<compile_context>
chip_gen: v5e
topology: v5e:2x2
jax: 0.10.0
libtpu: 0.0.40
codegen_flags: <defaults>
</compile_context>

<pallas_src>
import functools

import numpy as np
import jax
import jax.numpy as jnp
from jax.experimental import pallas as pl
from jax.experimental.pallas import tpu as pltpu

_HIGHEST = jax.lax.Precision.HIGHEST


def _sigmoid(v):
    return 1.0 / (1.0 + jnp.exp(-v))


def _dot(a, b):
    return jnp.dot(a, b, precision=_HIGHEST, preferred_element_type=jnp.float32)


def _cbam_kernel(x_ref, w1_ref, w2_ref, band_ref, padmask_ref, colsel_ref,
                 colselT_ref, rowmask_ref, out_ref, *, H, W):
    # x_ref/out_ref: (Nb, C, H*W)  lane-dense blocks
    # w1_ref, w2_ref: (C, C)                       1x1-conv MLP weights
    # band_ref:       (7, 2W, W)   per-kh band matrices (horizontal pad folded)
    # padmask_ref:    (H+6, 2*H*W) vertical-pad + unflatten row mask
    # colsel_ref:     (2*H*W, 2W)  unflatten column selector
    # colselT_ref:    (W, H*W)     re-flatten column selector
    # rowmask_ref:    (H, H*W)     re-flatten row mask
    Nb = x_ref.shape[0]
    HW = H * W
    Hp = H + 6

    w1 = w1_ref[...]
    w2 = w2_ref[...]
    padmask = padmask_ref[...]
    colsel = colsel_ref[...]
    colselT = colselT_ref[...]
    rowmask = rowmask_ref[...]

    for b in range(Nb):                       # Nb is a small static constant
        x = x_ref[b].astype(jnp.float32)      # (C, HW)

        # ---------------- Channel attention ----------------
        avg = jnp.mean(x, axis=1, keepdims=True)            # (C, 1)
        mx = jnp.max(x, axis=1, keepdims=True)               # (C, 1)
        pooled = jnp.concatenate([avg, mx], axis=1)          # (C, 2)
        h = jnp.maximum(_dot(w1, pooled), 0.0)               # shared MLP + ReLU
        o = _dot(w2, h)                                      # (C, 2)
        ca = _sigmoid(o[:, 0:1] + o[:, 1:2])                 # (C, 1)
        x1 = x * ca                                          # (C, HW)

        # ---------------- Spatial attention -----------------
        m = jnp.mean(x1, axis=0, keepdims=True)              # (1, HW)
        mm = jnp.max(x1, axis=0, keepdims=True)              # (1, HW)
        cat = jnp.concatenate([m, mm], axis=1)               # (1, 2*HW)

        # Vertical zero-pad + unflatten both maps in one MXU matmul:
        #   padded[r, ci*W + c] = map_ci[r-3, c] (0 outside), shape (H+6, 2W)
        bcast = jnp.broadcast_to(cat, (Hp, 2 * HW))
        padded = _dot(padmask * bcast, colsel)               # (Hp, 2W)

        # 7x7 conv (2 -> 1 channels) as 7 band matmuls on the MXU.
        acc = jnp.zeros((H, W), jnp.float32)
        for kh in range(7):
            acc = acc + _dot(padded[kh:kh + H, :], band_ref[kh])

        sa = _sigmoid(acc)                                   # (H, W)

        # Re-flatten sa to (1, HW) (MXU matmul + masked sublane reduce).
        tmp = _dot(sa, colselT)                              # (H, HW)
        sa_flat = jnp.sum(tmp * rowmask, axis=0, keepdims=True)   # (1, HW)

        out_ref[b] = (x1 * sa_flat).astype(out_ref.dtype)


def _build_constants(H, W, w_sa):
    """Host-precomputed selection / band matrices (float32 numpy)."""
    Hp = H + 6
    HW = H * W
    ws = np.asarray(w_sa, np.float32).reshape(2, 7, 7)

    # Band matrices: band[kh, ci*W + c, j] = ws[ci, kh, c - j + 3] if valid.
    c_idx = np.arange(W)[:, None]
    j_idx = np.arange(W)[None, :]
    kw = c_idx - j_idx + 3
    valid = (kw >= 0) & (kw < 7)
    kw_c = np.clip(kw, 0, 6)
    band = np.zeros((7, 2 * W, W), np.float32)
    for kh in range(7):
        for ci in range(2):
            band[kh, ci * W:(ci + 1) * W, :] = np.where(valid, ws[ci, kh, kw_c], 0.0)

    # Vertical-pad / unflatten: padmask (Hp, 2HW), colsel (2HW, 2W).
    q2 = np.arange(2 * HW)
    padmask = (((q2[None, :] % HW) // W) ==
               (np.arange(Hp)[:, None] - 3)).astype(np.float32)
    tgt_col = (q2 // HW) * W + (q2 % HW) % W
    colsel = (tgt_col[:, None] == np.arange(2 * W)[None, :]).astype(np.float32)

    # Re-flatten: colselT (W, HW), rowmask (H, HW).
    q = np.arange(HW)
    colselT = ((q[None, :] % W) == np.arange(W)[:, None]).astype(np.float32)
    rowmask = ((q[None, :] // W) == np.arange(H)[:, None]).astype(np.float32)

    return band, padmask, colsel, colselT, rowmask


def cbam_forward(x, w1, w2, w_sa, *, target_block_bytes=1 << 20):
    """x: (N, C, H, W); w1, w2: (C, C) 1x1-conv weights; w_sa: (1, 2, 7, 7)."""
    N, C, H, W = x.shape
    HW = H * W
    Hp = H + 6
    dtype = x.dtype
    itemsize = jnp.dtype(dtype).itemsize

    w1 = jnp.asarray(w1, dtype=jnp.float32)
    w2 = jnp.asarray(w2, dtype=jnp.float32)
    band, padmask, colsel, colselT, rowmask = _build_constants(H, W, np.asarray(w_sa))

    # Lane-dense layout for I/O (free reshape on contiguous NCHW).
    x_flat = x.reshape(N, C, HW)

    # Images per grid step: amortize per-step pipeline overhead, but keep at
    # least 2 grid steps when N >= 2 so both v7x TensorCores get work.
    Nb = 1
    img_bytes = C * HW * itemsize
    for nb in range(1, N + 1):
        if N % nb:
            continue
        if nb * img_bytes > target_block_bytes:
            break
        if N >= 2 and N // nb < 2:
            continue
        Nb = nb

    # Generation-aware VMEM budget (I/O double-buffered + resident constants
    # + in-kernel temporaries + fixed headroom), capped below physical VMEM.
    const_bytes = (band.size + padmask.size + colsel.size + colselT.size
                   + rowmask.size + 2 * C * C) * 4
    blk_bytes = Nb * C * HW * itemsize
    temp_bytes = 6 * C * HW * 4 + 24 * Hp * 2 * HW * 4
    est = 4 * blk_bytes + 2 * const_bytes + temp_bytes + (4 << 20)
    try:
        phys = int(pltpu.get_tpu_info().vmem_capacity_bytes)
    except Exception:
        phys = 64 << 20
    cap = int(phys * 0.8)
    vmem_limit = int(min(cap, max(32 << 20, est)))

    kernel = functools.partial(_cbam_kernel, H=H, W=W)
    out_flat = pl.pallas_call(
        kernel,
        out_shape=jax.ShapeDtypeStruct((N, C, HW), dtype),
        grid=(N // Nb,),
        in_specs=[
            pl.BlockSpec((Nb, C, HW), lambda n: (n, 0, 0)),
            pl.BlockSpec((C, C), lambda n: (0, 0)),
            pl.BlockSpec((C, C), lambda n: (0, 0)),
            pl.BlockSpec((7, 2 * W, W), lambda n: (0, 0, 0)),
            pl.BlockSpec((Hp, 2 * HW), lambda n: (0, 0)),
            pl.BlockSpec((2 * HW, 2 * W), lambda n: (0, 0)),
            pl.BlockSpec((W, HW), lambda n: (0, 0)),
            pl.BlockSpec((H, HW), lambda n: (0, 0)),
        ],
        out_specs=pl.BlockSpec((Nb, C, HW), lambda n: (n, 0, 0)),
        compiler_params=pltpu.CompilerParams(
            dimension_semantics=("parallel",),
            vmem_limit_bytes=vmem_limit),
    )(x_flat, w1, w2,
      jnp.asarray(band), jnp.asarray(padmask), jnp.asarray(colsel),
      jnp.asarray(colselT), jnp.asarray(rowmask))

    return out_flat.reshape(N, C, H, W)


def cbam_reference(x, w1, w2, w_sa):
    """Pure-JAX reference mirroring the PyTorch module."""
    hp = jax.lax.Precision.HIGHEST
    avg = jnp.mean(x, axis=(2, 3), keepdims=True)
    mx = jnp.max(x, axis=(2, 3), keepdims=True)

    def mlp(v):
        v = jnp.einsum('oc,nchw->nohw', w1, v, precision=hp)
        v = jnp.maximum(v, 0.0)
        return jnp.einsum('oc,nchw->nohw', w2, v, precision=hp)

    ca = jax.nn.sigmoid(mlp(avg) + mlp(mx))
    x1 = ca * x

    m = jnp.mean(x1, axis=1, keepdims=True)
    mm = jnp.max(x1, axis=1, keepdims=True)
    sin = jnp.concatenate([m, mm], axis=1)
    conv = jax.lax.conv_general_dilated(
        sin, w_sa, (1, 1), ((3, 3), (3, 3)),
        dimension_numbers=('NCHW', 'OIHW', 'NCHW'), precision=hp)
    sa = jax.nn.sigmoid(conv)
    return sa * x1


if __name__ == "__main__":
    key = jax.random.PRNGKey(0)
    k1, k2, k3, k4 = jax.random.split(key, 4)

    N, C, H, W = 2, 4, 16, 16       # planes = 4, ratio = 1
    x = jax.random.normal(k1, (N, C, H, W), jnp.float32)
    w1 = 0.5 * jax.random.normal(k2, (C, C), jnp.float32)          # Conv2d(C, C, 1)
    w2 = 0.5 * jax.random.normal(k3, (C, C), jnp.float32)          # Conv2d(C, C, 1)
    w_sa = 0.2 * jax.random.normal(k4, (1, 2, 7, 7), jnp.float32)  # Conv2d(2, 1, 7)

    out = cbam_forward(x, w1, w2, w_sa)
    jax.block_until_ready(out)

    ref = cbam_reference(x, w1, w2, w_sa)
    err = float(jnp.max(jnp.abs(out - ref)))
    assert jnp.allclose(out, ref, atol=1e-4, rtol=1e-4), f"max abs err {err}"

    print("KERNEL_OK")
</pallas_src>

<mosaic_0001>
module attributes {stable_mosaic.version = 11 : i64} {
  func.func @_cbam_kernel(%arg0: i32, %arg1: memref<1x4x256xf32, #tpu.memory_space<vmem>>, %arg2: memref<4x4xf32, #tpu.memory_space<vmem>>, %arg3: memref<4x4xf32, #tpu.memory_space<vmem>>, %arg4: memref<7x32x16xf32, #tpu.memory_space<vmem>>, %arg5: memref<22x512xf32, #tpu.memory_space<vmem>>, %arg6: memref<512x32xf32, #tpu.memory_space<vmem>>, %arg7: memref<16x256xf32, #tpu.memory_space<vmem>>, %arg8: memref<16x256xf32, #tpu.memory_space<vmem>>, %arg9: memref<1x4x256xf32, #tpu.memory_space<vmem>>) attributes {dimension_semantics = [#tpu.dimension_semantics<parallel>], iteration_bounds = array<i64: 2>, scalar_prefetch = 0 : i64, scratch_operands = 0 : i64, tpu.core_type = #tpu.core_type<tc>, window_params = [{transform_indices = @transform_0, window_bounds = array<i64: 1, 4, 256>}, {pipeline_mode = #tpu.pipeline_mode<synchronous>, transform_indices = @transform_1, window_bounds = array<i64: 4, 4>}, {pipeline_mode = #tpu.pipeline_mode<synchronous>, transform_indices = @transform_2, window_bounds = array<i64: 4, 4>}, {pipeline_mode = #tpu.pipeline_mode<synchronous>, transform_indices = @transform_3, window_bounds = array<i64: 7, 32, 16>}, {pipeline_mode = #tpu.pipeline_mode<synchronous>, transform_indices = @transform_4, window_bounds = array<i64: 22, 512>}, {pipeline_mode = #tpu.pipeline_mode<synchronous>, transform_indices = @transform_5, window_bounds = array<i64: 512, 32>}, {pipeline_mode = #tpu.pipeline_mode<synchronous>, transform_indices = @transform_6, window_bounds = array<i64: 16, 256>}, {pipeline_mode = #tpu.pipeline_mode<synchronous>, transform_indices = @transform_7, window_bounds = array<i64: 16, 256>}, {transform_indices = @transform_8, window_bounds = array<i64: 1, 4, 256>}]} {
    %c0 = arith.constant 0 : index
    %c0_0 = arith.constant 0 : index
    %0 = vector.load %arg2[%c0, %c0_0] : memref<4x4xf32, #tpu.memory_space<vmem>>, vector<4x4xf32>
    %c0_1 = arith.constant 0 : index
    %c0_2 = arith.constant 0 : index
    %1 = vector.load %arg3[%c0_1, %c0_2] : memref<4x4xf32, #tpu.memory_space<vmem>>, vector<4x4xf32>
    %c0_3 = arith.constant 0 : index
    %c0_4 = arith.constant 0 : index
    %2 = vector.load %arg5[%c0_3, %c0_4] : memref<22x512xf32, #tpu.memory_space<vmem>>, vector<22x512xf32>
    %c0_5 = arith.constant 0 : index
    %c0_6 = arith.constant 0 : index
    %3 = vector.load %arg6[%c0_5, %c0_6] : memref<512x32xf32, #tpu.memory_space<vmem>>, vector<512x32xf32>
    %c0_7 = arith.constant 0 : index
    %c0_8 = arith.constant 0 : index
    %4 = vector.load %arg7[%c0_7, %c0_8] : memref<16x256xf32, #tpu.memory_space<vmem>>, vector<16x256xf32>
    %c0_9 = arith.constant 0 : index
    %c0_10 = arith.constant 0 : index
    %5 = vector.load %arg8[%c0_9, %c0_10] : memref<16x256xf32, #tpu.memory_space<vmem>>, vector<16x256xf32>
    %c0_11 = arith.constant 0 : index
    %c0_12 = arith.constant 0 : index
    %c0_13 = arith.constant 0 : index
    %6 = vector.load %arg1[%c0_11, %c0_12, %c0_13] : memref<1x4x256xf32, #tpu.memory_space<vmem>>, vector<1x4x256xf32>
    %7 = vector.shape_cast %6 : vector<1x4x256xf32> to vector<4x256xf32>
    %cst = arith.constant dense<0.000000e+00> : vector<4xf32>
    %8 = vector.multi_reduction <add>, %7, %cst [1] : vector<4x256xf32> to vector<4xf32>
    %9 = vector.shape_cast %8 : vector<4xf32> to vector<4x1xf32>
    %cst_14 = arith.constant 2.560000e+02 : f32
    %10 = vector.broadcast %cst_14 : f32 to vector<4x1xf32>
    %11 = arith.divf %9, %10 : vector<4x1xf32>
    %cst_15 = arith.constant dense<0xFF800000> : vector<4xf32>
    %12 = vector.multi_reduction <maximumf>, %7, %cst_15 [1] : vector<4x256xf32> to vector<4xf32>
    %13 = vector.shape_cast %12 : vector<4xf32> to vector<4x1xf32>
    %14 = tpu.concatenate %11, %13 in 1 : vector<4x1xf32>, vector<4x1xf32> -> vector<4x2xf32>
    %cst_16 = arith.constant dense<0.000000e+00> : vector<4x2xf32>
    %15 = tpu.matmul %0, %14, %cst_16 {dimension_numbers = #tpu.dot_dimension_numbers<[1], [0], [0], [1], [0, 0, 1, 1], [], []>, precision = #tpu.contract_precision<fp32>} : vector<4x4xf32>, vector<4x2xf32>, vector<4x2xf32> -> vector<4x2xf32>
    %cst_17 = arith.constant 0.000000e+00 : f32
    %16 = vector.broadcast %cst_17 : f32 to vector<4x2xf32>
    %17 = arith.maximumf %15, %16 : vector<4x2xf32>
    %cst_18 = arith.constant dense<0.000000e+00> : vector<4x2xf32>
    %18 = tpu.matmul %1, %17, %cst_18 {dimension_numbers = #tpu.dot_dimension_numbers<[1], [0], [0], [1], [0, 0, 1, 1], [], []>, precision = #tpu.contract_precision<fp32>} : vector<4x4xf32>, vector<4x2xf32>, vector<4x2xf32> -> vector<4x2xf32>
    %19 = vector.extract_strided_slice %18 {offsets = [0, 0], sizes = [4, 1], strides = [1, 1]} : vector<4x2xf32> to vector<4x1xf32>
    %20 = vector.extract_strided_slice %18 {offsets = [0, 1], sizes = [4, 1], strides = [1, 1]} : vector<4x2xf32> to vector<4x1xf32>
    %21 = arith.addf %19, %20 : vector<4x1xf32>
    %cst_19 = arith.constant 0.000000e+00 : f32
    %22 = vector.broadcast %cst_19 : f32 to vector<4x1xf32>
    %23 = arith.subf %22, %21 : vector<4x1xf32>
    %24 = math.exp %23 : vector<4x1xf32>
    %cst_20 = arith.constant 1.000000e+00 : f32
    %25 = vector.broadcast %cst_20 : f32 to vector<4x1xf32>
    %26 = arith.addf %25, %24 : vector<4x1xf32>
    %cst_21 = arith.constant 1.000000e+00 : f32
    %27 = vector.broadcast %cst_21 : f32 to vector<4x1xf32>
    %28 = arith.divf %27, %26 : vector<4x1xf32>
    %29 = vector.broadcast %28 : vector<4x1xf32> to vector<4x256xf32>
    %30 = arith.mulf %7, %29 : vector<4x256xf32>
    %cst_22 = arith.constant dense<0.000000e+00> : vector<256xf32>
    %31 = vector.multi_reduction <add>, %30, %cst_22 [0] : vector<4x256xf32> to vector<256xf32>
    %32 = vector.shape_cast %31 : vector<256xf32> to vector<1x256xf32>
    %cst_23 = arith.constant 4.000000e+00 : f32
    %33 = vector.broadcast %cst_23 : f32 to vector<1x256xf32>
    %34 = arith.divf %32, %33 : vector<1x256xf32>
    %cst_24 = arith.constant dense<0xFF800000> : vector<256xf32>
    %35 = vector.multi_reduction <maximumf>, %30, %cst_24 [0] : vector<4x256xf32> to vector<256xf32>
    %36 = vector.shape_cast %35 : vector<256xf32> to vector<1x256xf32>
    %37 = tpu.concatenate %34, %36 in 1 : vector<1x256xf32>, vector<1x256xf32> -> vector<1x512xf32>
    %38 = vector.shape_cast %37 : vector<1x512xf32> to vector<1x512xf32>
    %39 = vector.broadcast %38 : vector<1x512xf32> to vector<22x512xf32>
    %40 = arith.mulf %2, %39 : vector<22x512xf32>
    %cst_25 = arith.constant dense<0.000000e+00> : vector<22x32xf32>
    %41 = tpu.matmul %40, %3, %cst_25 {dimension_numbers = #tpu.dot_dimension_numbers<[1], [0], [0], [1], [0, 0, 1, 1], [], []>, precision = #tpu.contract_precision<fp32>} : vector<22x512xf32>, vector<512x32xf32>, vector<22x32xf32> -> vector<22x32xf32>
    %cst_26 = arith.constant 0.000000e+00 : f32
    %42 = vector.broadcast %cst_26 : f32 to vector<16x16xf32>
    %43 = vector.extract_strided_slice %41 {offsets = [0, 0], sizes = [16, 32], strides = [1, 1]} : vector<22x32xf32> to vector<16x32xf32>
    %c0_27 = arith.constant 0 : index
    %c0_28 = arith.constant 0 : index
    %c0_29 = arith.constant 0 : index
    %44 = vector.load %arg4[%c0_27, %c0_28, %c0_29] : memref<7x32x16xf32, #tpu.memory_space<vmem>>, vector<1x32x16xf32>
    %45 = vector.shape_cast %44 : vector<1x32x16xf32> to vector<32x16xf32>
    %cst_30 = arith.constant dense<0.000000e+00> : vector<16x16xf32>
    %46 = tpu.matmul %43, %45, %cst_30 {dimension_numbers = #tpu.dot_dimension_numbers<[1], [0], [0], [1], [0, 0, 1, 1], [], []>, precision = #tpu.contract_precision<fp32>} : vector<16x32xf32>, vector<32x16xf32>, vector<16x16xf32> -> vector<16x16xf32>
    %47 = arith.addf %42, %46 : vector<16x16xf32>
    %48 = vector.extract_strided_slice %41 {offsets = [1, 0], sizes = [16, 32], strides = [1, 1]} : vector<22x32xf32> to vector<16x32xf32>
    %c1 = arith.constant 1 : index
    %c0_31 = arith.constant 0 : index
    %c0_32 = arith.constant 0 : index
    %49 = vector.load %arg4[%c1, %c0_31, %c0_32] : memref<7x32x16xf32, #tpu.memory_space<vmem>>, vector<1x32x16xf32>
    %50 = vector.shape_cast %49 : vector<1x32x16xf32> to vector<32x16xf32>
    %cst_33 = arith.constant dense<0.000000e+00> : vector<16x16xf32>
    %51 = tpu.matmul %48, %50, %cst_33 {dimension_numbers = #tpu.dot_dimension_numbers<[1], [0], [0], [1], [0, 0, 1, 1], [], []>, precision = #tpu.contract_precision<fp32>} : vector<16x32xf32>, vector<32x16xf32>, vector<16x16xf32> -> vector<16x16xf32>
    %52 = arith.addf %47, %51 : vector<16x16xf32>
    %53 = vector.extract_strided_slice %41 {offsets = [2, 0], sizes = [16, 32], strides = [1, 1]} : vector<22x32xf32> to vector<16x32xf32>
    %c2 = arith.constant 2 : index
    %c0_34 = arith.constant 0 : index
    %c0_35 = arith.constant 0 : index
    %54 = vector.load %arg4[%c2, %c0_34, %c0_35] : memref<7x32x16xf32, #tpu.memory_space<vmem>>, vector<1x32x16xf32>
    %55 = vector.shape_cast %54 : vector<1x32x16xf32> to vector<32x16xf32>
    %cst_36 = arith.constant dense<0.000000e+00> : vector<16x16xf32>
    %56 = tpu.matmul %53, %55, %cst_36 {dimension_numbers = #tpu.dot_dimension_numbers<[1], [0], [0], [1], [0, 0, 1, 1], [], []>, precision = #tpu.contract_precision<fp32>} : vector<16x32xf32>, vector<32x16xf32>, vector<16x16xf32> -> vector<16x16xf32>
    %57 = arith.addf %52, %56 : vector<16x16xf32>
    %58 = vector.extract_strided_slice %41 {offsets = [3, 0], sizes = [16, 32], strides = [1, 1]} : vector<22x32xf32> to vector<16x32xf32>
    %c3 = arith.constant 3 : index
    %c0_37 = arith.constant 0 : index
    %c0_38 = arith.constant 0 : index
    %59 = vector.load %arg4[%c3, %c0_37, %c0_38] : memref<7x32x16xf32, #tpu.memory_space<vmem>>, vector<1x32x16xf32>
    %60 = vector.shape_cast %59 : vector<1x32x16xf32> to vector<32x16xf32>
    %cst_39 = arith.constant dense<0.000000e+00> : vector<16x16xf32>
    %61 = tpu.matmul %58, %60, %cst_39 {dimension_numbers = #tpu.dot_dimension_numbers<[1], [0], [0], [1], [0, 0, 1, 1], [], []>, precision = #tpu.contract_precision<fp32>} : vector<16x32xf32>, vector<32x16xf32>, vector<16x16xf32> -> vector<16x16xf32>
    %62 = arith.addf %57, %61 : vector<16x16xf32>
    %63 = vector.extract_strided_slice %41 {offsets = [4, 0], sizes = [16, 32], strides = [1, 1]} : vector<22x32xf32> to vector<16x32xf32>
    %c4 = arith.constant 4 : index
    %c0_40 = arith.constant 0 : index
    %c0_41 = arith.constant 0 : index
    %64 = vector.load %arg4[%c4, %c0_40, %c0_41] : memref<7x32x16xf32, #tpu.memory_space<vmem>>, vector<1x32x16xf32>
    %65 = vector.shape_cast %64 : vector<1x32x16xf32> to vector<32x16xf32>
    %cst_42 = arith.constant dense<0.000000e+00> : vector<16x16xf32>
    %66 = tpu.matmul %63, %65, %cst_42 {dimension_numbers = #tpu.dot_dimension_numbers<[1], [0], [0], [1], [0, 0, 1, 1], [], []>, precision = #tpu.contract_precision<fp32>} : vector<16x32xf32>, vector<32x16xf32>, vector<16x16xf32> -> vector<16x16xf32>
    %67 = arith.addf %62, %66 : vector<16x16xf32>
    %68 = vector.extract_strided_slice %41 {offsets = [5, 0], sizes = [16, 32], strides = [1, 1]} : vector<22x32xf32> to vector<16x32xf32>
    %c5 = arith.constant 5 : index
    %c0_43 = arith.constant 0 : index
    %c0_44 = arith.constant 0 : index
    %69 = vector.load %arg4[%c5, %c0_43, %c0_44] : memref<7x32x16xf32, #tpu.memory_space<vmem>>, vector<1x32x16xf32>
    %70 = vector.shape_cast %69 : vector<1x32x16xf32> to vector<32x16xf32>
    %cst_45 = arith.constant dense<0.000000e+00> : vector<16x16xf32>
    %71 = tpu.matmul %68, %70, %cst_45 {dimension_numbers = #tpu.dot_dimension_numbers<[1], [0], [0], [1], [0, 0, 1, 1], [], []>, precision = #tpu.contract_precision<fp32>} : vector<16x32xf32>, vector<32x16xf32>, vector<16x16xf32> -> vector<16x16xf32>
    %72 = arith.addf %67, %71 : vector<16x16xf32>
    %73 = vector.extract_strided_slice %41 {offsets = [6, 0], sizes = [16, 32], strides = [1, 1]} : vector<22x32xf32> to vector<16x32xf32>
    %c6 = arith.constant 6 : index
    %c0_46 = arith.constant 0 : index
    %c0_47 = arith.constant 0 : index
    %74 = vector.load %arg4[%c6, %c0_46, %c0_47] : memref<7x32x16xf32, #tpu.memory_space<vmem>>, vector<1x32x16xf32>
    %75 = vector.shape_cast %74 : vector<1x32x16xf32> to vector<32x16xf32>
    %cst_48 = arith.constant dense<0.000000e+00> : vector<16x16xf32>
    %76 = tpu.matmul %73, %75, %cst_48 {dimension_numbers = #tpu.dot_dimension_numbers<[1], [0], [0], [1], [0, 0, 1, 1], [], []>, precision = #tpu.contract_precision<fp32>} : vector<16x32xf32>, vector<32x16xf32>, vector<16x16xf32> -> vector<16x16xf32>
    %77 = arith.addf %72, %76 : vector<16x16xf32>
    %cst_49 = arith.constant 0.000000e+00 : f32
    %78 = vector.broadcast %cst_49 : f32 to vector<16x16xf32>
    %79 = arith.subf %78, %77 : vector<16x16xf32>
    %80 = math.exp %79 : vector<16x16xf32>
    %cst_50 = arith.constant 1.000000e+00 : f32
    %81 = vector.broadcast %cst_50 : f32 to vector<16x16xf32>
    %82 = arith.addf %81, %80 : vector<16x16xf32>
    %cst_51 = arith.constant 1.000000e+00 : f32
    %83 = vector.broadcast %cst_51 : f32 to vector<16x16xf32>
    %84 = arith.divf %83, %82 : vector<16x16xf32>
    %cst_52 = arith.constant dense<0.000000e+00> : vector<16x256xf32>
    %85 = tpu.matmul %84, %4, %cst_52 {dimension_numbers = #tpu.dot_dimension_numbers<[1], [0], [0], [1], [0, 0, 1, 1], [], []>, precision = #tpu.contract_precision<fp32>} : vector<16x16xf32>, vector<16x256xf32>, vector<16x256xf32> -> vector<16x256xf32>
    %86 = arith.mulf %85, %5 : vector<16x256xf32>
    %cst_53 = arith.constant dense<0.000000e+00> : vector<256xf32>
    %87 = vector.multi_reduction <add>, %86, %cst_53 [0] : vector<16x256xf32> to vector<256xf32>
    %88 = vector.shape_cast %87 : vector<256xf32> to vector<1x256xf32>
    %89 = vector.broadcast %88 : vector<1x256xf32> to vector<4x256xf32>
    %90 = arith.mulf %30, %89 : vector<4x256xf32>
    %c0_54 = arith.constant 0 : index
    %c0_55 = arith.constant 0 : index
    %c0_56 = arith.constant 0 : index
    %91 = vector.load %arg9[%c0_54, %c0_55, %c0_56] : memref<1x4x256xf32, #tpu.memory_space<vmem>>, vector<1x4x256xf32>
    %92 = vector.shape_cast %91 : vector<1x4x256xf32> to vector<4x256xf32>
    %93 = vector.shape_cast %90 : vector<4x256xf32> to vector<1x4x256xf32>
    tpu.vector_store %arg9[%c0_54, %c0_55, %c0_56], %93 {strides = array<i32>} : memref<1x4x256xf32, #tpu.memory_space<vmem>>, vector<1x4x256xf32>,
    return
  }
  func.func @transform_0(%arg0: i32) -> (i32, i32, i32) {
    %c0_i32 = arith.constant 0 : i32
    %c0_i32_0 = arith.constant 0 : i32
    %c0_i32_1 = arith.constant 0 : i32
    return %arg0, %c0_i32, %c0_i32_0 : i32, i32, i32
  }
  func.func @transform_1(%arg0: i32) -> (i32, i32) {
    %c0_i32 = arith.constant 0 : i32
    %c0_i32_0 = arith.constant 0 : i32
    %c0_i32_1 = arith.constant 0 : i32
    return %c0_i32, %c0_i32_0 : i32, i32
  }
  func.func @transform_2(%arg0: i32) -> (i32, i32) {
    %c0_i32 = arith.constant 0 : i32
    %c0_i32_0 = arith.constant 0 : i32
    %c0_i32_1 = arith.constant 0 : i32
    return %c0_i32, %c0_i32_0 : i32, i32
  }
  func.func @transform_3(%arg0: i32) -> (i32, i32, i32) {
    %c0_i32 = arith.constant 0 : i32
    %c0_i32_0 = arith.constant 0 : i32
    %c0_i32_1 = arith.constant 0 : i32
    %c0_i32_2 = arith.constant 0 : i32
    return %c0_i32, %c0_i32_0, %c0_i32_1 : i32, i32, i32
  }
  func.func @transform_4(%arg0: i32) -> (i32, i32) {
    %c0_i32 = arith.constant 0 : i32
    %c0_i32_0 = arith.constant 0 : i32
    %c0_i32_1 = arith.constant 0 : i32
    return %c0_i32, %c0_i32_0 : i32, i32
  }
  func.func @transform_5(%arg0: i32) -> (i32, i32) {
    %c0_i32 = arith.constant 0 : i32
    %c0_i32_0 = arith.constant 0 : i32
    %c0_i32_1 = arith.constant 0 : i32
    return %c0_i32, %c0_i32_0 : i32, i32
  }
  func.func @transform_6(%arg0: i32) -> (i32, i32) {
    %c0_i32 = arith.constant 0 : i32
    %c0_i32_0 = arith.constant 0 : i32
    %c0_i32_1 = arith.constant 0 : i32
    return %c0_i32, %c0_i32_0 : i32, i32
  }
  func.func @transform_7(%arg0: i32) -> (i32, i32) {
    %c0_i32 = arith.constant 0 : i32
    %c0_i32_0 = arith.constant 0 : i32
    %c0_i32_1 = arith.constant 0 : i32
    return %c0_i32, %c0_i32_0 : i32, i32
  }
  func.func @transform_8(%arg0: i32) -> (i32, i32, i32) {
    %c0_i32 = arith.constant 0 : i32
    %c0_i32_0 = arith.constant 0 : i32
    %c0_i32_1 = arith.constant 0 : i32
    return %arg0, %c0_i32, %c0_i32_0 : i32, i32, i32
  }
}

</mosaic_0001>

<bundles_post_ra>
// kernel: tpu_custom_call.1
= control target key start
LH: loop header
LB: loop body
LE: loop exit
PB: predicated region body
PF: predicated region fallthrough
CT: control target
= control target key end

     0   :  { %13 = vsyncpa [#allocation3], 0  ;;  %s6961_s0 = inlined_call_operand.vmem [shape: f32[2,4,256], index: 0, kind: input, shape index: {}]   ;;  %s6962_s1 = inlined_call_operand.vmem [shape: f32[4,4], index: 1, kind: input, shape index: {}]   ;;  %s6963_s2 = inlined_call_operand.vmem [shape: f32[4,4], index: 2, kind: input, shape index: {}]   ;;  %s6964_s3 = inlined_call_operand.vmem [shape: f32[7,32,16], index: 3, kind: input, shape index: {}]   ;;  %s6965_s4 = inlined_call_operand.vmem [shape: f32[22,512], index: 4, kind: input, shape index: {}]   ;;  %s6966_s5 = inlined_call_operand.vmem [shape: f32[512,32], index: 5, kind: input, shape index: {}]   ;;  %s6967_s6 = inlined_call_operand.vmem [shape: f32[16,256], index: 6, kind: input, shape index: {}]   ;;  %s6968_s7 = inlined_call_operand.vmem [shape: f32[16,256], index: 7, kind: input, shape index: {}]   ;;  %s6969_s8 = inlined_call_operand.hbm [shape: f32[2,4,256], index: 8, kind: output, shape index: {}]  }
   0x1   :  { %15 = vsyncpa [#allocation3 + $0x1], 0  ;;  %s4802_s27 = smov 0   ;;  %s4804_s28 = smov 0  }
   0x2   :  { %s4806_s29 = smov 0   ;;  %s4808_s30 = smov 0  }
   0x3 LB: > { %s4823_s9 = sadd.s32 4294967295, %s4750_s30   ;;  %s4588_s10 = sadd.s32 4294967294, %s4750_s30   ;;  %s4750_s30 = sphi %s4808_s30, %s7058_s30   ;;  %s4746_s29 = sphi %s4806_s29, %s7057_s29   ;;  %s4742_s28 = sphi %s4804_s28, %s7056_s28   ;;  %s4738_s27 = sphi %s4802_s27, %s7055_s27  }
   0x4   : > { %s4827_s11 = sadd.s32 1, %s4750_s30   ;;  %s201_s12 = sadd.s32 1, %s4746_s29 }
   0x5   : > { %s198_s13 = ssub.s32 %s4750_s30, %s4827_s11  ;;  %p211_p0 = scmp.ne.s32.totalorder %s4746_s29, %s4742_s28 }
   0x6   : > { %p199_p1 = scmp.eq.s32.totalorder %s198_s13, 0  ;;  %p212_p2 = scmp.eq.s32.totalorder %s4823_s9, 1 }
   0x7   : > { %p217_p3 = scmp.ne.s32.totalorder %s4742_s28, %s4738_s27  ;;  %p218_p4 = scmp.eq.s32.totalorder %s4588_s10, 1 }
   0x8   : > { %s4838_s14 = scalar_select %p199_p1, %s4746_s29, %s201_s12  }
   0x9   : > { %p4840_p5 = por %p212_p2, %p211_p0  ;;  %p4844_p6 = por %p218_p4, %p217_p3 }
   0xa   : > { %p4591_p7 = scmp.ge.s32.totalorder %s4750_s30, 1  ;;  %p265_p8 = scmp.lt.s32.totalorder %s4750_s30, 3 }
   0xc   : > { %p266_p9 = pnand %p4591_p7, %p265_p8 }
   0xe   : > { %269 = sbr.rel (%p266_p9) target bundleno = 1629 (0x65d), region = 52 }
  0x13   : > { %p299_p10 = scmp.lt.s32.totalorder %s4823_s9, 1  ;;  %vm397_vm0 = vcmask 1043456   ;;  %v4752_v11 = vmov 256.0   ;;  %v304_v14 = vld [vmem:[%s6962_s1] sm:$0xf]  ;;  %vm423_vm1 = vcmask 31744  }
  0x14   : > { %4672 = vrcp.f32 %v4752_v11  ;;  %v425_v15 = vsel %vm423_vm1, %v304_v14, 0  ;;  %vm421_vm3 = vcmask 7168   ;;  %v305_v36 = vld [vmem:[%s6963_s2] sm:$0xf]  ;;  %s4753_s26 = smov 127   ;;  %v333_v11 = vld [vmem:[%s6966_s5 + $0x78] sm:$0xff] }
  0x15   : > { %s300_s17 = scalar_select %p299_p10, %s4823_s9, 1  ;;  %v447_v17 = vand.u32 4294901760, %v425_v15  ;;  %v578_v37 = vsel %vm423_vm1, %v305_v36, 0  ;;  %v4882_v14 = vand.u32 4294901760, %v333_v11  ;;  %v326_v36 = vld [vmem:[%s6966_s5 + $0x40] sm:$0xff]  ;;  %vm2451_vm9 = vcmask 1046528  }
  0x16   : > { %v600_v39 = vand.u32 4294901760, %v578_v37  ;;  %vm2457_vm10 = vcmask 261120   ;;  %vm3601_vm11 = vcmask 1042432   ;;  %vm3834_vm12 = vcmask 1041408   ;;  %s4625_s19 = sshll.u32 %s4823_s9, 3 }
  0x17   : > { %s4624_s18 = sshll.u32 %s300_s17, 3  ;;  %v448_v19 = vsub.f32 %v425_v15, %v447_v17  ;;  %vm2903_vm13 = vcmask 1045504   ;;  %vm3136_vm14 = vcmask 1044480   ;;  %s296_s17 = sand.u32 1, %s4742_s28  }
  0x18   : > { %s303_s21 = scalar_lea.vmem %s6961_s0, %s4624_s18  ;;  %v601_v42 = vsub.f32 %v578_v37, %v600_v39  ;;  %s4592_s18 = sshll.u32 %s296_s17, 3 }
  0x19   : > { %v4855_v0 = vld [vmem:[%s303_s21] sm:$0xff]  ;;  %v449_v22 = vand.u32 4294901760, %v448_v19  ;;  %s4524_s22 = scalar_lea.hbm %s6969_s8, %s4625_s19  ;;  %s298_s23 = scalar_lea.vmem [#allocation2], %s4592_s18 }
  0x1a   : > { %392 = vst [vmem:[#allocation1] ss:$2 sm:$0xff] %v4855_v0  ;;  %v4673_v12 = vpop.eup %4672  ;;  %v602_v47 = vand.u32 4294901760, %v601_v42  ;;  %s4526_s24 = sshll.u32 %s298_s23, 4  ;;  %s4528_s25 = sshll.u32 %s4524_s22, 4  ;;  %s4527_s24 = int_to_ptr.vmem [resolvable:$true] %s4526_s24  ;;  %s4529_s25 = int_to_ptr.hbm [resolvable:$true] %s4528_s25 }
  0x1b   : > { %v404_v13 = vmul.f32 256.0, %v4673_v12  ;;  %vm408_vm2 = vweird.f32 %v4673_v12  ;;  %v450_v24 = vsub.f32 %v448_v19, %v449_v22  ;;  %s4513_s9 = scalar_lea.sflag [#allocation3], %s296_s17  ;;  %s4708_s18 = scalar_lea.hbm %s6969_s8, 16 }
  0x1c   : > { %v603_v51 = vsub.f32 %v601_v42, %v602_v47 }
  0x1d   : > { %v405_v16 = vsub.f32 1.0, %v404_v13  ;;  %v451_v29 = vand.u32 4294901760, %v450_v24  ;;  %v331_v13 = vld [vmem:[%s6966_s5 + $0x68] sm:$0xff] }
  0x1e   : > { %v604_v54 = vand.u32 4294901760, %v603_v51  ;;  %v327_v24 = vld [vmem:[%s6966_s5 + $0x48] sm:$0xff] }
  0x1f   : > { %v406_v18 = vmul.f32 %v4673_v12, %v405_v16  ;;  %v4886_v16 = vand.u32 4294901760, %v331_v13 }
  0x21   : > { %v393_v1 = vld.sshfl [vmem:[#allocation1] sm:$0xff pattern:$0x75316420]  ;;  %v394_v2 = vld.sshfl [vmem:[#allocation1 + $0x8] sm:$0xff pattern:$0x75316420]  ;;  %v407_v20 = vadd.f32 %v4673_v12, %v406_v18 }
  0x22   : > { %v398_v3 = vsel %vm397_vm0, %v393_v1, 0.0  ;;  %v399_v4 = vsel %vm397_vm0, %v394_v2, 0.0  ;;  %411 = vst [vmem:[#allocation1] ss:$2 sm:$0xff] %v4855_v0  ;;  %v329_v18 = vld [vmem:[%s6966_s5 + $0x58] sm:$0xff] }
  0x23   : > { %v400_v5 = vadd.f32 %v399_v4, %v398_v3  ;;  %v409_v23 = vsel %vm408_vm2, %v4673_v12, %v407_v20  ;;  %v332_v12 = vld [vmem:[%s6966_s5 + $0x70] sm:$0xff] }
  0x24   : > { %v4884_v15 = vand.u32 4294901760, %v332_v12 }
  0x25   : > { %401 = vadd.xlane.f32.xlu0 %v400_v5 }
  0x29   : > { %v412_v6 = vld.sshfl [vmem:[#allocation1] sm:$0xff pattern:$0x75316420]  ;;  %v413_v7 = vld.sshfl [vmem:[#allocation1 + $0x8] sm:$0xff pattern:$0x75316420] }
  0x2a   : > { %v416_v8 = vsel %vm397_vm0, %v412_v6, -inf  ;;  %v417_v9 = vsel %vm397_vm0, %v413_v7, -inf }
  0x2b   : > { %v418_v10 = vmax.f32 %v416_v8, %v417_v9  ;;  %v4754_v8 = vmov 0  }
  0x2c   : > { %4670 = vset.pattern.permute.xlu1 %v4754_v8  ;;  %4671 = vset.pattern.permute.xlu0 %v4754_v8 }
  0x2d   : > { %419 = vmax.xlane.f32.xlu0 %v418_v10 }
  0x98   : > { %v402_v21 = vpop.xlane.xlu0 %401 }
  0x99   : > { %v410_v25 = vmul.f32 %v409_v23, %v402_v21 }
  0xa0   : > { %v420_v26 = vpop.xlane.xlu0 %419 }
  0xa1   : > { %v422_v27 = vsel %vm421_vm3, %v410_v25, %v420_v26  ;;  %v4907_v25 = vsub.f32 %v333_v11, %v4882_v14  ;;  %v4910_v26 = vsub.f32 %v332_v12, %v4884_v15  ;;  %v319_v12 = vld [vmem:[%s6966_s5 + $0x8] sm:$0xff]  ;;  %vm4100_vm3 = vcmask 130048  }
  0xa2   : > { %v428_v28 = vsel %vm397_vm0, %v422_v27, 0  ;;  %v4913_v27 = vsub.f32 %v331_v13, %v4886_v16 }
  0xa3   : > { %v445_v30 = vand.u32 4294901760, %v428_v28 }
  0xa5   : > { %v472_v31 = vsub.f32 %v428_v28, %v445_v30  ;;  %446 = vmatpush.msra.mxu2 %v445_v30  ;;  %570 = vmatpush.msra.mxu1 %v445_v30  ;;  %v4917_v28 = vand.u32 4294901760, %v327_v24 }
  0xa6   : > { %452 = vmatmul.f32.vlgmr.msra.gmra.mxu2 %v451_v29  ;;  %572 = vmatmul.f32.vlgmr.msra.gmra.mxu1 %v447_v17 }
  0xa7   : > { %499 = vmatpush.msrb.mxu2 %v472_v31  ;;  %v473_v32 = vand.u32 4294901760, %v472_v31 }
  0xa9   : > { %548 = vmatpush.msra.mxu0 %v473_v32  ;;  %v474_v33 = vsub.f32 %v472_v31, %v473_v32 }
  0xaa   : > { %550 = vmatmul.f32.vlgmr.msra.gmra.mxu0 %v447_v17 }
  0xab   : > { %v475_v34 = vand.u32 4294901760, %v474_v33  ;;  %v886_v33 = vand.u32 4294901760, %v4907_v25 }
  0xad   : > { %476 = vmatpush.msra.mxu3 %v475_v34  ;;  %v892_v34 = vand.u32 4294901760, %v4910_v26 }
  0xae   : > { %478 = vmatmul.f32.vlgmr.msra.gmra.mxu3 %v447_v17  ;;  %502 = vmatmul.f32.vlgmr.msrb.gmra.mxu2 %v448_v19  ;;  %v330_v17 = vld [vmem:[%s6966_s5 + $0x60] sm:$0xff]  ;;  %v328_v19 = vld [vmem:[%s6966_s5 + $0x50] sm:$0xff] }
  0xaf   : > { %522 = vmatpush.msrb.mxu3 %v445_v30  ;;  %v4897_v21 = vand.u32 4294901760, %v330_v17  ;;  %v4901_v23 = vand.u32 4294901760, %v328_v19 }
  0xb1   : > { %v4920_v30 = vsub.f32 %v330_v17, %v4897_v21  ;;  %v4926_v32 = vsub.f32 %v328_v19, %v4901_v23 }
  0xb3   : > { %v904_v37 = vand.u32 4294901760, %v4920_v30 }
  0xb6   : > { %526 = vmatmul.f32.vlgmr.msrb.gmra.mxu3 %v449_v22  ;;  %v4899_v22 = vand.u32 4294901760, %v329_v18 }
  0xb8   : > { %v4923_v31 = vsub.f32 %v329_v18, %v4899_v22 }
 0x123   : > { %v573_v48 = vpop.f32.mrf.mxu1 }
 0x127   : > { %v551_v45 = vpop.f32.mrf.mxu0 }
 0x129   : > { %v453_v35 = vpop.f32.mrf.mxu2 }
 0x131   : > { %v479_v38 = vpop.f32.mrf.mxu3  ;;  %v503_v41 = vpop.f32.mrf.mxu2 }
 0x132   : > { %v480_v40 = vadd.f32 %v479_v38, %v453_v35  ;;  %v898_v35 = vand.u32 4294901760, %v4913_v27  ;;  %v910_v38 = vand.u32 4294901760, %v4923_v31 }
 0x134   : > { %v504_v43 = vadd.f32 %v503_v41, %v480_v40  ;;  %v887_v40 = vsub.f32 %v4907_v25, %v886_v33  ;;  %v893_v41 = vsub.f32 %v4910_v26, %v892_v34  ;;  %v911_v51 = vsub.f32 %v4923_v31, %v910_v38 }
 0x139   : > { %v527_v44 = vpop.f32.mrf.mxu3 }
 0x13a   : > { %v528_v46 = vadd.f32 %v527_v44, %v504_v43  ;;  %v905_v43 = vsub.f32 %v4920_v30, %v904_v37  ;;  %v916_v44 = vand.u32 4294901760, %v4926_v32 }
 0x13c   : > { %v552_v49 = vadd.f32 %v551_v45, %v528_v46  ;;  %v4958_v45 = vand.u32 4294901760, %v326_v36  ;;  %v325_v46 = vld [vmem:[%s6966_s5 + $0x38] sm:$0xff] }
 0x13e   : > { %v574_v50 = vadd.f32 %v573_v48, %v552_v49  ;;  %v323_v48 = vld [vmem:[%s6966_s5 + $0x28] sm:$0xff]  ;;  %v888_v49 = vand.u32 4294901760, %v887_v40  ;;  %v5050_v40 = vand.u32 4294901760, %v319_v12 }
 0x140   : > { %v576_v52 = vmax.f32 %v574_v50, 0.0  ;;  %v894_v50 = vand.u32 4294901760, %v893_v41 }
 0x142   : > { %v581_v53 = vsel %vm397_vm0, %v576_v52, 0 }
 0x143   : > { %v598_v55 = vand.u32 4294901760, %v581_v53 }
 0x145   : > { %599 = vmatpush.msra.mxu2 %v598_v55  ;;  %675 = vmatpush.msrb.mxu1 %v598_v55  ;;  %v625_v56 = vsub.f32 %v581_v53, %v598_v55  ;;  %v4977_v53 = vsub.f32 %v326_v36, %v4958_v45 }
 0x146   : > { %605 = vmatmul.f32.vlgmr.msra.gmra.mxu2 %v604_v54  ;;  %679 = vmatmul.f32.vlgmr.msrb.gmra.mxu1 %v602_v47  ;;  %v324_v47 = vld [vmem:[%s6966_s5 + $0x30] sm:$0xff]  ;;  %v322_v54 = vld [vmem:[%s6966_s5 + $0x20] sm:$0xff] }
 0x147   : > { %652 = vmatpush.msrb.mxu0 %v625_v56  ;;  %v626_v57 = vand.u32 4294901760, %v625_v56  ;;  %889 = vmatpush.msra.mxu1 %v888_v49 }
 0x148   : > { %655 = vmatmul.f32.vlgmr.msrb.gmra.mxu0 %v601_v42  ;;  %v899_v42 = vsub.f32 %v4913_v27, %v898_v35 }
 0x149   : > { %701 = vmatpush.msrb.mxu2 %v626_v57  ;;  %v627_v58 = vsub.f32 %v625_v56, %v626_v57  ;;  %828 = vmatpush.msra.mxu0 %v4882_v14  ;;  %v4983_v56 = vand.u32 4294901760, %v325_v46  ;;  %v4985_v57 = vand.u32 4294901760, %v324_v47 }
 0x14a   : > { %895 = vmatpush.msra.mxu1 %v894_v50 }
 0x14b   : > { %v628_v59 = vand.u32 4294901760, %v627_v58  ;;  %995 = vmatpush.msra.mxu2 %v4907_v25  ;;  %830 = vmatpush.msra.mxu0 %v4884_v15  ;;  %v4987_v58 = vand.u32 4294901760, %v323_v48  ;;  %v348_v25 = vld [vmem:[%s6966_s5 + $0xf0] sm:$0xff] }
 0x14d   : > { %629 = vmatpush.msra.mxu3 %v628_v59  ;;  %998 = vmatpush.msra.mxu2 %v4910_v26  ;;  %v5020_v8 = vsub.f32 %v323_v48, %v4987_v58 }
 0x14e   : > { %631 = vmatmul.f32.vlgmr.msra.gmra.mxu3 %v600_v39  ;;  %703 = vmatmul.f32.vlgmr.msrb.gmra.mxu2 %v600_v39 }
 0x14f   : > { %723 = vmatpush.msrb.mxu3 %v598_v55  ;;  %832 = vmatpush.msra.mxu0 %v4886_v16  ;;  %v900_v55 = vand.u32 4294901760, %v899_v42 }
 0x150   : > { %1001 = vmatpush.msra.mxu2 %v4913_v27  ;;  %v346_v27 = vld [vmem:[%s6966_s5 + $0xe0] sm:$0xff] }
 0x151   : > { %1058 = vmatpush.msra.mxu3 %v4882_v14  ;;  %834 = vmatpush.msra.mxu0 %v4897_v21 }
 0x152   : > { %1004 = vmatpush.msra.mxu2 %v4920_v30  ;;  %901 = vmatpush.msra.mxu1 %v900_v55 }
 0x153   : > { %1060 = vmatpush.msra.mxu3 %v4884_v15  ;;  %836 = vmatpush.msra.mxu0 %v4899_v22 }
 0x154   : > { %1007 = vmatpush.msra.mxu2 %v4923_v31  ;;  %v341_v31 = vld [vmem:[%s6966_s5 + $0xb8] sm:$0xff] }
 0x155   : > { %1062 = vmatpush.msra.mxu3 %v4886_v16  ;;  %838 = vmatpush.msra.mxu0 %v4901_v23 }
 0x156   : > { %725 = vmatmul.f32.vlgmr.msrb.gmra.mxu3 %v600_v39  ;;  %v4940_v39 = vsub.f32 %v327_v24, %v4917_v28  ;;  %1010 = vmatpush.msra.mxu2 %v4926_v32 }
 0x157   : > { %1064 = vmatpush.msra.mxu3 %v4897_v21  ;;  %840 = vmatpush.msra.mxu0 %v4917_v28 }
 0x158   : > { %v922_v52 = vand.u32 4294901760, %v4940_v39  ;;  %1013 = vmatpush.msra.mxu2 %v4940_v39 }
 0x159   : > { %1066 = vmatpush.msra.mxu3 %v4899_v22  ;;  %842 = vmatpush.msra.mxu0 %v4958_v45 }
 0x15a   : > { %1016 = vmatpush.msra.mxu2 %v4977_v53 }
 0x15b   : > { %1068 = vmatpush.msra.mxu3 %v4901_v23  ;;  %844 = vmatpush.msra.mxu0 %v4983_v56 }
 0x15d   : > { %1070 = vmatpush.msra.mxu3 %v4917_v28  ;;  %846 = vmatpush.msra.mxu0 %v4985_v57 }
 0x15f   : > { %1072 = vmatpush.msra.mxu3 %v4958_v45  ;;  %848 = vmatpush.msra.mxu0 %v4987_v58 }
 0x161   : > { %1074 = vmatpush.msra.mxu3 %v4983_v56 }
 0x163   : > { %1076 = vmatpush.msra.mxu3 %v4985_v57 }
 0x165   : > { %1078 = vmatpush.msra.mxu3 %v4987_v58 }
 0x1c3   : > { %v680_v1 = vpop.f32.mrf.mxu1 }
 0x1c5   : > { %v656_v62 = vpop.f32.mrf.mxu0 }
 0x1c9   : > { %v606_v60 = vpop.f32.mrf.mxu2 }
 0x1d1   : > { %v632_v61 = vpop.f32.mrf.mxu3  ;;  %v704_v3 = vpop.f32.mrf.mxu2 }
 0x1d2   : > { %v633_v63 = vadd.f32 %v632_v61, %v606_v60  ;;  %v906_v60 = vand.u32 4294901760, %v905_v43  ;;  %v917_v61 = vsub.f32 %v4926_v32, %v916_v44 }
 0x1d4   : > { %v657_v2 = vadd.f32 %v656_v62, %v633_v63  ;;  %v928_v62 = vand.u32 4294901760, %v4977_v53  ;;  %v321_v63 = vld [vmem:[%s6966_s5 + $0x18] sm:$0xff]  ;;  %907 = vmatpush.msra.mxu1 %v906_v60 }
 0x1d6   : > { %v681_v4 = vadd.f32 %v680_v1, %v657_v2  ;;  %v5002_v2 = vsub.f32 %v325_v46, %v4983_v56  ;;  %v929_v13 = vsub.f32 %v4977_v53, %v928_v62 }
 0x1d8   : > { %v705_v5 = vadd.f32 %v704_v3, %v681_v4  ;;  %v5005_v3 = vsub.f32 %v324_v47, %v4985_v57  ;;  %v5007_v4 = vand.u32 4294901760, %v322_v54  ;;  %v934_v11 = vand.u32 4294901760, %v5002_v2  ;;  %1019 = vmatpush.msra.mxu2 %v5002_v2 }
 0x1d9   : > { %v726_v6 = vpop.f32.mrf.mxu3  ;;  %v930_v42 = vand.u32 4294901760, %v929_v13 }
 0x1da   : > { %v727_v7 = vadd.f32 %v726_v6, %v705_v5  ;;  %v923_v5 = vsub.f32 %v4940_v39, %v922_v52  ;;  %v320_v6 = vld [vmem:[%s6966_s5 + $0x10] sm:$0xff]  ;;  %v940_v17 = vand.u32 4294901760, %v5005_v3  ;;  %v5036_v18 = vsub.f32 %v322_v54, %v5007_v4  ;;  %1022 = vmatpush.msra.mxu2 %v5005_v3  ;;  %1080 = vmatpush.msra.mxu3 %v5007_v4 }
 0x1db   : > { %v5038_v19 = vand.u32 4294901760, %v320_v6  ;;  %v935_v24 = vsub.f32 %v5002_v2, %v934_v11  ;;  %v5071_v54 = vsub.f32 %v319_v12, %v5050_v40  ;;  %850 = vmatpush.msra.mxu0 %v5007_v4 }
 0x1dc   : > { %730 = vrot.lane.b32.xlu1 %v727_v7, %s4753_s26  ;;  %v941_v43 = vsub.f32 %v5005_v3, %v940_v17  ;;  %v952_v46 = vand.u32 4294901760, %v5036_v18  ;;  %1025 = vmatpush.msra.mxu2 %v5020_v8  ;;  %s4702_s26 = sshra.s32 %s4529_s25, 4  ;;  %s4703_s26 = int_to_ptr.hbm [resolvable:$true] %s4702_s26 }
 0x1dd   : > { %v5060_v47 = vsub.f32 %v320_v6, %v5038_v19  ;;  %v936_v49 = vand.u32 4294901760, %v935_v24  ;;  %v970_v12 = vand.u32 4294901760, %v5071_v54  ;;  %s4704_s10 = scalar_lea.hbm %s4703_s26, 8  ;;  %p4709_p0 = scmp.lt.s32.totalorder %s4703_s26, %s6969_s8 }
 0x1de   : > { %v942_v60 = vand.u32 4294901760, %v941_v43  ;;  %1028 = vmatpush.msra.mxu2 %v5036_v18  ;;  %p4705_p11 = scmp.ne.s32.totalorder %s4703_s26, %s4704_s10  ;;  %p4710_p1 = scmp.lt.s32.totalorder %s4708_s18, %s4704_s10 }
 0x1e0   : > { %p4706_p12 = pnand %p4705_p11, %p4840_p5  ;;  %p4711_p2 = por %p4710_p1, %p4709_p0 }
 0x1e2   : > { %p4707_p13 = pneg %p4706_p12 }
 0x1e4   : > { %p4712_p3 = pnand %p4711_p2, %p4707_p13 }
 0x24e   : > { %v731_v9 = vpop.permute.xlu1 %730 }
 0x24f   : > { %v733_v10 = vadd.f32 %v731_v9, %v727_v7  ;;  %v912_v7 = vand.u32 4294901760, %v911_v51  ;;  %v5022_v9 = vand.u32 4294901760, %v321_v63 }
 0x251   : > { %v734_v20 = vsub.f32 0.0, %v733_v10  ;;  %v918_v10 = vand.u32 4294901760, %v917_v61  ;;  %913 = vmatpush.msra.mxu1 %v912_v7  ;;  %v5048_v36 = vsub.f32 %v321_v63, %v5022_v9  ;;  %v953_v61 = vsub.f32 %v5036_v18, %v952_v46  ;;  %1082 = vmatpush.msra.mxu3 %v5022_v9 }
 0x252   : > { %v964_v63 = vand.u32 4294901760, %v5060_v47  ;;  %852 = vmatpush.msra.mxu0 %v5022_v9 }
 0x253   : > { %v735_v29 = vmul.f32 1.442695, %v734_v20  ;;  %v924_v20 = vand.u32 4294901760, %v923_v5  ;;  %919 = vmatpush.msra.mxu1 %v918_v10  ;;  %v958_v51 = vand.u32 4294901760, %v5048_v36  ;;  %v954_v24 = vand.u32 4294901760, %v953_v61  ;;  %1031 = vmatpush.msra.mxu2 %v5048_v36 }
 0x254   : > { %1084 = vmatpush.msra.mxu3 %v5038_v19  ;;  %854 = vmatpush.msra.mxu0 %v5038_v19 }
 0x255   : > { %4674 = vpow2.f32 %v735_v29  ;;  %v946_v29 = vand.u32 4294901760, %v5020_v8  ;;  %925 = vmatpush.msra.mxu1 %v924_v20  ;;  %v959_v10 = vsub.f32 %v5048_v36, %v958_v51  ;;  %1034 = vmatpush.msra.mxu2 %v5060_v47 }
 0x256   : > { %1086 = vmatpush.msra.mxu3 %v5050_v40  ;;  %856 = vmatpush.msra.mxu0 %v5050_v40 }
 0x257   : > { %v947_v50 = vsub.f32 %v5020_v8, %v946_v29  ;;  %931 = vmatpush.msra.mxu1 %v930_v42  ;;  %v965_v42 = vsub.f32 %v5060_v47, %v964_v63  ;;  %1037 = vmatpush.msra.mxu2 %v5071_v54 }
 0x259   : > { %937 = vmatpush.msra.mxu1 %v936_v49  ;;  %v948_v7 = vand.u32 4294901760, %v947_v50  ;;  %v971_v49 = vsub.f32 %v5071_v54, %v970_v12  ;;  %v966_v50 = vand.u32 4294901760, %v965_v42 }
 0x25b   : > { %v4675_v59 = vpop.eup %4674  ;;  %943 = vmatpush.msra.mxu1 %v942_v60 }
 0x25c   : > { %v4998_v1 = vadd.f32 1.0, %v4675_v59 }
 0x25d   : > { %949 = vmatpush.msra.mxu1 %v948_v7 }
 0x25e   : > { %4676 = vrcp.f32 %v4998_v1  ;;  %v749_v59 = vand.u32 2147483648, %v4998_v1  ;;  %v747_v6 = vand.u32 2147483647, %v4998_v1  ;;  %vm743_vm5 = vweird.f32 %v4998_v1 }
 0x25f   : > { %955 = vmatpush.msra.mxu1 %v954_v24 }
 0x260   : > { %v750_v20 = vor.u32 1.1754944e-38, %v749_v59  ;;  %vm748_vm7 = vcmp.eq.f32.partialorder %v747_v6, 8.507059e+37 }
 0x264   : > { %v4677_v41 = vpop.eup %4676 }
 0x265   : > { %v739_v48 = vmul.f32 %v4677_v41, %v4998_v1  ;;  %vm744_vm4 = vweird.f32 %v4677_v41 }
 0x266   : > { %vm745_vm6 = vmor %vm743_vm5, %vm744_vm4 }
 0x267   : > { %v740_v55 = vsub.f32 1.0, %v739_v48  ;;  %v960_v48 = vand.u32 4294901760, %v959_v10  ;;  %v5136_v10 = vand.u32 4294901760, %v348_v25 }
 0x269   : > { %v741_v5 = vmul.f32 %v4677_v41, %v740_v55  ;;  %961 = vmatpush.msra.mxu1 %v960_v48  ;;  %v318_v55 = vld [vmem:[%s6966_s5] sm:$0xff]  ;;  %v5148_v24 = vsub.f32 %v348_v25, %v5136_v10  ;;  %v340_v25 = vld [vmem:[%s6966_s5 + $0xb0] sm:$0xff] }
 0x26a   : > { %v5108_v59 = vand.u32 4294901760, %v318_v55 }
 0x26b   : > { %v742_v13 = vadd.f32 %v4677_v41, %v741_v5  ;;  %967 = vmatpush.msra.mxu1 %v966_v50  ;;  %v349_v5 = vld [vmem:[%s6966_s5 + $0xf8] sm:$0xff]  ;;  %v6972_v42 = vand.u32 4294901760, %v5148_v24 }
 0x26c   : > { %v5111_v60 = vsub.f32 %v318_v55, %v5108_v59  ;;  %1088 = vmatpush.msra.mxu3 %v5108_v59  ;;  %858 = vmatpush.msra.mxu0 %v5108_v59  ;;  %v5122_v6 = vand.u32 4294901760, %v349_v5  ;;  %v342_v55 = vld [vmem:[%s6966_s5 + $0xc0] sm:$0xff] }
 0x26d   : > { %v746_v43 = vsel %vm745_vm6, %v4677_v41, %v742_v13  ;;  %v972_v41 = vand.u32 4294901760, %v971_v49  ;;  %v1296_v49 = vsub.f32 %v5148_v24, %v6972_v42 }
 0x26e   : > { %v751_v1 = vsel %vm748_vm7, %v750_v20, %v746_v43  ;;  %1111 = vmatpush.msrb.mxu0 %v886_v33  ;;  %v976_v61 = vand.u32 4294901760, %v5111_v60  ;;  %1040 = vmatpush.msra.mxu2 %v5111_v60  ;;  %v5134_v33 = vsub.f32 %v349_v5, %v5122_v6  ;;  %v5161_v43 = vand.u32 4294901760, %v346_v27 }
 0x26f   : > { %755 = vperm.xlu1 %4670, %v751_v1   ;;  %973 = vmatpush.msra.mxu1 %v972_v41  ;;  %v343_v1 = vld [vmem:[%s6966_s5 + $0xc8] sm:$0xff] }
 0x270   : > { %1115 = vmatpush.msrb.mxu0 %v892_v34  ;;  %v977_v7 = vsub.f32 %v5111_v60, %v976_v61  ;;  %1231 = vmatpush.msrb.mxu2 %v5122_v6  ;;  %v347_v34 = vld [vmem:[%s6966_s5 + $0xe8] sm:$0xff]  ;;  %v1289_v13 = vand.u32 4294901760, %v5134_v33  ;;  %v5196_v5 = vand.u32 4294901760, %v343_v1 }
 0x271   : > { %v5145_v20 = vand.u32 4294901760, %v347_v34 }
 0x272   : > { %1119 = vmatpush.msrb.mxu0 %v898_v35  ;;  %v978_v26 = vand.u32 4294901760, %v977_v7  ;;  %1233 = vmatpush.msrb.mxu2 %v5136_v10  ;;  %v1290_v35 = vsub.f32 %v5134_v33, %v1289_v13  ;;  %v5198_v7 = vand.u32 4294901760, %v342_v55 }
 0x273   : > { %v5164_v30 = vsub.f32 %v347_v34, %v5145_v20 }
 0x274   : > { %1123 = vmatpush.msrb.mxu0 %v904_v37  ;;  %979 = vmatpush.msra.mxu1 %v978_v26  ;;  %v345_v37 = vld [vmem:[%s6966_s5 + $0xd8] sm:$0xff]  ;;  %v1291_v48 = vand.u32 4294901760, %v1290_v35  ;;  %v1297_v26 = vand.u32 4294901760, %v1296_v49  ;;  %v5212_v35 = vand.u32 4294901760, %v341_v31 }
 0x275   : > { %1235 = vmatpush.msrb.mxu2 %v5145_v20  ;;  %v6970_v50 = vand.u32 4294901760, %v5164_v30  ;;  %v5183_v41 = vand.u32 4294901760, %v345_v37 }
 0x276   : > { %1186 = vmatpush.msrb.mxu1 %v4882_v14  ;;  %v344_v14 = vld [vmem:[%s6966_s5 + $0xd0] sm:$0xff]  ;;  %1127 = vmatpush.msrb.mxu0 %v910_v38 }
 0x277   : > { %1237 = vmatpush.msrb.mxu2 %v5161_v43  ;;  %v5194_v38 = vand.u32 4294901760, %v344_v14  ;;  %1292 = vmatpush.msrb.mxu3 %v1291_v48  ;;  %v1302_v34 = vsub.f32 %v5164_v30, %v6970_v50  ;;  %v5223_v48 = vsub.f32 %v342_v55, %v5198_v7  ;;  %v5232_v50 = vand.u32 4294901760, %v340_v25 }
 0x278   : > { %1188 = vmatpush.msrb.mxu1 %v4884_v15  ;;  %v5192_v15 = vsub.f32 %v346_v27, %v5161_v43  ;;  %1131 = vmatpush.msrb.mxu0 %v916_v44  ;;  %v5210_v27 = vsub.f32 %v345_v37, %v5183_v41  ;;  %v339_v37 = vld [vmem:[%s6966_s5 + $0xa8] sm:$0xff] }
 0x279   : > { %1239 = vmatpush.msrb.mxu2 %v5183_v41  ;;  %v5217_v44 = vsub.f32 %v344_v14, %v5194_v38  ;;  %1298 = vmatpush.msrb.mxu3 %v1297_v26  ;;  %v1303_v49 = vand.u32 4294901760, %v1302_v34  ;;  %v5253_v34 = vand.u32 4294901760, %v339_v37 }
 0x27a   : > { %1190 = vmatpush.msrb.mxu1 %v4886_v16  ;;  %v6971_v32 = vand.u32 4294901760, %v5192_v15  ;;  %v5220_v16 = vsub.f32 %v343_v1, %v5196_v5  ;;  %1135 = vmatpush.msrb.mxu0 %v922_v52  ;;  %v6975_v14 = vand.u32 4294901760, %v5210_v27  ;;  %v5235_v1 = vsub.f32 %v341_v31, %v5212_v35  ;;  %v338_v31 = vld [vmem:[%s6966_s5 + $0xa0] sm:$0xff] }
 0x27b   : > { %1241 = vmatpush.msrb.mxu2 %v5194_v38  ;;  %v6973_v52 = vand.u32 4294901760, %v5217_v44  ;;  %1304 = vmatpush.msrb.mxu3 %v1303_v49 }
 0x27c   : > { %1192 = vmatpush.msrb.mxu1 %v4897_v21  ;;  %v1308_v39 = vsub.f32 %v5192_v15, %v6971_v32  ;;  %v6974_v55 = vand.u32 4294901760, %v5220_v16  ;;  %v6976_v21 = vand.u32 4294901760, %v5223_v48  ;;  %1139 = vmatpush.msrb.mxu0 %v928_v62  ;;  %v1314_v26 = vsub.f32 %v5210_v27, %v6975_v14 }
 0x27d   : > { %v5256_v32 = vsub.f32 %v340_v25, %v5232_v50  ;;  %1243 = vmatpush.msrb.mxu2 %v5196_v5  ;;  %v1320_v53 = vsub.f32 %v5217_v44, %v6973_v52  ;;  %v1337_v62 = vand.u32 4294901760, %v5235_v1  ;;  %v337_v25 = vld [vmem:[%s6966_s5 + $0x98] sm:$0xff]  ;;  %v336_v52 = vld [vmem:[%s6966_s5 + $0x90] sm:$0xff]  ;;  %v5283_v14 = vsub.f32 %v339_v37, %v5253_v34 }
 0x27e   : > { %1194 = vmatpush.msrb.mxu1 %v4899_v22  ;;  %v1309_v42 = vand.u32 4294901760, %v1308_v39  ;;  %v1326_v22 = vsub.f32 %v5220_v16, %v6974_v55  ;;  %1143 = vmatpush.msrb.mxu0 %v934_v11  ;;  %v1315_v49 = vand.u32 4294901760, %v1314_v26  ;;  %v5272_v39 = vand.u32 4294901760, %v338_v31 }
 0x27f   : > { %v1321_v55 = vand.u32 4294901760, %v1320_v53  ;;  %1245 = vmatpush.msrb.mxu2 %v5198_v7  ;;  %v1332_v2 = vsub.f32 %v5223_v48, %v6976_v21  ;;  %v1343_v11 = vand.u32 4294901760, %v5256_v32  ;;  %v1338_v53 = vsub.f32 %v5235_v1, %v1337_v62 }
 0x280   : > { %1196 = vmatpush.msrb.mxu1 %v4901_v23  ;;  %1310 = vmatpush.msrb.mxu3 %v1309_v42  ;;  %v5288_v23 = vand.u32 4294901760, %v337_v25  ;;  %v5291_v42 = vsub.f32 %v338_v31, %v5272_v39  ;;  %v1327_v26 = vand.u32 4294901760, %v1326_v22  ;;  %v1349_v37 = vand.u32 4294901760, %v5283_v14 }
 0x281   : > { %1147 = vmatpush.msrb.mxu0 %v940_v17  ;;  %1247 = vmatpush.msrb.mxu2 %v5212_v35  ;;  %v5298_v21 = vand.u32 4294901760, %v336_v52  ;;  %v1333_v3 = vand.u32 4294901760, %v1332_v2  ;;  %v1344_v17 = vsub.f32 %v5256_v32, %v1343_v11  ;;  %v4756_v2 = vmov 4.0  }
 0x282   : > { %1198 = vmatpush.msrb.mxu1 %v4917_v28  ;;  %1316 = vmatpush.msrb.mxu3 %v1315_v49  ;;  %v5304_v28 = vsub.f32 %v337_v25, %v5288_v23  ;;  %v1355_v31 = vand.u32 4294901760, %v5291_v42  ;;  %v1350_v8 = vsub.f32 %v5283_v14, %v1349_v37  ;;  %4678 = vrcp.f32 %v4756_v2 }
 0x283   : > { %1151 = vmatpush.msrb.mxu0 %v946_v29  ;;  %1249 = vmatpush.msrb.mxu2 %v5232_v50  ;;  %v5312_v22 = vsub.f32 %v336_v52, %v5298_v21  ;;  %v335_v52 = vld [vmem:[%s6966_s5 + $0x88] sm:$0xff] }
 0x284   : > { %1200 = vmatpush.msrb.mxu1 %v4958_v45  ;;  %1322 = vmatpush.msrb.mxu3 %v1321_v55  ;;  %v1339_v45 = vand.u32 4294901760, %v1338_v53  ;;  %v1361_v29 = vand.u32 4294901760, %v5304_v28  ;;  %v1356_v18 = vsub.f32 %v5291_v42, %v1355_v31  ;;  %v5334_v55 = vand.u32 4294901760, %v335_v52 }
 0x285   : > { %1155 = vmatpush.msrb.mxu0 %v952_v46  ;;  %1251 = vmatpush.msrb.mxu2 %v5253_v34  ;;  %v1367_v46 = vand.u32 4294901760, %v5312_v22 }
 0x286   : > { %1202 = vmatpush.msrb.mxu1 %v4983_v56  ;;  %1328 = vmatpush.msrb.mxu3 %v1327_v26  ;;  %v1345_v56 = vand.u32 4294901760, %v1344_v17  ;;  %v1362_v25 = vsub.f32 %v5304_v28, %v1361_v29 }
 0x287   : > { %1159 = vmatpush.msrb.mxu0 %v958_v51  ;;  %1253 = vmatpush.msrb.mxu2 %v5272_v39  ;;  %v1351_v51 = vand.u32 4294901760, %v1350_v8  ;;  %v1368_v47 = vsub.f32 %v5312_v22, %v1367_v46 }
 0x288   : > { %1204 = vmatpush.msrb.mxu1 %v4985_v57  ;;  %1334 = vmatpush.msrb.mxu3 %v1333_v3  ;;  %v4755_v57 = vmov 839922192  }
 0x289   : > { %1163 = vmatpush.msrb.mxu0 %v964_v63  ;;  %v758_v36 = vunpack.c.l.s4 %v4755_v57  ;;  %1255 = vmatpush.msrb.mxu2 %v5288_v23  ;;  %v334_v63 = vld [vmem:[%s6966_s5 + $0x80] sm:$0xff]  ;;  %v1369_v53 = vand.u32 4294901760, %v1368_v47 }
 0x28a   : > { %1206 = vmatpush.msrb.mxu1 %v4987_v58  ;;  %1340 = vmatpush.msrb.mxu3 %v1339_v45  ;;  %v1357_v58 = vand.u32 4294901760, %v1356_v18  ;;  %v5353_v49 = vand.u32 4294901760, %v334_v63 }
 0x28b   : > { %1167 = vmatpush.msrb.mxu0 %v970_v12  ;;  %1257 = vmatpush.msrb.mxu2 %v5298_v21  ;;  %v759_v54 = vunpack.c.0.s8 %v758_v36  ;;  %v1363_v12 = vand.u32 4294901760, %v1362_v25 }
 0x28c   : > { %1208 = vmatpush.msrb.mxu1 %v5007_v4  ;;  %1346 = vmatpush.msrb.mxu3 %v1345_v56  ;;  %v5356_v4 = vsub.f32 %v335_v52, %v5334_v55 }
 0x28d   : > { %1171 = vmatpush.msrb.mxu0 %v976_v61  ;;  %1259 = vmatpush.msrb.mxu2 %v5334_v55 }
 0x28e   : > { %1210 = vmatpush.msrb.mxu1 %v5022_v9  ;;  %1352 = vmatpush.msrb.mxu3 %v1351_v51  ;;  %v1373_v26 = vand.u32 4294901760, %v5356_v4  ;;  %v5364_v9 = vsub.f32 %v334_v63, %v5353_v49 }
 0x28f   : > { %1261 = vmatpush.msrb.mxu2 %v5353_v49 }
 0x290   : > { %1212 = vmatpush.msrb.mxu1 %v5038_v19  ;;  %1358 = vmatpush.msrb.mxu3 %v1357_v58  ;;  %v1374_v61 = vsub.f32 %v5356_v4, %v1373_v26  ;;  %v1379_v19 = vand.u32 4294901760, %v5364_v9 }
 0x292   : > { %1214 = vmatpush.msrb.mxu1 %v5050_v40  ;;  %1364 = vmatpush.msrb.mxu3 %v1363_v12  ;;  %v1375_v17 = vand.u32 4294901760, %v1374_v61  ;;  %v1380_v45 = vsub.f32 %v5364_v9, %v1379_v19  ;;  %v4679_v40 = vpop.eup %4678 }
 0x293   : > { %v784_v56 = vmul.f32 4.0, %v4679_v40  ;;  %vm788_vm8 = vweird.f32 %v4679_v40 }
 0x294   : > { %1216 = vmatpush.msrb.mxu1 %v5108_v59  ;;  %1370 = vmatpush.msrb.mxu3 %v1369_v53  ;;  %v1381_v52 = vand.u32 4294901760, %v1380_v45 }
 0x295   : > { %v785_v18 = vsub.f32 1.0, %v784_v56 }
 0x296   : > { %1376 = vmatpush.msrb.mxu3 %v1375_v17 }
 0x297   : > { %v786_v58 = vmul.f32 %v4679_v40, %v785_v18  ;;  %v310_v18 = vld [vmem:[%s6965_s4 + $0x20] sm:$0xff] }
 0x298   : > { %1382 = vmatpush.msrb.mxu3 %v1381_v52  ;;  %v306_v52 = vld [vmem:[%s6965_s4] sm:$0xff] }
 0x299   : > { %v787_v2 = vadd.f32 %v4679_v40, %v786_v58 }
 0x2e1   : > { %v756_v60 = vpop.permute.xlu1 %755 }
 0x2e2   : > { %v760_v3 = vperm.slane %v756_v60, %v759_v54 }
 0x2e4   : > { %v5377_v8 = vmul.f32 %v760_v3, %v4855_v0  ;;  %v789_v3 = vsel %vm788_vm8, %v4679_v40, %v787_v2 }
 0x2e6   : > { %7008 = vst [vmem:[#allocation5_spill] sm:$0xff] %v5377_v8 }
 0x2e7   : > { %764 = vst [vmem:[#allocation1] ss:$2 sm:$0xff] %v5377_v8 }
 0x2ee   : > { %v765_v57 = vld.sshfl [vmem:[#allocation1] sm:$0xff pattern:$0x75316420]  ;;  %v766_v36 = vld.sshfl [vmem:[#allocation1 + $0x8] sm:$0xff pattern:$0x75316420] }
 0x2ef   : > { %v769_v59 = vsel %vm397_vm0, %v765_v57, 0.0  ;;  %v776_v51 = vsel %vm397_vm0, %v766_v36, 0.0  ;;  %792 = vst [vmem:[#allocation1] ss:$2 sm:$0xff] %v5377_v8 }
 0x2f0   : > { %v770_v25 = vrot.slane %v769_v59, 4  ;;  %v777_v0 = vrot.slane %v776_v51, 4 }
 0x2f2   : > { %v771_v47 = vadd.f32 %v770_v25, %v769_v59  ;;  %v778_v63 = vadd.f32 %v777_v0, %v776_v51 }
 0x2f4   : > { %v772_v54 = vrot.slane %v771_v47, 2  ;;  %v779_v12 = vrot.slane %v778_v63, 2 }
 0x2f6   : > { %v773_v53 = vadd.f32 %v772_v54, %v771_v47  ;;  %v780_v61 = vadd.f32 %v779_v12, %v778_v63  ;;  %v314_v63 = vld [vmem:[%s6965_s4 + $0x40] sm:$0x3f] }
 0x2f8   : > { %v774_v60 = vrot.slane %v773_v53, 1  ;;  %v781_v56 = vrot.slane %v780_v61, 1 }
 0x2fa   : > { %v775_v17 = vadd.f32 %v774_v60, %v773_v53  ;;  %v782_v51 = vadd.f32 %v781_v56, %v780_v61  ;;  %v7009_v53 = vand.u32 4294901760, %v5148_v24  ;;  %v7012_v56 = vand.u32 4294901760, %v5210_v27 }
 0x2fc   : > { %v790_v45 = vmul.f32 %v789_v3, %v775_v17  ;;  %v791_v58 = vmul.f32 %v789_v3, %v782_v51  ;;  %v7010_v3 = vand.u32 4294901760, %v5164_v30 }
 0x2fe   : > { %v811_v57 = vperm.slane %v790_v45, 0  ;;  %v5403_v2 = vperm.slane %v791_v58, 0  ;;  %v7011_v45 = vand.u32 4294901760, %v5192_v15 }
 0x300   : > { %v815_v36 = vmul.f32 %v811_v57, %v306_v52  ;;  %v819_v59 = vmul.f32 %v811_v57, %v310_v18  ;;  %v823_v61 = vmul.f32 %v811_v57, %v314_v63 }
 0x302   : > { %v5389_v25 = vand.u32 4294901760, %v815_v36  ;;  %v5393_v0 = vand.u32 4294901760, %v819_v59  ;;  %v5422_v52 = vand.u32 4294901760, %v823_v61 }
 0x304   : > { %981 = vmatmul.f32.vlgmr.msra.gmra.mxu1 %v5389_v25  ;;  %v860_v40 = vsub.f32 %v815_v36, %v5389_v25  ;;  %v868_v12 = vsub.f32 %v819_v59, %v5393_v0  ;;  %v876_v18 = vsub.f32 %v823_v61, %v5422_v52 }
 0x305   : > { %1461 = vmatpush.msra.mxu1 %v5122_v6 }
 0x306   : > { %1043 = vmatmul.f32.vlgmr.msra.gmra.mxu2 %v860_v40  ;;  %v861_v47 = vand.u32 4294901760, %v860_v40  ;;  %v869_v17 = vand.u32 4294901760, %v868_v12  ;;  %v877_v36 = vand.u32 4294901760, %v876_v18 }
 0x307   : > { %1463 = vmatpush.msra.mxu1 %v5136_v10  ;;  %1514 = vmatpush.msra.mxu2 %v1289_v13  ;;  %v307_v13 = vld [vmem:[%s6965_s4 + $0x8] sm:$0xff] }
 0x308   : > { %1092 = vmatmul.f32.vlgmr.msra.gmra.mxu3 %v861_v47  ;;  %v862_v54 = vsub.f32 %v860_v40, %v861_v47  ;;  %v363_v47 = vld [vmem:[%s6966_s5 + $0x168] sm:$0xff] }
 0x309   : > { %1465 = vmatpush.msra.mxu1 %v5145_v20  ;;  %1518 = vmatpush.msra.mxu2 %v7009_v53 }
 0x30a   : > { %1589 = vmatpush.msra.mxu3 %v5122_v6  ;;  %v863_v60 = vand.u32 4294901760, %v862_v54  ;;  %v816_v6 = vmul.f32 %v5403_v2, %v307_v13  ;;  %v5482_v54 = vand.u32 4294901760, %v363_v47 }
 0x30b   : > { %1467 = vmatpush.msra.mxu1 %v5161_v43  ;;  %1522 = vmatpush.msra.mxu2 %v7010_v3 }
 0x30c   : > { %1591 = vmatpush.msra.mxu3 %v5136_v10  ;;  %864 = vmatmul.f32.vlgmr.msra.gmra.mxu0 %v863_v60  ;;  %v870_v10 = vsub.f32 %v868_v12, %v869_v17  ;;  %v5508_v60 = vsub.f32 %v363_v47, %v5482_v54 }
 0x30d   : > { %985 = vmatmul.f32.gmra.mxu1 %v5393_v0  ;;  %1398 = vmatpush.msra.mxu0 %v5134_v33  ;;  %v5430_v33 = vand.u32 4294901760, %v816_v6 }
 0x30e   : > { %1469 = vmatpush.msra.mxu1 %v5183_v41  ;;  %1526 = vmatpush.msra.mxu2 %v7011_v45 }
 0x30f   : > { %1593 = vmatpush.msra.mxu3 %v5145_v20  ;;  %1048 = vmatmul.f32.gmra.mxu2 %v868_v12  ;;  %v7013_v20 = vand.u32 4294901760, %v5217_v44  ;;  %v5446_v57 = vsub.f32 %v816_v6, %v5430_v33  ;;  %v359_v6 = vld [vmem:[%s6966_s5 + $0x148] sm:$0xff] }
 0x310   : > { %1401 = vmatpush.msra.mxu0 %v5148_v24  ;;  %1471 = vmatpush.msra.mxu1 %v5194_v38  ;;  %v365_v24 = vld [vmem:[%s6966_s5 + $0x178] sm:$0xff] }
 0x311   : > { %1530 = vmatpush.msra.mxu2 %v7012_v56  ;;  %1595 = vmatpush.msra.mxu3 %v5161_v43  ;;  %v871_v43 = vand.u32 4294901760, %v870_v10  ;;  %v5449_v59 = vand.u32 4294901760, %v365_v24  ;;  %v1264_v51 = vand.u32 4294901760, %v5446_v57 }
 0x312   : > { %1098 = vmatmul.f32.gmra.mxu3 %v869_v17  ;;  %1404 = vmatpush.msra.mxu0 %v5164_v30  ;;  %v7014_v30 = vand.u32 4294901760, %v5220_v16 }
 0x313   : > { %1473 = vmatpush.msra.mxu1 %v5196_v5  ;;  %1534 = vmatpush.msra.mxu2 %v7013_v20  ;;  %v5473_v63 = vsub.f32 %v365_v24, %v5449_v59 }
 0x314   : > { %1597 = vmatpush.msra.mxu3 %v5183_v41  ;;  %1407 = vmatpush.msra.mxu0 %v5192_v15  ;;  %v364_v41 = vld [vmem:[%s6966_s5 + $0x170] sm:$0xff]  ;;  %v311_v15 = vld [vmem:[%s6965_s4 + $0x28] sm:$0xff] }
 0x315   : > { %1475 = vmatpush.msra.mxu1 %v5198_v7  ;;  %1538 = vmatpush.msra.mxu2 %v7014_v30  ;;  %v5464_v40 = vand.u32 4294901760, %v364_v41  ;;  %v820_v58 = vmul.f32 %v5403_v2, %v311_v15 }
 0x316   : > { %1599 = vmatpush.msra.mxu3 %v5194_v38  ;;  %872 = vmatmul.f32.gmra.mxu0 %v871_v43  ;;  %v7015_v38 = vand.u32 4294901760, %v5223_v48  ;;  %v357_v43 = vld [vmem:[%s6966_s5 + $0x138] sm:$0xff] }
 0x317   : > { %989 = vmatmul.f32.gmra.mxu1 %v5422_v52  ;;  %1410 = vmatpush.msra.mxu0 %v5210_v27  ;;  %v878_v27 = vsub.f32 %v876_v18, %v877_v36 }
 0x318   : > { %1477 = vmatpush.msra.mxu1 %v5212_v35  ;;  %1542 = vmatpush.msra.mxu2 %v7015_v38 }
 0x319   : > { %1601 = vmatpush.msra.mxu3 %v5196_v5  ;;  %1053 = vmatmul.f32.gmra.mxu2 %v876_v18  ;;  %v362_v5 = vld [vmem:[%s6966_s5 + $0x160] sm:$0xff]  ;;  %v879_v12 = vand.u32 4294901760, %v878_v27  ;;  %v5556_v18 = vand.u32 4294901760, %v359_v6 }
 0x31a   : > { %1413 = vmatpush.msra.mxu0 %v5217_v44  ;;  %1479 = vmatpush.msra.mxu1 %v5232_v50  ;;  %v1265_v44 = vsub.f32 %v5446_v57, %v1264_v51  ;;  %v5501_v53 = vand.u32 4294901760, %v362_v5 }
 0x31b   : > { %1546 = vmatpush.msra.mxu2 %v1337_v62  ;;  %1603 = vmatpush.msra.mxu3 %v5198_v7  ;;  %v5491_v7 = vsub.f32 %v364_v41, %v5464_v40  ;;  %v5493_v62 = vand.u32 4294901760, %v820_v58  ;;  %v5598_v41 = vand.u32 4294901760, %v357_v43 }
 0x31c   : > { %1104 = vmatmul.f32.gmra.mxu3 %v877_v36  ;;  %1416 = vmatpush.msra.mxu0 %v5220_v16  ;;  %v361_v16 = vld [vmem:[%s6966_s5 + $0x158] sm:$0xff]  ;;  %v5591_v36 = vsub.f32 %v359_v6, %v5556_v18 }
 0x31d   : > { %1481 = vmatpush.msra.mxu1 %v5253_v34  ;;  %1550 = vmatpush.msra.mxu2 %v1343_v11  ;;  %v6995_v11 = vand.u32 4294901760, %v5473_v63  ;;  %v5510_v61 = vand.u32 4294901760, %v361_v16  ;;  %v6993_v13 = vand.u32 4294901760, %v5491_v7 }
 0x31e   : > { %1605 = vmatpush.msra.mxu3 %v5212_v35  ;;  %1419 = vmatpush.msra.mxu0 %v5223_v48  ;;  %v315_v35 = vld [vmem:[%s6965_s4 + $0x48] sm:$0x3f]  ;;  %v1266_v48 = vand.u32 4294901760, %v1265_v44  ;;  %v6986_v27 = vand.u32 4294901760, %v5591_v36  ;;  %v5625_v44 = vsub.f32 %v357_v43, %v5598_v41 }
 0x31f   : > { %1483 = vmatpush.msra.mxu1 %v5272_v39  ;;  %1554 = vmatpush.msra.mxu2 %v1349_v37  ;;  %v5519_v37 = vsub.f32 %v820_v58, %v5493_v62  ;;  %v1693_v3 = vsub.f32 %v5473_v63, %v6995_v11  ;;  %v824_v17 = vmul.f32 %v5403_v2, %v315_v35  ;;  %v354_v35 = vld [vmem:[%s6966_s5 + $0x120] sm:$0xff] }
 0x320   : > { %1607 = vmatpush.msra.mxu3 %v5232_v50  ;;  %880 = vmatmul.f32.gmra.mxu0 %v879_v12  ;;  %v360_v50 = vld [vmem:[%s6966_s5 + $0x150] sm:$0xff]  ;;  %v5542_v45 = vsub.f32 %v361_v16, %v5510_v61  ;;  %v6983_v6 = vand.u32 4294901760, %v5625_v44 }
 0x321   : > { %1218 = vmatmul.f32.vlgmr.msrb.gmra.mxu1 %v5389_v25  ;;  %1422 = vmatpush.msra.mxu0 %v5235_v1  ;;  %v5531_v1 = vsub.f32 %v362_v5, %v5501_v53  ;;  %v5544_v10 = vand.u32 4294901760, %v360_v50  ;;  %v1694_v2 = vand.u32 4294901760, %v1693_v3 }
 0x322   : > { %1485 = vmatpush.msra.mxu1 %v5288_v23  ;;  %1558 = vmatpush.msra.mxu2 %v1355_v31  ;;  %v6992_v31 = vand.u32 4294901760, %v5508_v60  ;;  %v6988_v20 = vand.u32 4294901760, %v5542_v45 }
 0x323   : > { %1609 = vmatpush.msra.mxu3 %v5253_v34  ;;  %1267 = vmatmul.f32.vlgmr.msrb.gmra.mxu2 %v1266_v48  ;;  %v1699_v34 = vsub.f32 %v5491_v7, %v6993_v13  ;;  %v6990_v56 = vand.u32 4294901760, %v5531_v1  ;;  %v5573_v24 = vsub.f32 %v360_v50, %v5544_v10  ;;  %v1729_v50 = vsub.f32 %v5591_v36, %v6986_v27 }
 0x324   : > { %1425 = vmatpush.msra.mxu0 %v5256_v32  ;;  %1487 = vmatpush.msra.mxu1 %v5298_v21  ;;  %v1272_v32 = vand.u32 4294901760, %v5519_v37 }
 0x325   : > { %1562 = vmatpush.msra.mxu2 %v1361_v29  ;;  %1611 = vmatpush.msra.mxu3 %v5272_v39  ;;  %v358_v29 = vld [vmem:[%s6966_s5 + $0x140] sm:$0xff]  ;;  %v5564_v39 = vand.u32 4294901760, %v824_v17  ;;  %v1711_v30 = vsub.f32 %v5531_v1, %v6990_v56  ;;  %v6987_v38 = vand.u32 4294901760, %v5573_v24 }
 0x326   : > { %1384 = vmatmul.f32.vlgmr.msrb.gmra.mxu3 %v5430_v33  ;;  %1428 = vmatpush.msra.mxu0 %v5283_v14  ;;  %v1705_v14 = vsub.f32 %v5508_v60, %v6992_v31 }
 0x327   : > { %1489 = vmatpush.msra.mxu1 %v5334_v55  ;;  %1566 = vmatpush.msra.mxu2 %v1367_v46  ;;  %v5584_v46 = vand.u32 4294901760, %v358_v29 }
 0x328   : > { %1613 = vmatpush.msra.mxu3 %v5288_v23  ;;  %1431 = vmatpush.msra.mxu0 %v5291_v42  ;;  %v1700_v23 = vand.u32 4294901760, %v1699_v34  ;;  %v1273_v42 = vsub.f32 %v5519_v37, %v1272_v32  ;;  %v1706_v15 = vand.u32 4294901760, %v1705_v14  ;;  %v5655_v34 = vand.u32 4294901760, %v354_v35 }
 0x329   : > { %1491 = vmatpush.msra.mxu1 %v5353_v49  ;;  %1570 = vmatpush.msra.mxu2 %v1373_v26  ;;  %v5596_v26 = vsub.f32 %v824_v17, %v5564_v39  ;;  %v5612_v47 = vsub.f32 %v358_v29, %v5584_v46  ;;  %v353_v17 = vld [vmem:[%s6966_s5 + $0x118] sm:$0xff] }
 0x32a   : > { %1615 = vmatpush.msra.mxu3 %v5298_v21  ;;  %1173 = vmatmul.f32.vlgmr.msrb.gmra.mxu0 %v5389_v25  ;;  %v356_v21 = vld [vmem:[%s6966_s5 + $0x130] sm:$0xff]  ;;  %v1717_v25 = vsub.f32 %v5542_v45, %v6988_v20  ;;  %v1274_v58 = vand.u32 4294901760, %v1273_v42 }
 0x32b   : > { %1695 = vmatpush.msrb.mxu1 %v1694_v2  ;;  %1434 = vmatpush.msra.mxu0 %v5304_v28  ;;  %v355_v28 = vld [vmem:[%s6966_s5 + $0x128] sm:$0xff]  ;;  %v5620_v5 = vand.u32 4294901760, %v356_v21  ;;  %v6984_v48 = vand.u32 4294901760, %v5612_v47  ;;  %v352_v42 = vld [vmem:[%s6966_s5 + $0x110] sm:$0xff] }
 0x32c   : > { %1222 = vmatmul.f32.gmra.mxu1 %v5393_v0  ;;  %1574 = vmatpush.msra.mxu2 %v1379_v19  ;;  %v1712_v19 = vand.u32 4294901760, %v1711_v30  ;;  %v1718_v16 = vand.u32 4294901760, %v1717_v25  ;;  %v5631_v12 = vand.u32 4294901760, %v355_v28  ;;  %v1741_v25 = vsub.f32 %v5625_v44, %v6983_v6 }
 0x32d   : > { %1617 = vmatpush.msra.mxu3 %v5334_v55  ;;  %1701 = vmatpush.msrb.mxu1 %v1700_v23  ;;  %v1280_v55 = vand.u32 4294901760, %v5596_v26  ;;  %v5644_v3 = vsub.f32 %v356_v21, %v5620_v5  ;;  %v1735_v43 = vsub.f32 %v5612_v47, %v6984_v48  ;;  %v5667_v23 = vand.u32 4294901760, %v353_v17 }
 0x32e   : > { %1801 = vmatpush.msrb.mxu2 %v5473_v63  ;;  %1437 = vmatpush.msra.mxu0 %v5312_v22  ;;  %v1723_v22 = vsub.f32 %v5573_v24, %v6987_v38  ;;  %v5660_v14 = vsub.f32 %v355_v28, %v5631_v12  ;;  %v375_v38 = vld [vmem:[%s6966_s5 + $0x1c8] sm:$0xff] }
 0x32f   : > { %1275 = vmatmul.f32.gmra.mxu2 %v1274_v58  ;;  %1619 = vmatpush.msra.mxu3 %v5353_v49  ;;  %v793_v49 = vld.sshfl [vmem:[#allocation1] sm:$0xff pattern:$0x75316420]  ;;  %v6977_v30 = vand.u32 4294901760, %v5644_v3  ;;  %v5681_v58 = vsub.f32 %v354_v35, %v5655_v34 }
 0x330   : > { %1707 = vmatpush.msrb.mxu1 %v1706_v15  ;;  %1804 = vmatpush.msrb.mxu2 %v5491_v7  ;;  %v797_v2 = vsel %vm397_vm0, %v793_v49, -inf  ;;  %v1724_v29 = vand.u32 4294901760, %v1723_v22  ;;  %v6978_v28 = vand.u32 4294901760, %v5660_v14  ;;  %v5692_v22 = vsub.f32 %v353_v17, %v5667_v23 }
 0x331   : > { %1864 = vmatpush.msrb.mxu3 %v5449_v59  ;;  %1440 = vmatpush.msra.mxu0 %v5356_v4  ;;  %v1281_v4 = vsub.f32 %v5596_v26, %v1280_v55  ;;  %v798_v21 = vrot.slane %v797_v2, 4  ;;  %v1747_v35 = vsub.f32 %v5644_v3, %v6977_v30  ;;  %v1742_v17 = vand.u32 4294901760, %v1741_v25 }
 0x332   : > { %1388 = vmatmul.f32.gmra.mxu3 %v5493_v62  ;;  %1713 = vmatpush.msrb.mxu1 %v1712_v19  ;;  %v5688_v19 = vand.u32 4294901760, %v352_v42 }
 0x333   : > { %1807 = vmatpush.msrb.mxu2 %v5508_v60  ;;  %1866 = vmatpush.msrb.mxu3 %v5464_v40  ;;  %v1282_v15 = vand.u32 4294901760, %v1281_v4  ;;  %v799_v4 = vmax.f32 %v797_v2, %v798_v21  ;;  %v6979_v2 = vand.u32 4294901760, %v5692_v22 }
 0x334   : > { %1443 = vmatpush.msra.mxu0 %v5364_v9  ;;  %1719 = vmatpush.msrb.mxu1 %v1718_v16  ;;  %v1730_v9 = vand.u32 4294901760, %v1729_v50  ;;  %v1736_v16 = vand.u32 4294901760, %v1735_v43  ;;  %v350_v50 = vld [vmem:[%s6966_s5 + $0x100] sm:$0xff]  ;;  %v1753_v43 = vsub.f32 %v5660_v14, %v6978_v28 }
 0x335   : > { %1810 = vmatpush.msrb.mxu2 %v5531_v1  ;;  %1868 = vmatpush.msrb.mxu3 %v5482_v54  ;;  %v5716_v21 = vand.u32 4294901760, %v350_v50  ;;  %v800_v30 = vrot.slane %v799_v4, 2 }
 0x336   : > { %1634 = vmatpush.msrb.mxu0 %v5449_v59  ;;  %1226 = vmatmul.f32.gmra.mxu1 %v5422_v52 }
 0x337   : > { %1177 = vmatmul.f32.gmra.mxu0 %v5393_v0  ;;  %v351_v0 = vld [vmem:[%s6966_s5 + $0x108] sm:$0xff]  ;;  %1725 = vmatpush.msrb.mxu1 %v1724_v29  ;;  %v6982_v29 = vand.u32 4294901760, %v5681_v58 }
 0x338   : > { %1636 = vmatpush.msrb.mxu0 %v5464_v40  ;;  %1813 = vmatpush.msrb.mxu2 %v5542_v45  ;;  %v5698_v49 = vand.u32 4294901760, %v351_v0 }
 0x339   : > { %1870 = vmatpush.msrb.mxu3 %v5501_v53  ;;  %1283 = vmatmul.f32.gmra.mxu2 %v1282_v15  ;;  %v1748_v15 = vand.u32 4294901760, %v1747_v35  ;;  %v5737_v35 = vsub.f32 %v350_v50, %v5716_v21 }
 0x33a   : > { %1638 = vmatpush.msrb.mxu0 %v5482_v54  ;;  %1731 = vmatpush.msrb.mxu1 %v1730_v9  ;;  %v5712_v9 = vsub.f32 %v352_v42, %v5688_v19  ;;  %v5721_v25 = vsub.f32 %v351_v0, %v5698_v49  ;;  %v1759_v42 = vsub.f32 %v5681_v58, %v6982_v29  ;;  %v794_v29 = vld.sshfl [vmem:[#allocation1 + $0x8] sm:$0xff pattern:$0x75316420] }
 0x33b   : > { %1816 = vmatpush.msrb.mxu2 %v5573_v24  ;;  %1872 = vmatpush.msrb.mxu3 %v5510_v61  ;;  %v1765_v0 = vsub.f32 %v5692_v22, %v6979_v2 }
 0x33c   : > { %1392 = vmatmul.f32.gmra.mxu3 %v5564_v39  ;;  %1640 = vmatpush.msrb.mxu0 %v5501_v53  ;;  %v6980_v28 = vand.u32 4294901760, %v5712_v9 }
 0x33d   : > { %1737 = vmatpush.msrb.mxu1 %v1736_v16  ;;  %1819 = vmatpush.msrb.mxu2 %v5591_v36  ;;  %v1754_v16 = vand.u32 4294901760, %v1753_v43  ;;  %v801_v43 = vmax.f32 %v799_v4, %v800_v30  ;;  %v1766_v30 = vand.u32 4294901760, %v1765_v0  ;;  %v6985_v4 = vand.u32 4294901760, %v5737_v35  ;;  %v379_v0 = vld [vmem:[%s6966_s5 + $0x1e8] sm:$0xff] }
 0x33e   : > { %1874 = vmatpush.msrb.mxu3 %v5544_v10  ;;  %1642 = vmatpush.msrb.mxu0 %v5510_v61  ;;  %v1771_v50 = vsub.f32 %v5712_v9, %v6980_v28  ;;  %v5780_v48 = vand.u32 4294901760, %v379_v0 }
 0x33f   : > { %1743 = vmatpush.msrb.mxu1 %v1742_v17  ;;  %1822 = vmatpush.msrb.mxu2 %v5612_v47  ;;  %v381_v17 = vld [vmem:[%s6966_s5 + $0x1f8] sm:$0xff] }
 0x340   : > { %1876 = vmatpush.msrb.mxu3 %v5556_v18  ;;  %1181 = vmatmul.f32.gmra.mxu0 %v5422_v52  ;;  %v6981_v52 = vand.u32 4294901760, %v5721_v25  ;;  %v5756_v2 = vand.u32 4294901760, %v381_v17 }
 0x341   : > { %1495 = vmatmul.f32.vlgmr.msra.gmra.mxu1 %v1264_v51  ;;  %1644 = vmatpush.msrb.mxu0 %v5544_v10  ;;  %v1760_v51 = vand.u32 4294901760, %v1759_v42 }
 0x342   : > { %1749 = vmatpush.msrb.mxu1 %v1748_v15  ;;  %1825 = vmatpush.msrb.mxu2 %v5625_v44  ;;  %v380_v15 = vld [vmem:[%s6966_s5 + $0x1f0] sm:$0xff]  ;;  %v1777_v42 = vsub.f32 %v5721_v25, %v6981_v52  ;;  %v5776_v52 = vsub.f32 %v381_v17, %v5756_v2 }
 0x343   : > { %1878 = vmatpush.msrb.mxu3 %v5584_v46  ;;  %1576 = vmatmul.f32.vlgmr.msra.gmra.mxu2 %v5430_v33  ;;  %v5764_v28 = vand.u32 4294901760, %v380_v15 }
 0x344   : > { %1646 = vmatpush.msrb.mxu0 %v5556_v18  ;;  %1755 = vmatpush.msrb.mxu1 %v1754_v16  ;;  %v802_v16 = vrot.slane %v801_v43, 1  ;;  %v1778_v6 = vand.u32 4294901760, %v1777_v42  ;;  %v804_v42 = vsel %vm397_vm0, %v794_v29, -inf }
 0x345   : > { %1828 = vmatpush.msrb.mxu2 %v5644_v3  ;;  %1880 = vmatpush.msrb.mxu3 %v5598_v41  ;;  %v5789_v17 = vsub.f32 %v380_v15, %v5764_v28  ;;  %v5803_v15 = vsub.f32 %v379_v0, %v5780_v48  ;;  %v805_v0 = vrot.slane %v804_v42, 4 }
 0x346   : > { %1621 = vmatmul.f32.vlgmr.msra.gmra.mxu3 %v5430_v33  ;;  %1648 = vmatpush.msrb.mxu0 %v5584_v46  ;;  %v1772_v33 = vand.u32 4294901760, %v1771_v50  ;;  %v378_v50 = vld [vmem:[%s6966_s5 + $0x1e0] sm:$0xff] }
 0x347   : > { %1761 = vmatpush.msrb.mxu1 %v1760_v51  ;;  %1831 = vmatpush.msrb.mxu2 %v5660_v14  ;;  %v1783_v51 = vsub.f32 %v5737_v35, %v6985_v4  ;;  %v6991_v29 = vand.u32 4294901760, %v5789_v17  ;;  %v806_v56 = vmax.f32 %v804_v42, %v805_v0 }
 0x348   : > { %1882 = vmatpush.msrb.mxu3 %v5620_v5  ;;  %1650 = vmatpush.msrb.mxu0 %v5598_v41 }
 0x349   : > { %1767 = vmatpush.msrb.mxu1 %v1766_v30  ;;  %1834 = vmatpush.msrb.mxu2 %v5681_v58  ;;  %v803_v30 = vmax.f32 %v801_v43, %v802_v16  ;;  %v1784_v43 = vand.u32 4294901760, %v1783_v51  ;;  %v5799_v16 = vand.u32 4294901760, %v378_v50  ;;  %v308_v51 = vld [vmem:[%s6965_s4 + $0x10] sm:$0xff]  ;;  %v807_v13 = vrot.slane %v806_v56, 2 }
 0x34a   : > { %1884 = vmatpush.msrb.mxu3 %v5631_v12  ;;  %1446 = vmatmul.f32.vlgmr.msra.gmra.mxu0 %v5446_v57  ;;  %v377_v57 = vld [vmem:[%s6966_s5 + $0x1d8] sm:$0xff] }
 0x34b   : > { %1501 = vmatmul.f32.gmra.mxu1 %v1272_v32  ;;  %1652 = vmatpush.msrb.mxu0 %v5620_v5  ;;  %v6989_v32 = vand.u32 4294901760, %v5776_v52  ;;  %v5813_v4 = vand.u32 4294901760, %v377_v57  ;;  %v5825_v27 = vsub.f32 %v378_v50, %v5799_v16  ;;  %v2102_v50 = vsub.f32 %v5789_v17, %v6991_v29 }
 0x34c   : > { %1773 = vmatpush.msrb.mxu1 %v1772_v33  ;;  %1837 = vmatpush.msrb.mxu2 %v5692_v22  ;;  %v5805_v33 = vperm.slane %v803_v30, 0 }
 0x34d   : > { %1886 = vmatpush.msrb.mxu3 %v5655_v34  ;;  %1580 = vmatmul.f32.gmra.mxu2 %v5493_v62  ;;  %v2096_v30 = vsub.f32 %v5776_v52, %v6989_v32  ;;  %7016 = vst [vmem:[#allocation6_spill] sm:$0xff] %v5825_v27  ;;  %v5842_v32 = vsub.f32 %v377_v57, %v5813_v4  ;;  %v6996_v57 = vand.u32 4294901760, %v5825_v27 }
 0x34e   : > { %1654 = vmatpush.msrb.mxu0 %v5631_v12  ;;  %1779 = vmatpush.msrb.mxu1 %v1778_v6  ;;  %v376_v6 = vld [vmem:[%s6966_s5 + $0x1d0] sm:$0xff] }
 0x34f   : > { %1840 = vmatpush.msrb.mxu2 %v5712_v9  ;;  %1888 = vmatpush.msrb.mxu3 %v5667_v23  ;;  %v5834_v20 = vand.u32 4294901760, %v376_v6  ;;  %v2097_v29 = vand.u32 4294901760, %v2096_v30 }
 0x350   : > { %1625 = vmatmul.f32.gmra.mxu3 %v5493_v62  ;;  %1656 = vmatpush.msrb.mxu0 %v5655_v34  ;;  %v6994_v62 = vand.u32 4294901760, %v5803_v15 }
 0x351   : > { %1785 = vmatpush.msrb.mxu1 %v1784_v43  ;;  %1843 = vmatpush.msrb.mxu2 %v5721_v25  ;;  %v817_v43 = vmul.f32 %v5805_v33, %v308_v51  ;;  %v374_v51 = vld [vmem:[%s6966_s5 + $0x1c0] sm:$0xff]  ;;  %v5863_v0 = vsub.f32 %v376_v6, %v5834_v20 }
 0x352   : > { %1890 = vmatpush.msrb.mxu3 %v5688_v19  ;;  %1658 = vmatpush.msrb.mxu0 %v5667_v23  ;;  %v5871_v31 = vand.u32 4294901760, %v374_v51 }
 0x353   : > { %1992 = vmatpush.msra.mxu1 %v5449_v59  ;;  %1846 = vmatpush.msrb.mxu2 %v5737_v35  ;;  %v5846_v59 = vand.u32 4294901760, %v375_v38  ;;  %v5860_v42 = vand.u32 4294901760, %v817_v43  ;;  %7017 = vst [vmem:[#allocation7_spill] sm:$0xff] %v5863_v0 }
 0x354   : > { %1892 = vmatpush.msrb.mxu3 %v5698_v49  ;;  %1451 = vmatmul.f32.gmra.mxu0 %v5519_v37  ;;  %v2108_v37 = vsub.f32 %v5803_v15, %v6994_v62  ;;  %v2114_v62 = vsub.f32 %v5825_v27, %v6996_v57  ;;  %v7019_v57 = vand.u32 4294901760, %v5842_v32  ;;  %v5899_v27 = vsub.f32 %v374_v51, %v5871_v31 }
 0x355   : > { %1507 = vmatmul.f32.gmra.mxu1 %v1280_v55  ;;  %2037 = vmatpush.msra.mxu2 %v5756_v2  ;;  %v373_v55 = vld [vmem:[%s6966_s5 + $0x1b8] sm:$0xff]  ;;  %v5876_v6 = vsub.f32 %v375_v38, %v5846_v59 }
 0x356   : > { %1994 = vmatpush.msra.mxu1 %v5464_v40  ;;  %1660 = vmatpush.msrb.mxu0 %v5688_v19  ;;  %v2103_v40 = vand.u32 4294901760, %v2102_v50  ;;  %v312_v50 = vld [vmem:[%s6965_s4 + $0x30] sm:$0xff]  ;;  %v5885_v11 = vand.u32 4294901760, %v373_v55  ;;  %v2109_v38 = vand.u32 4294901760, %v2108_v37  ;;  %v2120_v8 = vsub.f32 %v5842_v32, %v7019_v57 }
 0x357   : > { %1894 = vmatpush.msrb.mxu3 %v5716_v21  ;;  %1584 = vmatmul.f32.gmra.mxu2 %v5564_v39  ;;  %7018 = vst [vmem:[#allocation8_spill] sm:$0xff] %v5876_v6  ;;  %v821_v37 = vmul.f32 %v5805_v33, %v312_v50  ;;  %v7020_v57 = vand.u32 4294901760, %v5473_v63  ;;  %v2115_v51 = vand.u32 4294901760, %v2114_v62  ;;  %v370_v63 = vld [vmem:[%s6966_s5 + $0x1a0] sm:$0xff]  ;;  %v7022_v62 = vand.u32 4294901760, %v5491_v7 }
 0x358   : > { %1996 = vmatpush.msra.mxu1 %v5482_v54  ;;  %2039 = vmatpush.msra.mxu2 %v5764_v28  ;;  %v372_v54 = vld [vmem:[%s6966_s5 + $0x1b0] sm:$0xff]  ;;  %v5914_v30 = vsub.f32 %v373_v55, %v5885_v11  ;;  %v2121_v55 = vand.u32 4294901760, %v2120_v8  ;;  %v369_v8 = vld [vmem:[%s6966_s5 + $0x198] sm:$0xff] }
 0x359   : > { %2098 = vmatpush.msra.mxu3 %v2097_v29  ;;  %1662 = vmatpush.msrb.mxu0 %v5698_v49  ;;  %v1666_v29 = vsub.f32 %v817_v43, %v5860_v42  ;;  %v7002_v43 = vand.u32 4294901760, %v5876_v6  ;;  %v5955_v7 = vand.u32 4294901760, %v369_v8 }
 0x35a   : > { %1629 = vmatmul.f32.gmra.mxu3 %v5564_v39  ;;  %1998 = vmatpush.msra.mxu1 %v5501_v53  ;;  %v371_v39 = vld [vmem:[%s6966_s5 + $0x1a8] sm:$0xff]  ;;  %v808_v53 = vmax.f32 %v806_v56, %v807_v13 }
 0x35b   : > { %2041 = vmatpush.msra.mxu2 %v5780_v48  ;;  %2104 = vmatpush.msra.mxu3 %v2103_v40  ;;  %v5908_v40 = vand.u32 4294901760, %v372_v54  ;;  %v1667_v13 = vand.u32 4294901760, %v1666_v29  ;;  %v5920_v50 = vand.u32 4294901760, %v371_v39 }
 0x35c   : > { %1664 = vmatpush.msrb.mxu0 %v5716_v21  ;;  %2000 = vmatpush.msra.mxu1 %v5510_v61  ;;  %v7021_v61 = vand.u32 4294901760, %v5863_v0 }
 0x35d   : > { %2043 = vmatpush.msra.mxu2 %v5799_v16  ;;  %2110 = vmatpush.msra.mxu3 %v2109_v38  ;;  %v1668_v38 = vsub.f32 %v1666_v29, %v1667_v13 }
 0x35e   : > { %1917 = vmatpush.msra.mxu0 %v7020_v57  ;;  %v2126_v56 = vsub.f32 %v5863_v0, %v7021_v61  ;;  %1787 = vmatmul.f32.vlgmr.msrb.gmra.mxu1 %v5860_v42  ;;  %v2132_v57 = vsub.f32 %v5876_v6, %v7002_v43  ;;  %v5934_v61 = vand.u32 4294901760, %v821_v37  ;;  %v5937_v0 = vsub.f32 %v372_v54, %v5908_v40 }
 0x35f   : > { %1456 = vmatmul.f32.gmra.mxu0 %v5596_v26  ;;  %v809_v26 = vrot.slane %v808_v53, 1  ;;  %2002 = vmatpush.msra.mxu1 %v5544_v10  ;;  %v5943_v10 = vand.u32 4294901760, %v370_v63  ;;  %v5949_v54 = vsub.f32 %v371_v39, %v5920_v50 }
 0x360   : > { %1921 = vmatpush.msra.mxu0 %v7022_v62  ;;  %2045 = vmatpush.msra.mxu2 %v5813_v4  ;;  %v7023_v62 = vand.u32 4294901760, %v5508_v60  ;;  %v2127_v43 = vand.u32 4294901760, %v2126_v56  ;;  %v368_v60 = vld [vmem:[%s6966_s5 + $0x190] sm:$0xff]  ;;  %v1674_v39 = vsub.f32 %v821_v37, %v5934_v61  ;;  %v367_v37 = vld [vmem:[%s6966_s5 + $0x188] sm:$0xff] }
 0x361   : > { %2116 = vmatpush.msra.mxu3 %v2115_v51  ;;  %1849 = vmatmul.f32.vlgmr.msrb.gmra.mxu2 %v1666_v29  ;;  %v7024_v51 = vand.u32 4294901760, %v5899_v27  ;;  %v2133_v29 = vand.u32 4294901760, %v2132_v57  ;;  %v5981_v57 = vand.u32 4294901760, %v368_v60 }
 0x362   : > { %1925 = vmatpush.msra.mxu0 %v7023_v62  ;;  %2004 = vmatpush.msra.mxu1 %v5556_v18  ;;  %v810_v62 = vmax.f32 %v808_v53, %v809_v26  ;;  %v7025_v18 = vand.u32 4294901760, %v5531_v1  ;;  %v5973_v1 = vsub.f32 %v370_v63, %v5943_v10  ;;  %v1669_v26 = vand.u32 4294901760, %v1668_v38 }
 0x363   : > { %2047 = vmatpush.msra.mxu2 %v5834_v20  ;;  %2122 = vmatpush.msra.mxu3 %v2121_v55  ;;  %v2138_v6 = vsub.f32 %v5899_v27, %v7024_v51  ;;  %v316_v55 = vld [vmem:[%s6965_s4 + $0x50] sm:$0x3f]  ;;  %v7026_v51 = vand.u32 4294901760, %v5914_v30 }
 0x364   : > { %1898 = vmatmul.f32.vlgmr.msrb.gmra.mxu3 %v1667_v13  ;;  %1929 = vmatpush.msra.mxu0 %v7025_v18  ;;  %v7027_v13 = vand.u32 4294901760, %v5542_v45  ;;  %v825_v63 = vmul.f32 %v5805_v33, %v316_v55  ;;  %v5989_v56 = vperm.slane %v810_v62, 0  ;;  %v1675_v45 = vand.u32 4294901760, %v1674_v39  ;;  %v309_v33 = vld [vmem:[%s6965_s4 + $0x18] sm:$0xff] }
 0x365   : > { %2006 = vmatpush.msra.mxu1 %v5584_v46  ;;  %2049 = vmatpush.msra.mxu2 %v5846_v59  ;;  %v2144_v53 = vsub.f32 %v5914_v30, %v7026_v51  ;;  %v7005_v46 = vand.u32 4294901760, %v5949_v54  ;;  %v2139_v18 = vand.u32 4294901760, %v2138_v6  ;;  %v5987_v51 = vsub.f32 %v369_v8, %v5955_v7 }
 0x366   : > { %2128 = vmatpush.msra.mxu3 %v2127_v43  ;;  %1933 = vmatpush.msra.mxu0 %v7027_v13  ;;  %v7028_v43 = vand.u32 4294901760, %v5937_v0  ;;  %v5994_v13 = vand.u32 4294901760, %v367_v37  ;;  %v7029_v6 = vand.u32 4294901760, %v5573_v24  ;;  %v2161_v62 = vand.u32 4294901760, %v5973_v1 }
 0x367   : > { %2008 = vmatpush.msra.mxu1 %v5598_v41  ;;  %2051 = vmatpush.msra.mxu2 %v5871_v31  ;;  %v366_v41 = vld [vmem:[%s6966_s5 + $0x180] sm:$0xff]  ;;  %v2145_v8 = vand.u32 4294901760, %v2144_v53  ;;  %v6012_v55 = vsub.f32 %v368_v60, %v5981_v57  ;;  %v2167_v24 = vand.u32 4294901760, %v5987_v51 }
 0x368   : > { %2134 = vmatpush.msra.mxu3 %v2133_v29  ;;  %1670 = vmatmul.f32.vlgmr.msrb.gmra.mxu0 %v1669_v26  ;;  %v2150_v38 = vsub.f32 %v5937_v0, %v7028_v43  ;;  %v2156_v29 = vsub.f32 %v5949_v54, %v7005_v46  ;;  %v6014_v26 = vand.u32 4294901760, %v825_v63  ;;  %v6017_v53 = vand.u32 4294901760, %v366_v41 }
 0x369   : > { %1791 = vmatmul.f32.gmra.mxu1 %v5934_v61  ;;  %1937 = vmatpush.msra.mxu0 %v7029_v6  ;;  %v818_v43 = vmul.f32 %v5989_v56, %v309_v33  ;;  %v1676_v46 = vsub.f32 %v1674_v39, %v1675_v45  ;;  %v6024_v60 = vsub.f32 %v367_v37, %v5994_v13  ;;  %v7031_v33 = vand.u32 4294901760, %v5612_v47 }
 0x36a   : > { %2010 = vmatpush.msra.mxu1 %v5620_v5  ;;  %2053 = vmatpush.msra.mxu2 %v5885_v11  ;;  %v7030_v5 = vand.u32 4294901760, %v5591_v36  ;;  %v2151_v6 = vand.u32 4294901760, %v2150_v38  ;;  %v2157_v36 = vand.u32 4294901760, %v2156_v29  ;;  %v6040_v37 = vsub.f32 %v366_v41, %v6017_v53 }
 0x36b   : > { %2140 = vmatpush.msra.mxu3 %v2139_v18  ;;  %1854 = vmatmul.f32.gmra.mxu2 %v1674_v39  ;;  %v2162_v18 = vsub.f32 %v5973_v1, %v2161_v62  ;;  %v2168_v39 = vsub.f32 %v5987_v51, %v2167_v24  ;;  %v7032_v47 = vand.u32 4294901760, %v5625_v44  ;;  %v1677_v38 = vand.u32 4294901760, %v1676_v46 }
 0x36c   : > { %1941 = vmatpush.msra.mxu0 %v7030_v5  ;;  %2012 = vmatpush.msra.mxu1 %v5631_v12  ;;  %v2173_v5 = vand.u32 4294901760, %v6012_v55  ;;  %v1682_v12 = vsub.f32 %v825_v63, %v6014_v26  ;;  %v7033_v44 = vand.u32 4294901760, %v5644_v3  ;;  %v2185_v29 = vand.u32 4294901760, %v6040_v37 }
 0x36d   : > { %2055 = vmatpush.msra.mxu2 %v5908_v40  ;;  %2146 = vmatpush.msra.mxu3 %v2145_v8  ;;  %v2163_v63 = vand.u32 4294901760, %v2162_v18  ;;  %v313_v8 = vld [vmem:[%s6965_s4 + $0x38] sm:$0xff]  ;;  %v2169_v46 = vand.u32 4294901760, %v2168_v39 }
 0x36e   : > { %1904 = vmatmul.f32.gmra.mxu3 %v1675_v45  ;;  %1945 = vmatpush.msra.mxu0 %v7031_v33  ;;  %v6042_v45 = vand.u32 4294901760, %v818_v43  ;;  %v2174_v41 = vsub.f32 %v6012_v55, %v2173_v5  ;;  %v822_v3 = vmul.f32 %v5989_v56, %v313_v8  ;;  %v7034_v33 = vand.u32 4294901760, %v5660_v14 }
 0x36f   : > { %2014 = vmatpush.msra.mxu1 %v5655_v34  ;;  %2057 = vmatpush.msra.mxu2 %v5920_v50  ;;  %v2179_v34 = vand.u32 4294901760, %v6024_v60  ;;  %v7038_v8 = vand.u32 4294901760, %v5712_v9 }
 0x370   : > { %2152 = vmatpush.msra.mxu3 %v2151_v6  ;;  %1949 = vmatpush.msra.mxu0 %v7032_v47  ;;  %v6060_v6 = vsub.f32 %v818_v43, %v6042_v45  ;;  %v2186_v43 = vsub.f32 %v6040_v37, %v2185_v29  ;;  %v7035_v47 = vand.u32 4294901760, %v5681_v58  ;;  %v6080_v14 = vand.u32 4294901760, %v822_v3 }
 0x371   : > { %2016 = vmatpush.msra.mxu1 %v5667_v23  ;;  %2059 = vmatpush.msra.mxu2 %v5943_v10  ;;  %v1683_v23 = vand.u32 4294901760, %v1682_v12  ;;  %v2180_v18 = vsub.f32 %v6024_v60, %v2179_v34 }
 0x372   : > { %2158 = vmatpush.msra.mxu3 %v2157_v36  ;;  %1678 = vmatmul.f32.gmra.mxu0 %v1677_v38  ;;  %v2175_v36 = vand.u32 4294901760, %v2174_v41  ;;  %v2070_v39 = vand.u32 4294901760, %v6060_v6  ;;  %v7037_v41 = vand.u32 4294901760, %v5776_v52 }
 0x373   : > { %1795 = vmatmul.f32.gmra.mxu1 %v6014_v26  ;;  %1953 = vmatpush.msra.mxu0 %v7033_v44  ;;  %v2181_v38 = vand.u32 4294901760, %v2180_v18  ;;  %v7040_v18 = vand.u32 4294901760, %v5721_v25 }
 0x374   : > { %2018 = vmatpush.msra.mxu1 %v5688_v19  ;;  %2061 = vmatpush.msra.mxu2 %v5955_v7  ;;  %v1684_v19 = vsub.f32 %v1682_v12, %v1683_v23  ;;  %v2071_v58 = vsub.f32 %v6060_v6, %v2070_v39 }
 0x375   : > { %2164 = vmatpush.msra.mxu3 %v2163_v63  ;;  %1859 = vmatmul.f32.gmra.mxu2 %v1682_v12  ;;  %v2187_v63 = vand.u32 4294901760, %v2186_v43 }
 0x376   : > { %1957 = vmatpush.msra.mxu0 %v7034_v33  ;;  %2020 = vmatpush.msra.mxu1 %v5698_v49  ;;  %v7036_v49 = vand.u32 4294901760, %v5692_v22  ;;  %v1685_v12 = vand.u32 4294901760, %v1684_v19  ;;  %v6096_v22 = vsub.f32 %v822_v3, %v6080_v14  ;;  %v2072_v44 = vand.u32 4294901760, %v2071_v58 }
 0x377   : > { %2063 = vmatpush.msra.mxu2 %v5981_v57  ;;  %2170 = vmatpush.msra.mxu3 %v2169_v46  ;;  %v7041_v3 = vand.u32 4294901760, %v5803_v15 }
 0x378   : > { %1910 = vmatmul.f32.gmra.mxu3 %v1683_v23  ;;  %1961 = vmatpush.msra.mxu0 %v7035_v47  ;;  %v7039_v23 = vand.u32 4294901760, %v5789_v17  ;;  %v2078_v9 = vand.u32 4294901760, %v6096_v22 }
 0x379   : > { %2022 = vmatpush.msra.mxu1 %v5716_v21  ;;  %2065 = vmatpush.msra.mxu2 %v5994_v13  ;;  %v317_v21 = vld [vmem:[%s6965_s4 + $0x58] sm:$0x3f] }
 0x37a   : > { %2176 = vmatpush.msra.mxu3 %v2175_v36  ;;  %1965 = vmatpush.msra.mxu0 %v7036_v49  ;;  %v826_v46 = vmul.f32 %v5989_v56, %v317_v21  ;;  %v7042_v56 = vand.u32 4294901760, %v5737_v35  ;;  %v2079_v36 = vsub.f32 %v6096_v22, %v2078_v9 }
 0x37b   : > { %2267 = vmatpush.msrb.mxu1 %v5756_v2  ;;  %2067 = vmatpush.msra.mxu2 %v6017_v53 }
 0x37c   : > { %2182 = vmatpush.msra.mxu3 %v2181_v38  ;;  %1686 = vmatmul.f32.gmra.mxu0 %v1685_v12  ;;  %v6115_v33 = vand.u32 4294901760, %v826_v46  ;;  %v7052_v38 = vand.u32 4294901760, %v5937_v0 }
 0x37d   : > { %2269 = vmatpush.msrb.mxu1 %v5764_v28  ;;  %2320 = vmatpush.msrb.mxu2 %v7037_v41 }
 0x37e   : > { %1969 = vmatpush.msra.mxu0 %v7038_v8  ;;  %2024 = vmatmul.f32.vlgmr.msra.gmra.mxu1 %v5860_v42  ;;  %v6131_v35 = vsub.f32 %v826_v46, %v6115_v33 }
 0x37f   : > { %2188 = vmatpush.msra.mxu3 %v2187_v63  ;;  %2271 = vmatpush.msrb.mxu1 %v5780_v48 }
 0x380   : > { %2324 = vmatpush.msrb.mxu2 %v7039_v23  ;;  %1973 = vmatpush.msra.mxu0 %v7040_v18  ;;  %v2086_v19 = vand.u32 4294901760, %v6131_v35 }
 0x381   : > { %2395 = vmatpush.msrb.mxu3 %v5756_v2  ;;  %2073 = vmatmul.f32.vlgmr.msra.gmra.mxu2 %v2072_v44  ;;  %v7043_v2 = vld [vmem:[#allocation6_spill] sm:$0xff]  ;;  %v6155_v43 = vpop.f32.mrf.mxu1 }
 0x382   : > { %2273 = vmatpush.msrb.mxu1 %v5799_v16  ;;  %2328 = vmatpush.msrb.mxu2 %v7041_v3  ;;  %v7044_v25 = vand.u32 4294901760, %v7043_v2 }
 0x383   : > { %2397 = vmatpush.msrb.mxu3 %v5764_v28  ;;  %1977 = vmatpush.msra.mxu0 %v7042_v56  ;;  %v7045_v28 = vand.u32 4294901760, %v5842_v32 }
 0x384   : > { %2190 = vmatmul.f32.vlgmr.msra.gmra.mxu3 %v6042_v45  ;;  %2275 = vmatpush.msrb.mxu1 %v5813_v4 }
 0x385   : > { %2204 = vmatpush.msrb.mxu0 %v5776_v52  ;;  %2332 = vmatpush.msrb.mxu2 %v7044_v25  ;;  %v2080_v52 = vand.u32 4294901760, %v2079_v36 }
 0x386   : > { %2399 = vmatpush.msrb.mxu3 %v5780_v48  ;;  %2277 = vmatpush.msrb.mxu1 %v5834_v20  ;;  %v7046_v48 = vld [vmem:[#allocation7_spill] sm:$0xff] }
 0x387   : > { %2207 = vmatpush.msrb.mxu0 %v5789_v17  ;;  %2336 = vmatpush.msrb.mxu2 %v7045_v28  ;;  %v7047_v17 = vand.u32 4294901760, %v7046_v48 }
 0x388   : > { %2401 = vmatpush.msrb.mxu3 %v5799_v16  ;;  %1979 = vmatmul.f32.vlgmr.msra.gmra.mxu0 %v5860_v42  ;;  %v7048_v16 = vld [vmem:[#allocation8_spill] sm:$0xff] }
 0x389   : > { %2028 = vmatmul.f32.gmra.mxu1 %v5934_v61  ;;  %2210 = vmatpush.msrb.mxu0 %v5803_v15  ;;  %v7049_v42 = vand.u32 4294901760, %v7048_v16  ;;  %v2087_v15 = vsub.f32 %v6131_v35, %v2086_v19  ;;  %v6166_v47 = vpop.f32.mrf.mxu2 }
 0x38a   : > { %2279 = vmatpush.msrb.mxu1 %v5846_v59  ;;  %2340 = vmatpush.msrb.mxu2 %v7047_v17 }
 0x38b   : > { %2403 = vmatpush.msrb.mxu3 %v5813_v4  ;;  %2081 = vmatmul.f32.gmra.mxu2 %v2080_v52  ;;  %v7050_v4 = vand.u32 4294901760, %v5899_v27  ;;  %v6173_v49 = vpop.f32.mrf.mxu3 }
 0x38c   : > { %2213 = vmatpush.msrb.mxu0 %v7043_v2  ;;  %2281 = vmatpush.msrb.mxu1 %v5871_v31 }
 0x38d   : > { %2344 = vmatpush.msrb.mxu2 %v7049_v42  ;;  %2405 = vmatpush.msrb.mxu3 %v5834_v20  ;;  %v7051_v20 = vand.u32 4294901760, %v5914_v30 }
 0x38e   : > { %2194 = vmatmul.f32.gmra.mxu3 %v6080_v14  ;;  %2216 = vmatpush.msrb.mxu0 %v5842_v32  ;;  %v6162_v32 = vpop.f32.mrf.mxu0 }
 0x38f   : > { %2283 = vmatpush.msrb.mxu1 %v5885_v11  ;;  %2348 = vmatpush.msrb.mxu2 %v7050_v4  ;;  %v983_v21 = vadd.f32 %v6155_v43, %v6162_v32 }
 0x390   : > { %2407 = vmatpush.msrb.mxu3 %v5846_v59  ;;  %2219 = vmatpush.msrb.mxu0 %v7046_v48  ;;  %v2088_v59 = vand.u32 4294901760, %v2087_v15 }
 0x391   : > { %2285 = vmatpush.msrb.mxu1 %v5908_v40  ;;  %2352 = vmatpush.msrb.mxu2 %v7051_v20 }
 0x392   : > { %2409 = vmatpush.msrb.mxu3 %v5871_v31  ;;  %1983 = vmatmul.f32.gmra.mxu0 %v5934_v61  ;;  %v7053_v31 = vand.u32 4294901760, %v5949_v54 }
 0x393   : > { %2032 = vmatmul.f32.gmra.mxu1 %v6014_v26  ;;  %2222 = vmatpush.msrb.mxu0 %v7048_v16 }
 0x394   : > { %2287 = vmatpush.msrb.mxu1 %v5920_v50  ;;  %2356 = vmatpush.msrb.mxu2 %v7052_v38 }
 0x395   : > { %2411 = vmatpush.msrb.mxu3 %v5885_v11  ;;  %2089 = vmatmul.f32.gmra.mxu2 %v2088_v59  ;;  %v6186_v11 = vpop.f32.mrf.mxu1 }
 0x396   : > { %2225 = vmatpush.msrb.mxu0 %v5899_v27  ;;  %2289 = vmatpush.msrb.mxu1 %v5943_v10  ;;  %v6193_v27 = vpop.f32.mrf.mxu0 }
 0x397   : > { %2360 = vmatpush.msrb.mxu2 %v7053_v31  ;;  %2413 = vmatpush.msrb.mxu3 %v5908_v40  ;;  %v987_v44 = vadd.f32 %v6186_v11, %v6193_v27 }
 0x398   : > { %2198 = vmatmul.f32.gmra.mxu3 %v6115_v33  ;;  %2228 = vmatpush.msrb.mxu0 %v5914_v30  ;;  %v6197_v30 = vpop.f32.mrf.mxu2 }
 0x399   : > { %2291 = vmatpush.msrb.mxu1 %v5955_v7  ;;  %2364 = vmatpush.msrb.mxu2 %v2161_v62  ;;  %v1050_v56 = vadd.f32 %v6197_v30, %v987_v44 }
 0x39a   : > { %2415 = vmatpush.msrb.mxu3 %v5920_v50  ;;  %2231 = vmatpush.msrb.mxu0 %v5937_v0  ;;  %v6204_v0 = vpop.f32.mrf.mxu3 }
 0x39b   : > { %2293 = vmatpush.msrb.mxu1 %v5981_v57  ;;  %2368 = vmatpush.msrb.mxu2 %v2167_v24  ;;  %v1100_v2 = vadd.f32 %v6204_v0, %v1050_v56 }
 0x39c   : > { %2417 = vmatpush.msrb.mxu3 %v5943_v10  ;;  %1987 = vmatmul.f32.gmra.mxu0 %v6014_v26 }
 0x39d   : > { %2234 = vmatpush.msrb.mxu0 %v5949_v54  ;;  %2295 = vmatpush.msrb.mxu1 %v5994_v13  ;;  %v990_v40 = vpop.f32.mrf.mxu1 }
 0x39e   : > { %2372 = vmatpush.msrb.mxu2 %v2173_v5  ;;  %2419 = vmatpush.msrb.mxu3 %v5955_v7  ;;  %v881_v50 = vpop.f32.mrf.mxu0 }
 0x39f   : > { %2237 = vmatpush.msrb.mxu0 %v5973_v1  ;;  %2297 = vmatpush.msrb.mxu1 %v6017_v53  ;;  %v991_v25 = vadd.f32 %v990_v40, %v881_v50 }
 0x3a0   : > { %2376 = vmatpush.msrb.mxu2 %v2179_v34  ;;  %2421 = vmatpush.msrb.mxu3 %v5981_v57  ;;  %v1054_v61 = vpop.f32.mrf.mxu2 }
 0x3a1   : > { %2301 = vmatmul.f32.vlgmr.msrb.gmra.mxu1 %v2070_v39  ;;  %2240 = vmatpush.msrb.mxu0 %v5987_v51  ;;  %v1055_v17 = vadd.f32 %v1054_v61, %v991_v25 }
 0x3a2   : > { %2380 = vmatpush.msrb.mxu2 %v2185_v29  ;;  %2423 = vmatpush.msrb.mxu3 %v5994_v13  ;;  %v1105_v7 = vpop.f32.mrf.mxu3 }
 0x3a3   : > { %2382 = vmatmul.f32.vlgmr.msrb.gmra.mxu2 %v6042_v45  ;;  %2243 = vmatpush.msrb.mxu0 %v6012_v55  ;;  %v1106_v4 = vadd.f32 %v1105_v7, %v1055_v17 }
 0x3a4   : > { %2425 = vmatpush.msrb.mxu3 %v6017_v53 }
 0x3a5   : > { %2427 = vmatmul.f32.vlgmr.msrb.gmra.mxu3 %v6042_v45  ;;  %2246 = vmatpush.msrb.mxu0 %v6024_v60  ;;  %v1219_v10 = vpop.f32.mrf.mxu1 }
 0x3a7   : > { %2249 = vmatpush.msrb.mxu0 %v6040_v37  ;;  %v1174_v54 = vpop.f32.mrf.mxu0 }
 0x3a8   : > { %2252 = vmatmul.f32.vlgmr.msrb.gmra.mxu0 %v6060_v6  ;;  %v1268_v1 = vpop.f32.mrf.mxu2 }
 0x3a9   : > { %2307 = vmatmul.f32.gmra.mxu1 %v2078_v9 }
 0x3aa   : > { %v1385_v57 = vpop.f32.mrf.mxu3 }
 0x3ab   : > { %2386 = vmatmul.f32.gmra.mxu2 %v6080_v14 }
 0x3ad   : > { %2431 = vmatmul.f32.gmra.mxu3 %v6080_v14  ;;  %v1223_v51 = vpop.f32.mrf.mxu1 }
 0x3b0   : > { %2257 = vmatmul.f32.gmra.mxu0 %v6096_v22  ;;  %v1045_v22 = vadd.f32 %v6166_v47, %v983_v21  ;;  %v4595_v21 = vld [vmem:[%s6964_s3 + $0x20] sm:$0xff] }
 0x3b1   : > { %2313 = vmatmul.f32.gmra.mxu1 %v2086_v19 }
 0x3b2   : > { %v1276_v62 = vpop.f32.mrf.mxu2  ;;  %v1094_v23 = vadd.f32 %v6173_v49, %v1045_v22 }
 0x3b3   : > { %2390 = vmatmul.f32.gmra.mxu2 %v6115_v33 }
 0x3b4   : > { %v1178_v13 = vpop.f32.mrf.mxu0  ;;  %v1175_v9 = vadd.f32 %v1174_v54, %v1094_v23  ;;  %v2480_v23 = vand.u32 4294901760, %v4595_v21 }
 0x3b5   : > { %2435 = vmatmul.f32.gmra.mxu3 %v6115_v33  ;;  %v1389_v55 = vpop.f32.mrf.mxu3  ;;  %v1227_v26 = vpop.f32.mrf.mxu1  ;;  %v1179_v28 = vadd.f32 %v1178_v13, %v1100_v2  ;;  %v4598_v13 = vld [vmem:[%s6964_s3 + $0x38] sm:$0xff] }
 0x3b6   : > { %v1220_v33 = vadd.f32 %v1219_v10, %v1175_v9 }
 0x3b7   : > { %v1224_v16 = vadd.f32 %v1223_v51, %v1179_v28  ;;  %v2530_v28 = vsub.f32 %v4595_v21, %v2480_v23 }
 0x3b8   : > { %2262 = vmatmul.f32.gmra.mxu0 %v6131_v35  ;;  %v1269_v52 = vadd.f32 %v1268_v1, %v1220_v33 }
 0x3b9   : > { %v1277_v43 = vadd.f32 %v1276_v62, %v1224_v16  ;;  %v2531_v16 = vand.u32 4294901760, %v2530_v28 }
 0x3ba   : > { %v1386_v42 = vadd.f32 %v1385_v57, %v1269_v52 }
 0x3bb   : > { %v1390_v49 = vadd.f32 %v1389_v55, %v1277_v43  ;;  %v6271_v55 = vand.u32 4294901760, %v4598_v13  ;;  %v2532_v43 = vsub.f32 %v2530_v28, %v2531_v16 }
 0x3bc   : > { %v1284_v53 = vpop.f32.mrf.mxu2 }
 0x3bd   : > { %v1182_v24 = vpop.f32.mrf.mxu0  ;;  %2475 = vmatpush.msra.mxu0 %v6271_v55  ;;  %2592 = vmatpush.msra.mxu3 %v6271_v55 }
 0x3be   : > { %v1496_v5 = vpop.f32.mrf.mxu1  ;;  %v1183_v20 = vadd.f32 %v1182_v24, %v1106_v4 }
 0x3bf   : > { %v1393_v60 = vpop.f32.mrf.mxu3 }
 0x3c0   : > { %v1228_v31 = vadd.f32 %v1227_v26, %v1183_v20  ;;  %v4597_v26 = vld [vmem:[%s6964_s3 + $0x30] sm:$0xff]  ;;  %v2533_v20 = vand.u32 4294901760, %v2532_v43 }
 0x3c2   : > { %v1285_v0 = vadd.f32 %v1284_v53, %v1228_v31  ;;  %v2512_v53 = vsub.f32 %v4598_v13, %v6271_v55 }
 0x3c4   : > { %v1394_v7 = vadd.f32 %v1393_v60, %v1285_v0  ;;  %v6278_v60 = vand.u32 4294901760, %v4597_v26  ;;  %2558 = vmatpush.msra.mxu2 %v2512_v53 }
 0x3c6   : > { %v1577_v45 = vpop.f32.mrf.mxu2  ;;  %2477 = vmatpush.msra.mxu0 %v6278_v60  ;;  %2594 = vmatpush.msra.mxu3 %v6278_v60 }
 0x3c7   : > { %v1447_v37 = vpop.f32.mrf.mxu0 }
 0x3c8   : > { %v1502_v29 = vpop.f32.mrf.mxu1  ;;  %v1448_v15 = vadd.f32 %v1447_v37, %v1386_v42 }
 0x3c9   : > { %v1622_v34 = vpop.f32.mrf.mxu3 }
 0x3ca   : > { %v1497_v59 = vadd.f32 %v1496_v5, %v1448_v15 }
 0x3cc   : > { %v1578_v30 = vadd.f32 %v1577_v45, %v1497_v59  ;;  %v4596_v45 = vld [vmem:[%s6964_s3 + $0x28] sm:$0xff] }
 0x3ce   : > { %v1623_v61 = vadd.f32 %v1622_v34, %v1578_v30  ;;  %v2513_v34 = vand.u32 4294901760, %v2512_v53 }
 0x3d0   : > { %v1581_v39 = vpop.f32.mrf.mxu2 }
 0x3d1   : > { %v1452_v6 = vpop.f32.mrf.mxu0 }
 0x3d2   : > { %v1508_v12 = vpop.f32.mrf.mxu1  ;;  %v1453_v27 = vadd.f32 %v1452_v6, %v1390_v49  ;;  %v2478_v6 = vand.u32 4294901760, %v4596_v45 }
 0x3d3   : > { %v1626_v14 = vpop.f32.mrf.mxu3 }
 0x3d4   : > { %v1503_v40 = vadd.f32 %v1502_v29, %v1453_v27  ;;  %v2518_v29 = vsub.f32 %v4597_v26, %v6278_v60  ;;  %2479 = vmatpush.msra.mxu0 %v2478_v6  ;;  %2596 = vmatpush.msra.mxu3 %v2478_v6  ;;  %v2439_v26 = vld [vmem:[%s6964_s3] sm:$0xff] }
 0x3d6   : > { %v1582_v57 = vadd.f32 %v1581_v39, %v1503_v40  ;;  %v2519_v22 = vand.u32 4294901760, %v2518_v29  ;;  %2561 = vmatpush.msra.mxu2 %v2518_v29  ;;  %2598 = vmatpush.msra.mxu3 %v2480_v23 }
 0x3d7   : > { %2481 = vmatpush.msra.mxu0 %v2480_v23 }
 0x3d8   : > { %v1627_v5 = vadd.f32 %v1626_v14, %v1582_v57  ;;  %v2520_v33 = vsub.f32 %v2518_v29, %v2519_v22 }
 0x3d9   : > { %2627 = vmatpush.msrb.mxu0 %v2513_v34 }
 0x3da   : > { %v6234_v58 = vpop.f32.mrf.mxu2 }
 0x3db   : > { %v1788_v8 = vpop.f32.mrf.mxu1  ;;  %2631 = vmatpush.msrb.mxu0 %v2519_v22 }
 0x3dc   : > { %v1457_v63 = vpop.f32.mrf.mxu0 }
 0x3dd   : > { %v6238_v41 = vpop.f32.mrf.mxu3  ;;  %v1458_v51 = vadd.f32 %v1457_v63, %v1394_v7 }
 0x3df   : > { %v1509_v37 = vadd.f32 %v1508_v12, %v1458_v51  ;;  %v2514_v12 = vsub.f32 %v2512_v53, %v2513_v34 }
 0x3e1   : > { %v1586_v44 = vadd.f32 %v6234_v58, %v1509_v37  ;;  %v2515_v56 = vand.u32 4294901760, %v2514_v12  ;;  %v2521_v58 = vand.u32 4294901760, %v2520_v33 }
 0x3e3   : > { %2516 = vmatpush.msra.mxu1 %v2515_v56  ;;  %v1631_v17 = vadd.f32 %v6238_v41, %v1586_v44 }
 0x3e4   : > { %v1850_v18 = vpop.f32.mrf.mxu2 }
 0x3e5   : > { %v1671_v46 = vpop.f32.mrf.mxu0  ;;  %2522 = vmatpush.msra.mxu1 %v2521_v58 }
 0x3e6   : > { %v6248_v36 = vpop.f32.mrf.mxu1  ;;  %v1672_v54 = vadd.f32 %v1671_v46, %v1623_v61 }
 0x3e7   : > { %v6244_v3 = vpop.f32.mrf.mxu3 }
 0x3e8   : > { %v1789_v24 = vadd.f32 %v1788_v8, %v1672_v54  ;;  %v2524_v8 = vsub.f32 %v4596_v45, %v2478_v6  ;;  %v2440_v54 = vld [vmem:[%s6964_s3 + $0x8] sm:$0xff] }
 0x3e9   : > { %v6327_v57 = vand.u32 4294901760, %v2440_v54 }
 0x3ea   : > { %v1851_v14 = vadd.f32 %v1850_v18, %v1789_v24  ;;  %v2525_v2 = vand.u32 4294901760, %v2524_v8  ;;  %2564 = vmatpush.msra.mxu2 %v2524_v8 }
 0x3ec   : > { %v1900_v18 = vadd.f32 %v6244_v3, %v1851_v14  ;;  %v2526_v52 = vsub.f32 %v2524_v8, %v2525_v2  ;;  %2567 = vmatpush.msra.mxu2 %v2530_v28  ;;  %2635 = vmatpush.msrb.mxu0 %v2525_v2 }
 0x3ee   : > { %v6250_v48 = vpop.f32.mrf.mxu2  ;;  %v2527_v4 = vand.u32 4294901760, %v2526_v52  ;;  %2639 = vmatpush.msrb.mxu0 %v2531_v16 }
 0x3ef   : > { %v1679_v35 = vpop.f32.mrf.mxu0 }
 0x3f0   : > { %v6254_v32 = vpop.f32.mrf.mxu1  ;;  %v1680_v39 = vadd.f32 %v1679_v35, %v1627_v5  ;;  %2528 = vmatpush.msra.mxu1 %v2527_v4  ;;  %v6341_v5 = vand.u32 4294901760, %v2439_v26 }
 0x3f1   : > { %v6252_v19 = vpop.f32.mrf.mxu3 }
 0x3f2   : > { %v1793_v25 = vadd.f32 %v6248_v36, %v1680_v39  ;;  %2534 = vmatpush.msra.mxu1 %v2533_v20  ;;  %v6352_v39 = vsub.f32 %v2439_v26, %v6341_v5 }
 0x3f4   : > { %v1856_v36 = vadd.f32 %v6250_v48, %v1793_v25  ;;  %2662 = vmatpush.msrb.mxu1 %v6271_v55  ;;  %v2751_v12 = vand.u32 4294901760, %v6352_v39 }
 0x3f6   : > { %v1906_v41 = vadd.f32 %v6252_v19, %v1856_v36  ;;  %2664 = vmatpush.msrb.mxu1 %v6278_v60 }
 0x3f8   : > { %v6258_v38 = vpop.f32.mrf.mxu2  ;;  %2666 = vmatpush.msrb.mxu1 %v2478_v6 }
 0x3f9   : > { %v6256_v47 = vpop.f32.mrf.mxu0 }
 0x3fa   : > { %v1688_v15 = vadd.f32 %v6256_v47, %v1631_v17  ;;  %v2442_v47 = vld [vmem:[%s6964_s3 + $0x18] sm:$0xff]  ;;  %2668 = vmatpush.msrb.mxu1 %v2480_v23 }
 0x3fb   : > { %v6260_v11 = vpop.f32.mrf.mxu3  ;;  %v6262_v50 = vpop.f32.mrf.mxu1  ;;  %v6309_v40 = vand.u32 4294901760, %v2442_v47 }
 0x3fc   : > { %v1797_v49 = vadd.f32 %v6254_v32, %v1688_v15  ;;  %v2441_v32 = vld [vmem:[%s6964_s3 + $0x10] sm:$0xff] }
 0x3fd   : > { %2695 = vmatpush.msrb.mxu2 %v6309_v40  ;;  %v6319_v61 = vand.u32 4294901760, %v2441_v32 }
 0x3fe   : > { %v1861_v19 = vadd.f32 %v6258_v38, %v1797_v49 }
 0x3ff   : > { %2697 = vmatpush.msrb.mxu2 %v6319_v61  ;;  %v6330_v51 = vsub.f32 %v2441_v32, %v6319_v61 }
 0x400   : > { %v1912_v13 = vadd.f32 %v6260_v11, %v1861_v19  ;;  %v6345_v11 = vsub.f32 %v2440_v54, %v6327_v57 }
 0x401   : > { %2699 = vmatpush.msrb.mxu2 %v6327_v57  ;;  %v2739_v60 = vand.u32 4294901760, %v6330_v51 }
 0x403   : > { %v2740_v6 = vsub.f32 %v6330_v51, %v2739_v60  ;;  %2701 = vmatpush.msrb.mxu2 %v6341_v5 }
 0x404   : > { %v6264_v1 = vpop.f32.mrf.mxu2 }
 0x405   : > { %v1980_v10 = vpop.f32.mrf.mxu0  ;;  %v2741_v14 = vand.u32 4294901760, %v2740_v6  ;;  %v4600_v6 = vld [vmem:[%s6964_s3 + $0x48] sm:$0xff] }
 0x406   : > { %v2029_v63 = vpop.f32.mrf.mxu1  ;;  %v1981_v42 = vadd.f32 %v1980_v10, %v1900_v18 }
 0x407   : > { %v6269_v62 = vpop.f32.mrf.mxu3 }
 0x408   : > { %v2026_v59 = vadd.f32 %v6262_v50, %v1981_v42  ;;  %v6317_v50 = vsub.f32 %v2442_v47, %v6309_v40 }
 0x40a   : > { %v2075_v30 = vadd.f32 %v6264_v1, %v2026_v59  ;;  %v2733_v1 = vand.u32 4294901760, %v6317_v50 }
 0x40c   : > { %v2192_v38 = vadd.f32 %v6269_v62, %v2075_v30  ;;  %v2734_v62 = vsub.f32 %v6317_v50, %v2733_v1 }
 0x40e   : > { %v6291_v9 = vpop.f32.mrf.mxu2  ;;  %v2735_v29 = vand.u32 4294901760, %v2734_v62 }
 0x40f   : > { %v1984_v46 = vpop.f32.mrf.mxu0 }
 0x410   : > { %v2033_v3 = vpop.f32.mrf.mxu1  ;;  %v1985_v48 = vadd.f32 %v1984_v46, %v1906_v41  ;;  %2736 = vmatpush.msrb.mxu3 %v2735_v29  ;;  %v2752_v46 = vsub.f32 %v6352_v39, %v2751_v12 }
 0x411   : > { %v6295_v35 = vpop.f32.mrf.mxu3 }
 0x412   : > { %v2030_v7 = vadd.f32 %v2029_v63, %v1985_v48  ;;  %v2745_v63 = vand.u32 4294901760, %v6345_v11  ;;  %2742 = vmatpush.msrb.mxu3 %v2741_v14  ;;  %v2753_v25 = vand.u32 4294901760, %v2752_v46 }
 0x414   : > { %v2083_v37 = vadd.f32 %v6291_v9, %v2030_v7  ;;  %v2746_v22 = vsub.f32 %v6345_v11, %v2745_v63  ;;  %v4602_v7 = vld [vmem:[%s6964_s3 + $0x58] sm:$0xff] }
 0x415   : > { %v6394_v26 = vand.u32 4294901760, %v4602_v7 }
 0x416   : > { %v2196_v8 = vadd.f32 %v6295_v35, %v2083_v37  ;;  %v2747_v56 = vand.u32 4294901760, %v2746_v22 }
 0x418   : > { %v2090_v27 = vpop.f32.mrf.mxu2  ;;  %2748 = vmatpush.msrb.mxu3 %v2747_v56 }
 0x419   : > { %v1988_v31 = vpop.f32.mrf.mxu0 }
 0x41a   : > { %v1989_v45 = vadd.f32 %v1988_v31, %v1912_v13  ;;  %2754 = vmatpush.msrb.mxu3 %v2753_v25 }
 0x41b   : > { %v2199_v0 = vpop.f32.mrf.mxu3 }
 0x41c   : > { %v2034_v44 = vadd.f32 %v2033_v3, %v1989_v45 }
 0x41e   : > { %v2302_v10 = vpop.f32.mrf.mxu1  ;;  %v2091_v18 = vadd.f32 %v2090_v27, %v2034_v44 }
 0x420   : > { %v2200_v16 = vadd.f32 %v2199_v0, %v2091_v18 }
 0x425   : > { %v2253_v55 = vpop.f32.mrf.mxu0 }
 0x426   : > { %v2254_v24 = vadd.f32 %v2253_v55, %v2192_v38  ;;  %v2383_v53 = vpop.f32.mrf.mxu2  ;;  %v2308_v23 = vpop.f32.mrf.mxu1 }
 0x428   : > { %v2428_v34 = vpop.f32.mrf.mxu3  ;;  %v2303_v21 = vadd.f32 %v2302_v10, %v2254_v24  ;;  %v4601_v24 = vld [vmem:[%s6964_s3 + $0x50] sm:$0xff] }
 0x429   : > { %v6410_v29 = vand.u32 4294901760, %v4601_v24 }
 0x42a   : > { %v2384_v33 = vadd.f32 %v2383_v53, %v2303_v21 }
 0x42c   : > { %v6363_v17 = vadd.f32 %v2428_v34, %v2384_v33  ;;  %v6408_v34 = vsub.f32 %v4602_v7, %v6394_v26  ;;  %v4606_v7 = vld [vmem:[%s6964_s3 + $0x78] sm:$0xff] }
 0x42d   : > { %v2258_v9 = vpop.f32.mrf.mxu0 }
 0x42e   : > { %v2259_v2 = vadd.f32 %v2258_v9, %v2196_v8  ;;  %v2387_v28 = vpop.f32.mrf.mxu2  ;;  %v2452_v15 = vrot.slane %v6363_v17, 1  ;;  %v2314_v3 = vpop.f32.mrf.mxu1  ;;  %v2678_v48 = vsel %vm2457_vm10, %v6363_v17, 0  ;;  %v3369_v47 = vrot.slane %v6363_v17, 4  ;;  %v4599_v9 = vld [vmem:[%s6964_s3 + $0x40] sm:$0xff] }
 0x42f   : > { %v3602_v30 = vrot.slane %v6363_v17, 5  ;;  %v6392_v55 = vand.u32 4294901760, %v2678_v48  ;;  %v6423_v8 = vsub.f32 %v4601_v24, %v6410_v29  ;;  %v6447_v25 = vand.u32 4294901760, %v4599_v9  ;;  %v4605_v24 = vld [vmem:[%s6964_s3 + $0x70] sm:$0xff] }
 0x430   : > { %v2309_v58 = vadd.f32 %v2308_v23, %v2259_v2  ;;  %v2432_v52 = vpop.f32.mrf.mxu3  ;;  %v6432_v23 = vand.u32 4294901760, %v4600_v6 }
 0x431   : > { %v6420_v22 = vsub.f32 %v2678_v48, %v6392_v55 }
 0x432   : > { %v2388_v35 = vadd.f32 %v2387_v28, %v2309_v58  ;;  %v6445_v2 = vsub.f32 %v4600_v6, %v6432_v23  ;;  %v6532_v6 = vand.u32 4294901760, %v4605_v24 }
 0x433   : > { %v2704_v18 = vand.u32 4294901760, %v6420_v22 }
 0x434   : > { %v6365_v42 = vadd.f32 %v2432_v52, %v2388_v35  ;;  %v2976_v58 = vand.u32 4294901760, %v6445_v2  ;;  %v6461_v52 = vsub.f32 %v4599_v9, %v6447_v25 }
 0x435   : > { %v2263_v4 = vpop.f32.mrf.mxu0 }
 0x436   : > { %v2264_v36 = vadd.f32 %v2263_v4, %v2200_v16  ;;  %v2453_v43 = vrot.slane %v6365_v42, 1  ;;  %v3370_v20 = vrot.slane %v6365_v42, 4  ;;  %v3603_v49 = vrot.slane %v6365_v42, 5  ;;  %v2391_v31 = vpop.f32.mrf.mxu2 }
 0x437   : > { %v2680_v46 = vsel %vm2457_vm10, %v6365_v42, 0  ;;  %v2705_v4 = vsub.f32 %v6420_v22, %v2704_v18  ;;  %v3836_v48 = vrot.slane %v6365_v42, 6 }
 0x438   : > { %v2315_v59 = vadd.f32 %v2314_v3, %v2264_v36  ;;  %v2454_v41 = vsel %vm2451_vm9, %v2452_v15, %v2453_v43  ;;  %v2436_v32 = vpop.f32.mrf.mxu3  ;;  %v3371_v10 = vsel %vm397_vm0, %v3369_v47, %v3370_v20  ;;  %v3604_v54 = vsel %vm3601_vm11, %v3602_v30, %v3603_v49 }
 0x439   : > { %v2458_v27 = vsel %vm2457_vm10, %v2454_v41, 0  ;;  %v6401_v53 = vsel %vm2457_vm10, %v3371_v10, 0  ;;  %v6404_v62 = vsel %vm2457_vm10, %v3604_v54, 0  ;;  %v2706_v41 = vand.u32 4294901760, %v2705_v4 }
 0x43a   : > { %v2392_v0 = vadd.f32 %v2391_v31, %v2315_v59  ;;  %v6377_v19 = vand.u32 4294901760, %v2458_v27 }
 0x43c   : > { %v6388_v38 = vadd.f32 %v2436_v32, %v2392_v0  ;;  %2536 = vmatmul.f32.vlgmr.msra.gmra.mxu1 %v6377_v19  ;;  %v2483_v13 = vsub.f32 %v2458_v27, %v6377_v19 }
 0x43d   : > { %2812 = vmatpush.msra.mxu1 %v6309_v40 }
 0x43e   : > { %2570 = vmatmul.f32.vlgmr.msra.gmra.mxu2 %v2483_v13  ;;  %v2484_v37 = vand.u32 4294901760, %v2483_v13  ;;  %v2455_v45 = vrot.slane %v6388_v38, 1  ;;  %v3372_v15 = vrot.slane %v6388_v38, 4  ;;  %v3838_v30 = vrot.slane %v6388_v38, 6 }
 0x43f   : > { %2814 = vmatpush.msra.mxu1 %v6319_v61  ;;  %2847 = vmatpush.msra.mxu2 %v2733_v1  ;;  %v2964_v1 = vand.u32 4294901760, %v6408_v34 }
 0x440   : > { %2602 = vmatmul.f32.vlgmr.msra.gmra.mxu3 %v2484_v37  ;;  %v2485_v21 = vsub.f32 %v2483_v13, %v2484_v37  ;;  %v2456_v14 = vsel %vm2451_vm9, %v2453_v43, %v2455_v45  ;;  %v3839_v54 = vsel %vm3834_vm12, %v3836_v48, %v3838_v30  ;;  %v6519_v13 = vand.u32 4294901760, %v4606_v7  ;;  %v4609_v30 = vld [vmem:[%s6964_s3 + $0x90] sm:$0xff] }
 0x441   : > { %v2460_v44 = vsel %vm2457_vm10, %v2456_v14, 0  ;;  %2816 = vmatpush.msra.mxu1 %v6327_v57  ;;  %2851 = vmatpush.msra.mxu2 %v2739_v60  ;;  %v2970_v60 = vand.u32 4294901760, %v6423_v8  ;;  %v6526_v37 = vsel %vm2457_vm10, %v3839_v54, 0  ;;  %v4604_v14 = vld [vmem:[%s6964_s3 + $0x68] sm:$0xff] }
 0x442   : > { %v2486_v56 = vand.u32 4294901760, %v2485_v21  ;;  %v6437_v33 = vand.u32 4294901760, %v2460_v44  ;;  %2882 = vmatpush.msra.mxu3 %v6309_v40  ;;  %v6452_v40 = vand.u32 4294901760, %v2680_v46  ;;  %v6530_v45 = vsub.f32 %v4606_v7, %v6519_v13  ;;  %v4608_v7 = vld [vmem:[%s6964_s3 + $0x88] sm:$0xff] }
 0x443   : > { %2818 = vmatpush.msra.mxu1 %v6341_v5  ;;  %2855 = vmatpush.msra.mxu2 %v2745_v63  ;;  %v2965_v63 = vsub.f32 %v6408_v34, %v2964_v1 }
 0x444   : > { %2487 = vmatmul.f32.vlgmr.msra.gmra.mxu0 %v2486_v56  ;;  %2540 = vmatmul.f32.gmra.mxu1 %v6437_v33  ;;  %v2491_v28 = vsub.f32 %v2460_v44, %v6437_v33  ;;  %v6474_v36 = vsub.f32 %v2680_v46, %v6452_v40  ;;  %v6541_v44 = vand.u32 4294901760, %v4604_v14  ;;  %v6544_v46 = vsub.f32 %v4605_v24, %v6532_v6 }
 0x445   : > { %2778 = vmatpush.msra.mxu0 %v6317_v50  ;;  %2884 = vmatpush.msra.mxu3 %v6319_v61  ;;  %v2971_v50 = vsub.f32 %v6423_v8, %v2970_v60  ;;  %v2982_v61 = vand.u32 4294901760, %v6461_v52  ;;  %v3197_v9 = vand.u32 4294901760, %v6530_v45  ;;  %v2905_v56 = vrot.slane %v6365_v42, 2 }
 0x446   : > { %2575 = vmatmul.f32.gmra.mxu2 %v2491_v28  ;;  %v2492_v35 = vand.u32 4294901760, %v2491_v28  ;;  %v2712_v31 = vand.u32 4294901760, %v6474_v36  ;;  %v6670_v24 = vand.u32 4294901760, %v4608_v7 }
 0x447   : > { %2781 = vmatpush.msra.mxu0 %v6330_v51  ;;  %2859 = vmatpush.msra.mxu2 %v2751_v12  ;;  %v2966_v51 = vand.u32 4294901760, %v2965_v63  ;;  %v2977_v12 = vsub.f32 %v6445_v2, %v2976_v58  ;;  %v2972_v3 = vand.u32 4294901760, %v2971_v50  ;;  %v2983_v59 = vsub.f32 %v6461_v52, %v2982_v61 }
 0x448   : > { %2608 = vmatmul.f32.gmra.mxu3 %v2492_v35  ;;  %v2493_v16 = vsub.f32 %v2491_v28, %v2492_v35  ;;  %v3203_v63 = vand.u32 4294901760, %v6544_v46  ;;  %v6560_v35 = vsub.f32 %v4604_v14, %v6541_v44  ;;  %v2904_v50 = vrot.slane %v6363_v17, 2 }
 0x449   : > { %2886 = vmatpush.msra.mxu3 %v6327_v57  ;;  %2784 = vmatpush.msra.mxu0 %v6345_v11  ;;  %v3373_v57 = vsel %vm397_vm0, %v3370_v20, %v3372_v15  ;;  %v3605_v11 = vrot.slane %v6388_v38, 5  ;;  %v3835_v20 = vrot.slane %v6363_v17, 6  ;;  %v2984_v0 = vand.u32 4294901760, %v2983_v59 }
 0x44a   : > { %v2494_v43 = vand.u32 4294901760, %v2493_v16  ;;  %v3198_v16 = vsub.f32 %v6530_v45, %v3197_v9  ;;  %v2906_v4 = vsel %vm2903_vm13, %v2904_v50, %v2905_v56  ;;  %v3209_v15 = vand.u32 4294901760, %v6560_v35 }
 0x44b   : > { %2888 = vmatpush.msra.mxu3 %v6341_v5  ;;  %2787 = vmatpush.msra.mxu0 %v6352_v39  ;;  %v6494_v5 = vsel %vm2457_vm10, %v3373_v57, 0  ;;  %v2978_v39 = vand.u32 4294901760, %v2977_v12  ;;  %v3606_v27 = vsel %vm3601_vm11, %v3603_v49, %v3605_v11  ;;  %v3837_v32 = vsel %vm3834_vm12, %v3835_v20, %v3836_v48 }
 0x44c   : > { %2495 = vmatmul.f32.gmra.mxu0 %v2494_v43  ;;  %2670 = vmatmul.f32.vlgmr.msrb.gmra.mxu1 %v6377_v19  ;;  %v6502_v47 = vsel %vm2457_vm10, %v3606_v27, 0  ;;  %v2713_v49 = vsub.f32 %v6474_v36, %v2712_v31  ;;  %v6515_v10 = vsel %vm2457_vm10, %v3837_v32, 0  ;;  %v3204_v12 = vsub.f32 %v6544_v46, %v3203_v63 }
 0x44d   : > { %2967 = vmatpush.msrb.mxu1 %v2966_v51  ;;  %v3199_v43 = vand.u32 4294901760, %v3198_v16  ;;  %v3210_v59 = vsub.f32 %v6560_v35, %v3209_v15  ;;  %v3138_v57 = vrot.slane %v6365_v42, 3  ;;  %v6659_v32 = vand.u32 4294901760, %v4609_v30 }
 0x44e   : > { %2707 = vmatmul.f32.vlgmr.msrb.gmra.mxu2 %v2706_v41  ;;  %v2714_v21 = vand.u32 4294901760, %v2713_v49 }
 0x44f   : > { %2973 = vmatpush.msrb.mxu1 %v2972_v3  ;;  %3009 = vmatpush.msrb.mxu2 %v6408_v34  ;;  %v3211_v42 = vand.u32 4294901760, %v3210_v59 }
 0x450   : > { %2756 = vmatmul.f32.vlgmr.msrb.gmra.mxu3 %v6392_v55 }
 0x451   : > { %2979 = vmatpush.msrb.mxu1 %v2978_v39  ;;  %3012 = vmatpush.msrb.mxu2 %v6423_v8 }
 0x452   : > { %3043 = vmatpush.msrb.mxu3 %v6394_v26 }
 0x453   : > { %2985 = vmatpush.msrb.mxu1 %v2984_v0  ;;  %3015 = vmatpush.msrb.mxu2 %v6445_v2 }
 0x454   : > { %2641 = vmatmul.f32.vlgmr.msrb.gmra.mxu0 %v6377_v19  ;;  %2674 = vmatmul.f32.gmra.mxu1 %v6437_v33  ;;  %v4603_v19 = vld [vmem:[%s6964_s3 + $0x60] sm:$0xff] }
 0x455   : > { %2926 = vmatpush.msrb.mxu0 %v6394_v26  ;;  %3045 = vmatpush.msrb.mxu3 %v6410_v29  ;;  %v6554_v28 = vand.u32 4294901760, %v4603_v19 }
 0x456   : > { %2715 = vmatmul.f32.gmra.mxu2 %v2714_v21 }
 0x457   : > { %2928 = vmatpush.msrb.mxu0 %v6410_v29  ;;  %3018 = vmatpush.msrb.mxu2 %v6461_v52  ;;  %v6573_v51 = vsub.f32 %v4603_v19, %v6554_v28  ;;  %v4610_v52 = vld [vmem:[%s6964_s3 + $0x98] sm:$0xff]  ;;  %v6689_v19 = vsub.f32 %v4608_v7, %v6670_v24 }
 0x458   : > { %2760 = vmatmul.f32.gmra.mxu3 %v6452_v40 }
 0x459   : > { %3047 = vmatpush.msrb.mxu3 %v6432_v23  ;;  %2930 = vmatpush.msrb.mxu0 %v6432_v23  ;;  %v3215_v3 = vand.u32 4294901760, %v6573_v51  ;;  %v3441_v16 = vand.u32 4294901760, %v6689_v19 }
 0x45b   : > { %3049 = vmatpush.msrb.mxu3 %v6447_v25  ;;  %2932 = vmatpush.msrb.mxu0 %v6447_v25 }
 0x45c   : > { %2645 = vmatmul.f32.gmra.mxu0 %v6437_v33  ;;  %2822 = vmatmul.f32.vlgmr.msra.gmra.mxu1 %v2704_v18  ;;  %v2909_v33 = vsel %vm2457_vm10, %v2906_v4, 0  ;;  %v2907_v18 = vrot.slane %v6388_v38, 2 }
 0x45d   : > { %3113 = vmatpush.msra.mxu1 %v6394_v26  ;;  %v3205_v26 = vand.u32 4294901760, %v3204_v12  ;;  %v6593_v11 = vand.u32 4294901760, %v2909_v33 }
 0x45e   : > { %2861 = vmatmul.f32.vlgmr.msra.gmra.mxu2 %v6392_v55 }
 0x45f   : > { %3115 = vmatpush.msra.mxu1 %v6410_v29  ;;  %3159 = vmatpush.msra.mxu2 %v6519_v13  ;;  %v2908_v29 = vsel %vm2903_vm13, %v2905_v56, %v2907_v18 }
 0x460   : > { %2890 = vmatmul.f32.vlgmr.msra.gmra.mxu3 %v6392_v55  ;;  %v3137_v55 = vrot.slane %v6363_v17, 3  ;;  %v2934_v17 = vsub.f32 %v2909_v33, %v6593_v11  ;;  %v2911_v41 = vsel %vm2457_vm10, %v2908_v29, 0 }
 0x461   : > { %3117 = vmatpush.msra.mxu1 %v6432_v23  ;;  %3161 = vmatpush.msra.mxu2 %v6532_v6  ;;  %v3216_v23 = vsub.f32 %v6573_v51, %v3215_v3 }
 0x462   : > { %3200 = vmatpush.msra.mxu3 %v3199_v43  ;;  %v2935_v39 = vand.u32 4294901760, %v2934_v17 }
 0x463   : > { %3119 = vmatpush.msra.mxu1 %v6447_v25  ;;  %3163 = vmatpush.msra.mxu2 %v6541_v44  ;;  %v3139_v25 = vsel %vm3136_vm14, %v3137_v55, %v3138_v57 }
 0x464   : > { %2790 = vmatmul.f32.vlgmr.msra.gmra.mxu0 %v6420_v22  ;;  %2828 = vmatmul.f32.gmra.mxu1 %v2712_v31  ;;  %v3217_v22 = vand.u32 4294901760, %v3216_v23  ;;  %v3142_v34 = vsel %vm2457_vm10, %v3139_v25, 0  ;;  %v3140_v31 = vrot.slane %v6388_v38, 3  ;;  %v2936_v2 = vsub.f32 %v2934_v17, %v2935_v39 }
 0x465   : > { %3078 = vmatpush.msra.mxu0 %v2964_v1  ;;  %3206 = vmatpush.msra.mxu3 %v3205_v26  ;;  %v6616_v1 = vand.u32 4294901760, %v2911_v41  ;;  %v6621_v27 = vand.u32 4294901760, %v3142_v34  ;;  %v4614_v26 = vld [vmem:[%s6964_s3 + $0xb8] sm:$0xff] }
 0x466   : > { %2865 = vmatmul.f32.gmra.mxu2 %v6452_v40  ;;  %v6730_v59 = vand.u32 4294901760, %v4614_v26 }
 0x467   : > { %3082 = vmatpush.msra.mxu0 %v2970_v60  ;;  %3165 = vmatpush.msra.mxu2 %v6554_v28  ;;  %v2942_v8 = vsub.f32 %v2911_v41, %v6616_v1  ;;  %v3141_v60 = vsel %vm3136_vm14, %v3138_v57, %v3140_v31  ;;  %v6631_v38 = vsub.f32 %v3142_v34, %v6621_v27  ;;  %v4613_v57 = vld [vmem:[%s6964_s3 + $0xb0] sm:$0xff] }
 0x468   : > { %2894 = vmatmul.f32.gmra.mxu3 %v6452_v40  ;;  %v3144_v40 = vsel %vm2457_vm10, %v3141_v60, 0  ;;  %v6742_v29 = vsub.f32 %v4614_v26, %v6730_v59  ;;  %v6744_v55 = vand.u32 4294901760, %v4613_v57 }
 0x469   : > { %3212 = vmatpush.msra.mxu3 %v3211_v42  ;;  %3086 = vmatpush.msra.mxu0 %v2976_v58  ;;  %v2943_v58 = vand.u32 4294901760, %v2942_v8  ;;  %v3168_v20 = vand.u32 4294901760, %v6631_v38  ;;  %v6647_v48 = vand.u32 4294901760, %v3144_v40 }
 0x46a   : > { %v3662_v42 = vand.u32 4294901760, %v6742_v29  ;;  %v6752_v25 = vsub.f32 %v4613_v57, %v6744_v55 }
 0x46b   : > { %3218 = vmatpush.msra.mxu3 %v3217_v22  ;;  %3090 = vmatpush.msra.mxu0 %v2982_v61  ;;  %v2937_v61 = vand.u32 4294901760, %v2936_v2  ;;  %v2944_v49 = vsub.f32 %v2942_v8, %v2943_v58  ;;  %v3169_v21 = vsub.f32 %v6631_v38, %v3168_v20 }
 0x46c   : > { %2795 = vmatmul.f32.gmra.mxu0 %v6474_v36  ;;  %2987 = vmatmul.f32.vlgmr.msrb.gmra.mxu1 %v6593_v11  ;;  %v6644_v36 = vand.u32 4294901760, %v4610_v52  ;;  %v3663_v22 = vsub.f32 %v6742_v29, %v3662_v42  ;;  %v3668_v34 = vand.u32 4294901760, %v6752_v25 }
 0x46d   : > { %3276 = vmatpush.msrb.mxu1 %v6519_v13  ;;  %v3170_v12 = vand.u32 4294901760, %v3169_v21 }
 0x46e   : > { %3021 = vmatmul.f32.vlgmr.msrb.gmra.mxu2 %v2934_v17  ;;  %v6657_v0 = vsub.f32 %v4610_v52, %v6644_v36  ;;  %v4611_v17 = vld [vmem:[%s6964_s3 + $0xa0] sm:$0xff]  ;;  %v6782_v52 = vand.u32 4294901760, %v6401_v53 }
 0x46f   : > { %3278 = vmatpush.msrb.mxu1 %v6532_v6  ;;  %3311 = vmatpush.msrb.mxu2 %v3197_v9  ;;  %v6766_v31 = vand.u32 4294901760, %v4611_v17 }
 0x470   : > { %3053 = vmatmul.f32.vlgmr.msrb.gmra.mxu3 %v2935_v39  ;;  %v3429_v54 = vand.u32 4294901760, %v6657_v0  ;;  %v3664_v39 = vand.u32 4294901760, %v3663_v22 }
 0x471   : > { %3280 = vmatpush.msrb.mxu1 %v6541_v44  ;;  %3315 = vmatpush.msrb.mxu2 %v3203_v63  ;;  %v6774_v60 = vsub.f32 %v4611_v17, %v6766_v31 }
 0x472   : > { %3346 = vmatpush.msrb.mxu3 %v6519_v13  ;;  %v6668_v13 = vsub.f32 %v4609_v30, %v6659_v32  ;;  %v3430_v14 = vsub.f32 %v6657_v0, %v3429_v54  ;;  %v6802_v30 = vand.u32 4294901760, %v6494_v5 }
 0x473   : > { %3282 = vmatpush.msrb.mxu1 %v6554_v28  ;;  %3319 = vmatpush.msrb.mxu2 %v3209_v15  ;;  %v3442_v15 = vsub.f32 %v6689_v19, %v3441_v16 }
 0x474   : > { %2938 = vmatmul.f32.vlgmr.msrb.gmra.mxu0 %v2937_v61  ;;  %2991 = vmatmul.f32.gmra.mxu1 %v6616_v1  ;;  %v3435_v9 = vand.u32 4294901760, %v6668_v13  ;;  %v3431_v63 = vand.u32 4294901760, %v3430_v14 }
 0x475   : > { %3242 = vmatpush.msrb.mxu0 %v6530_v45  ;;  %3348 = vmatpush.msrb.mxu3 %v6532_v6  ;;  %v6676_v45 = vsub.f32 %v3144_v40, %v6647_v48  ;;  %v4607_v6 = vld [vmem:[%s6964_s3 + $0x80] sm:$0xff]  ;;  %v3443_v33 = vand.u32 4294901760, %v3442_v15 }
 0x476   : > { %3026 = vmatmul.f32.gmra.mxu2 %v2942_v8  ;;  %v6691_v56 = vand.u32 4294901760, %v4607_v6  ;;  %v3436_v50 = vsub.f32 %v6668_v13, %v3435_v9  ;;  %v3669_v8 = vsub.f32 %v6752_v25, %v3668_v34 }
 0x477   : > { %3245 = vmatpush.msrb.mxu0 %v6544_v46  ;;  %3323 = vmatpush.msrb.mxu2 %v3215_v3  ;;  %v2945_v46 = vand.u32 4294901760, %v2944_v49 }
 0x478   : > { %3059 = vmatmul.f32.gmra.mxu3 %v2943_v58  ;;  %v6700_v4 = vsub.f32 %v4607_v6, %v6691_v56  ;;  %v3670_v2 = vand.u32 4294901760, %v3669_v8  ;;  %v3680_v58 = vand.u32 4294901760, %v6774_v60 }
 0x479   : > { %3350 = vmatpush.msrb.mxu3 %v6541_v44  ;;  %3248 = vmatpush.msrb.mxu0 %v6560_v35  ;;  %v3176_v44 = vand.u32 4294901760, %v6676_v45  ;;  %v3437_v35 = vand.u32 4294901760, %v3436_v50 }
 0x47a   : > { %v3447_v43 = vand.u32 4294901760, %v6700_v4  ;;  %v3681_v61 = vsub.f32 %v6774_v60, %v3680_v58 }
 0x47b   : > { %3352 = vmatpush.msrb.mxu3 %v6554_v28  ;;  %3251 = vmatpush.msrb.mxu0 %v6573_v51  ;;  %v3177_v51 = vsub.f32 %v6676_v45, %v3176_v44 }
 0x47c   : > { %2946 = vmatmul.f32.gmra.mxu0 %v2945_v46  ;;  %3121 = vmatmul.f32.vlgmr.msra.gmra.mxu1 %v6593_v11  ;;  %v3448_v28 = vsub.f32 %v6700_v4, %v3447_v43 }
 0x47d   : > { %3432 = vmatpush.msra.mxu1 %v3431_v63  ;;  %v3178_v3 = vand.u32 4294901760, %v3177_v51 }
 0x47e   : > { %3171 = vmatmul.f32.vlgmr.msra.gmra.mxu2 %v3170_v12  ;;  %v3449_v18 = vand.u32 4294901760, %v3448_v28 }
 0x47f   : > { %3438 = vmatpush.msra.mxu1 %v3437_v35  ;;  %3474 = vmatpush.msra.mxu2 %v6657_v0  ;;  %v3407_v0 = vsub.f32 %v6494_v5, %v6802_v30  ;;  %v4615_v35 = vld [vmem:[%s6964_s3 + $0xc0] sm:$0xff] }
 0x480   : > { %3220 = vmatmul.f32.vlgmr.msra.gmra.mxu3 %v6621_v27  ;;  %v3862_v28 = vand.u32 4294901760, %v4615_v35 }
 0x481   : > { %3444 = vmatpush.msra.mxu1 %v3443_v33  ;;  %3477 = vmatpush.msra.mxu2 %v6668_v13  ;;  %v3408_v7 = vand.u32 4294901760, %v3407_v0  ;;  %v4618_v13 = vld [vmem:[%s6964_s3 + $0xd8] sm:$0xff] }
 0x482   : > { %3508 = vmatpush.msra.mxu3 %v6644_v36  ;;  %v3856_v21 = vand.u32 4294901760, %v4618_v13 }
 0x483   : > { %3450 = vmatpush.msra.mxu1 %v3449_v18  ;;  %3480 = vmatpush.msra.mxu2 %v6689_v19 }
 0x484   : > { %3092 = vmatmul.f32.vlgmr.msra.gmra.mxu0 %v6593_v11  ;;  %3125 = vmatmul.f32.gmra.mxu1 %v6616_v1  ;;  %v4612_v11 = vld [vmem:[%s6964_s3 + $0xa8] sm:$0xff] }
 0x485   : > { %3391 = vmatpush.msra.mxu0 %v6644_v36  ;;  %3510 = vmatpush.msra.mxu3 %v6659_v32  ;;  %v6746_v23 = vand.u32 4294901760, %v4612_v11 }
 0x486   : > { %3179 = vmatmul.f32.gmra.mxu2 %v3178_v3  ;;  %v3912_v3 = vsub.f32 %v4615_v35, %v3862_v28 }
 0x487   : > { %3393 = vmatpush.msra.mxu0 %v6659_v32  ;;  %3483 = vmatpush.msra.mxu2 %v6700_v4  ;;  %v6761_v41 = vsub.f32 %v4612_v11, %v6746_v23 }
 0x488   : > { %3224 = vmatmul.f32.gmra.mxu3 %v6647_v48 }
 0x489   : > { %3512 = vmatpush.msra.mxu3 %v6670_v24  ;;  %3395 = vmatpush.msra.mxu0 %v6670_v24 }
 0x48b   : > { %3514 = vmatpush.msra.mxu3 %v6691_v56  ;;  %3397 = vmatpush.msra.mxu0 %v6691_v56 }
 0x48c   : > { %3096 = vmatmul.f32.gmra.mxu0 %v6616_v1  ;;  %3286 = vmatmul.f32.vlgmr.msrb.gmra.mxu1 %v3168_v20  ;;  %v3674_v1 = vand.u32 4294901760, %v6761_v41  ;;  %v3682_v20 = vand.u32 4294901760, %v3681_v61 }
 0x48d   : > { %3578 = vmatpush.msrb.mxu1 %v6644_v36  ;;  %v3399_v36 = vsub.f32 %v6401_v53, %v6782_v52  ;;  %v6809_v53 = vand.u32 4294901760, %v6404_v62 }
 0x48e   : > { %3325 = vmatmul.f32.vlgmr.msrb.gmra.mxu2 %v6621_v27  ;;  %v3675_v40 = vsub.f32 %v6761_v41, %v3674_v1 }
 0x48f   : > { %3580 = vmatpush.msrb.mxu1 %v6659_v32  ;;  %3624 = vmatpush.msrb.mxu2 %v6730_v59  ;;  %v6817_v32 = vsub.f32 %v6404_v62, %v6809_v53  ;;  %v3409_v62 = vsub.f32 %v3407_v0, %v3408_v7 }
 0x490   : > { %3354 = vmatmul.f32.vlgmr.msrb.gmra.mxu3 %v6621_v27  ;;  %v3676_v27 = vand.u32 4294901760, %v3675_v40 }
 0x491   : > { %3582 = vmatpush.msrb.mxu1 %v6670_v24  ;;  %3626 = vmatpush.msrb.mxu2 %v6744_v55  ;;  %v3633_v5 = vand.u32 4294901760, %v6817_v32  ;;  %v4617_v24 = vld [vmem:[%s6964_s3 + $0xd0] sm:$0xff] }
 0x492   : > { %3665 = vmatpush.msrb.mxu3 %v3664_v39 }
 0x493   : > { %3584 = vmatpush.msrb.mxu1 %v6691_v56  ;;  %3628 = vmatpush.msrb.mxu2 %v6746_v23  ;;  %v3634_v6 = vsub.f32 %v6817_v32, %v3633_v5  ;;  %v3410_v56 = vand.u32 4294901760, %v3409_v62 }
 0x494   : > { %3254 = vmatmul.f32.vlgmr.msrb.gmra.mxu0 %v6631_v38  ;;  %3292 = vmatmul.f32.gmra.mxu1 %v3176_v44  ;;  %v3400_v38 = vand.u32 4294901760, %v3399_v36 }
 0x495   : > { %3543 = vmatpush.msrb.mxu0 %v3429_v54  ;;  %3671 = vmatpush.msrb.mxu3 %v3670_v2  ;;  %v6825_v54 = vand.u32 4294901760, %v6502_v47  ;;  %v3872_v2 = vand.u32 4294901760, %v6526_v37 }
 0x496   : > { %3329 = vmatmul.f32.gmra.mxu2 %v6647_v48 }
 0x497   : > { %3547 = vmatpush.msrb.mxu0 %v3435_v9  ;;  %3630 = vmatpush.msrb.mxu2 %v6766_v31  ;;  %v6841_v14 = vsub.f32 %v6502_v47, %v6825_v54  ;;  %v6845_v9 = vsub.f32 %v4618_v13, %v3856_v21  ;;  %v3635_v47 = vand.u32 4294901760, %v3634_v6 }
 0x498   : > { %3358 = vmatmul.f32.gmra.mxu3 %v6647_v48  ;;  %v3401_v48 = vsub.f32 %v3399_v36, %v3400_v38 }
 0x499   : > { %3677 = vmatpush.msrb.mxu3 %v3676_v27  ;;  %3551 = vmatpush.msrb.mxu0 %v3441_v16  ;;  %v3895_v46 = vand.u32 4294901760, %v6845_v9  ;;  %v3641_v50 = vand.u32 4294901760, %v6841_v14  ;;  %v4616_v16 = vld [vmem:[%s6964_s3 + $0xc8] sm:$0xff] }
 0x49a   : > { %v3402_v49 = vand.u32 4294901760, %v3401_v48  ;;  %v3860_v44 = vand.u32 4294901760, %v4616_v16 }
 0x49b   : > { %3683 = vmatpush.msrb.mxu3 %v3682_v20  ;;  %3555 = vmatpush.msrb.mxu0 %v3447_v43  ;;  %v3896_v4 = vsub.f32 %v6845_v9, %v3895_v46  ;;  %v3642_v51 = vsub.f32 %v6841_v14, %v3641_v50 }
 0x49c   : > { %3259 = vmatmul.f32.gmra.mxu0 %v6676_v45  ;;  %3452 = vmatmul.f32.vlgmr.msra.gmra.mxu1 %v6782_v52  ;;  %v3858_v45 = vand.u32 4294901760, %v4617_v24  ;;  %v3906_v33 = vsub.f32 %v4616_v16, %v3860_v44 }
 0x49d   : > { %3741 = vmatpush.msra.mxu1 %v6730_v59  ;;  %v3897_v15 = vand.u32 4294901760, %v3896_v4  ;;  %v3643_v57 = vand.u32 4294901760, %v3642_v51 }
 0x49e   : > { %3486 = vmatmul.f32.vlgmr.msra.gmra.mxu2 %v3399_v36  ;;  %v6847_v19 = vsub.f32 %v4617_v24, %v3858_v45  ;;  %v3907_v18 = vand.u32 4294901760, %v3906_v33 }
 0x49f   : > { %3743 = vmatpush.msra.mxu1 %v6744_v55  ;;  %3776 = vmatpush.msra.mxu2 %v3662_v42 }
 0x4a0   : > { %3518 = vmatmul.f32.vlgmr.msra.gmra.mxu3 %v3400_v38  ;;  %v3901_v63 = vand.u32 4294901760, %v6847_v19  ;;  %v3908_v26 = vsub.f32 %v3906_v33, %v3907_v18 }
 0x4a1   : > { %3745 = vmatpush.msra.mxu1 %v6746_v23  ;;  %3780 = vmatpush.msra.mxu2 %v3668_v34 }
 0x4a2   : > { %3811 = vmatpush.msra.mxu3 %v6730_v59  ;;  %v3902_v12 = vsub.f32 %v6847_v19, %v3901_v63  ;;  %v3913_v59 = vand.u32 4294901760, %v3912_v3  ;;  %v3909_v11 = vand.u32 4294901760, %v3908_v26 }
 0x4a3   : > { %3747 = vmatpush.msra.mxu1 %v6766_v31  ;;  %3784 = vmatpush.msra.mxu2 %v3674_v1 }
 0x4a4   : > { %3403 = vmatmul.f32.vlgmr.msra.gmra.mxu0 %v3402_v49  ;;  %3456 = vmatmul.f32.gmra.mxu1 %v6802_v30  ;;  %v3903_v43 = vand.u32 4294901760, %v3902_v12 }
 0x4a5   : > { %3707 = vmatpush.msra.mxu0 %v6742_v29  ;;  %3813 = vmatpush.msra.mxu3 %v6744_v55  ;;  %v3914_v29 = vsub.f32 %v3912_v3, %v3913_v59 }
 0x4a6   : > { %3491 = vmatmul.f32.gmra.mxu2 %v3407_v0 }
 0x4a7   : > { %3710 = vmatpush.msra.mxu0 %v6752_v25  ;;  %3788 = vmatpush.msra.mxu2 %v3680_v58  ;;  %v3915_v55 = vand.u32 4294901760, %v3914_v29 }
 0x4a8   : > { %3524 = vmatmul.f32.gmra.mxu3 %v3408_v7 }
 0x4a9   : > { %3815 = vmatpush.msra.mxu3 %v6746_v23  ;;  %3713 = vmatpush.msra.mxu0 %v6761_v41  ;;  %v3864_v41 = vand.u32 4294901760, %v6515_v10 }
 0x4ab   : > { %3817 = vmatpush.msra.mxu3 %v6766_v31  ;;  %3716 = vmatpush.msra.mxu0 %v6774_v60  ;;  %v3865_v34 = vsub.f32 %v6515_v10, %v3864_v41 }
 0x4ac   : > { %3411 = vmatmul.f32.gmra.mxu0 %v3410_v56  ;;  %3586 = vmatmul.f32.vlgmr.msrb.gmra.mxu1 %v6782_v52 }
 0x4ad   : > { %3898 = vmatpush.msrb.mxu1 %v3897_v15  ;;  %v3866_v60 = vand.u32 4294901760, %v3865_v34 }
 0x4ae   : > { %3636 = vmatmul.f32.vlgmr.msrb.gmra.mxu2 %v3635_v47 }
 0x4af   : > { %3940 = vmatpush.msrb.mxu2 %v6845_v9  ;;  %3904 = vmatpush.msrb.mxu1 %v3903_v43  ;;  %v3867_v10 = vsub.f32 %v3865_v34, %v3866_v60 }
 0x4b0   : > { %3685 = vmatmul.f32.vlgmr.msrb.gmra.mxu3 %v6809_v53 }
 0x4b1   : > { %3943 = vmatpush.msrb.mxu2 %v6847_v19  ;;  %3974 = vmatpush.msrb.mxu3 %v3856_v21 }
 0x4b2   : > { %3910 = vmatpush.msrb.mxu1 %v3909_v11 }
 0x4b3   : > { %3946 = vmatpush.msrb.mxu2 %v3906_v33  ;;  %3976 = vmatpush.msrb.mxu3 %v3858_v45 }
 0x4b4   : > { %3557 = vmatmul.f32.vlgmr.msrb.gmra.mxu0 %v6782_v52  ;;  %3590 = vmatmul.f32.gmra.mxu1 %v6802_v30  ;;  %v3873_v52 = vsub.f32 %v6526_v37, %v3872_v2 }
 0x4b5   : > { %3857 = vmatpush.msrb.mxu0 %v3856_v21  ;;  %3949 = vmatpush.msrb.mxu2 %v3912_v3 }
 0x4b6   : > { %3644 = vmatmul.f32.gmra.mxu2 %v3643_v57  ;;  %3916 = vmatpush.msrb.mxu1 %v3915_v55  ;;  %v3874_v48 = vand.u32 4294901760, %v3873_v52 }
 0x4b7   : > { %3859 = vmatpush.msrb.mxu0 %v3858_v45  ;;  %3978 = vmatpush.msrb.mxu3 %v3860_v44 }
 0x4b8   : > { %3689 = vmatmul.f32.gmra.mxu3 %v6825_v54 }
 0x4b9   : > { %v2537_v23 = vpop.f32.mrf.mxu1  ;;  %3861 = vmatpush.msrb.mxu0 %v3860_v44  ;;  %3980 = vmatpush.msrb.mxu3 %v3862_v28 }
 0x4bb   : > { %3863 = vmatpush.msrb.mxu0 %v3862_v28 }
 0x4bc   : > { %3561 = vmatmul.f32.gmra.mxu0 %v6802_v30  ;;  %3751 = vmatmul.f32.vlgmr.msra.gmra.mxu1 %v3633_v5  ;;  %v3875_v5 = vsub.f32 %v3873_v52, %v3874_v48 }
 0x4bd   : > { %4044 = vmatpush.msra.mxu1 %v3856_v21 }
 0x4be   : > { %3790 = vmatmul.f32.vlgmr.msra.gmra.mxu2 %v6809_v53 }
 0x4bf   : > { %4046 = vmatpush.msra.mxu1 %v3858_v45  ;;  %v3876_v45 = vand.u32 4294901760, %v3875_v5 }
 0x4c0   : > { %3819 = vmatmul.f32.vlgmr.msra.gmra.mxu3 %v6809_v53  ;;  %v3868_v53 = vand.u32 4294901760, %v3867_v10 }
 0x4c1   : > { %v2488_v42 = vpop.f32.mrf.mxu0  ;;  %v2541_v25 = vpop.f32.mrf.mxu1  ;;  %4048 = vmatpush.msra.mxu1 %v3860_v44 }
 0x4c2   : > { %v2571_v17 = vpop.f32.mrf.mxu2  ;;  %v2538_v31 = vadd.f32 %v2537_v23, %v2488_v42 }
 0x4c3   : > { %v2603_v22 = vpop.f32.mrf.mxu3  ;;  %4050 = vmatpush.msra.mxu1 %v3862_v28 }
 0x4c4   : > { %3719 = vmatmul.f32.vlgmr.msra.gmra.mxu0 %v6817_v32  ;;  %3757 = vmatmul.f32.gmra.mxu1 %v3641_v50  ;;  %v2572_v58 = vadd.f32 %v2571_v17, %v2538_v31 }
 0x4c5   : > { %4009 = vmatpush.msra.mxu0 %v3895_v46 }
 0x4c6   : > { %3794 = vmatmul.f32.gmra.mxu2 %v6825_v54  ;;  %v2604_v61 = vadd.f32 %v2603_v22, %v2572_v58 }
 0x4c7   : > { %4013 = vmatpush.msra.mxu0 %v3901_v63 }
 0x4c8   : > { %3823 = vmatmul.f32.gmra.mxu3 %v6825_v54 }
 0x4c9   : > { %v2496_v1 = vpop.f32.mrf.mxu0  ;;  %v2671_v39 = vpop.f32.mrf.mxu1  ;;  %4017 = vmatpush.msra.mxu0 %v3907_v18 }
 0x4ca   : > { %v2576_v8 = vpop.f32.mrf.mxu2  ;;  %v2542_v27 = vadd.f32 %v2541_v25, %v2496_v1 }
 0x4cb   : > { %v2609_v40 = vpop.f32.mrf.mxu3  ;;  %4021 = vmatpush.msra.mxu0 %v3913_v59 }
 0x4cc   : > { %3724 = vmatmul.f32.gmra.mxu0 %v6841_v14  ;;  %3918 = vmatmul.f32.vlgmr.msrb.gmra.mxu1 %v3864_v41  ;;  %v2577_v32 = vadd.f32 %v2576_v8, %v2542_v27 }
 0x4ce   : > { %3952 = vmatmul.f32.vlgmr.msrb.gmra.mxu2 %v3865_v34  ;;  %v2610_v54 = vadd.f32 %v2609_v40, %v2577_v32 }
 0x4d0   : > { %3984 = vmatmul.f32.vlgmr.msrb.gmra.mxu3 %v3866_v60 }
 0x4d1   : > { %v2642_v36 = vpop.f32.mrf.mxu0  ;;  %v2675_v20 = vpop.f32.mrf.mxu1 }
 0x4d2   : > { %v2643_v38 = vadd.f32 %v2642_v36, %v2604_v61  ;;  %v2708_v30 = vpop.f32.mrf.mxu2 }
 0x4d3   : > { %v2757_v0 = vpop.f32.mrf.mxu3 }
 0x4d4   : > { %v2672_v49 = vadd.f32 %v2671_v39, %v2643_v38  ;;  %3869 = vmatmul.f32.vlgmr.msrb.gmra.mxu0 %v3868_v53  ;;  %3922 = vmatmul.f32.gmra.mxu1 %v3872_v2 }
 0x4d6   : > { %v2709_v7 = vadd.f32 %v2708_v30, %v2672_v49  ;;  %3957 = vmatmul.f32.gmra.mxu2 %v3873_v52 }
 0x4d8   : > { %v2758_v62 = vadd.f32 %v2757_v0, %v2709_v7  ;;  %3990 = vmatmul.f32.gmra.mxu3 %v3874_v48 }
 0x4d9   : > { %v2646_v37 = vpop.f32.mrf.mxu0  ;;  %v2823_v13 = vpop.f32.mrf.mxu1 }
 0x4da   : > { %v2647_v24 = vadd.f32 %v2646_v37, %v2610_v54  ;;  %v2716_v21 = vpop.f32.mrf.mxu2 }
 0x4db   : > { %v2761_v6 = vpop.f32.mrf.mxu3 }
 0x4dc   : > { %v2676_v14 = vadd.f32 %v2675_v20, %v2647_v24  ;;  %3877 = vmatmul.f32.gmra.mxu0 %v3876_v45  ;;  %4052 = vmatmul.f32.vlgmr.msra.gmra.mxu1 %v3864_v41 }
 0x4de   : > { %v2717_v9 = vadd.f32 %v2716_v21, %v2676_v14 }
 0x4e0   : > { %v2762_v19 = vadd.f32 %v2761_v6, %v2717_v9 }
 0x4e1   : > { %v2791_v56 = vpop.f32.mrf.mxu0  ;;  %v2829_v46 = vpop.f32.mrf.mxu1 }
 0x4e2   : > { %v2792_v63 = vadd.f32 %v2791_v56, %v2758_v62  ;;  %v2862_v47 = vpop.f32.mrf.mxu2 }
 0x4e3   : > { %v2891_v50 = vpop.f32.mrf.mxu3 }
 0x4e4   : > { %v2824_v16 = vadd.f32 %v2823_v13, %v2792_v63  ;;  %4023 = vmatmul.f32.vlgmr.msra.gmra.mxu0 %v3864_v41  ;;  %4056 = vmatmul.f32.gmra.mxu1 %v3872_v2 }
 0x4e6   : > { %v2863_v4 = vadd.f32 %v2862_v47, %v2824_v16 }
 0x4e8   : > { %v2892_v12 = vadd.f32 %v2891_v50, %v2863_v4 }
 0x4e9   : > { %v2796_v44 = vpop.f32.mrf.mxu0  ;;  %v2988_v35 = vpop.f32.mrf.mxu1 }
 0x4ea   : > { %v2797_v15 = vadd.f32 %v2796_v44, %v2762_v19  ;;  %v2866_v43 = vpop.f32.mrf.mxu2 }
 0x4eb   : > { %v2895_v33 = vpop.f32.mrf.mxu3 }
 0x4ec   : > { %v2830_v28 = vadd.f32 %v2829_v46, %v2797_v15  ;;  %4027 = vmatmul.f32.gmra.mxu0 %v3872_v2 }
 0x4ee   : > { %v2867_v51 = vadd.f32 %v2866_v43, %v2830_v28 }
 0x4f0   : > { %v2896_v18 = vadd.f32 %v2895_v33, %v2867_v51 }
 0x4f1   : > { %v2939_v3 = vpop.f32.mrf.mxu0  ;;  %v2992_v26 = vpop.f32.mrf.mxu1 }
 0x4f2   : > { %v2989_v59 = vadd.f32 %v2988_v35, %v2939_v3  ;;  %v3022_v57 = vpop.f32.mrf.mxu2 }
 0x4f3   : > { %v3054_v11 = vpop.f32.mrf.mxu3 }
 0x4f4   : > { %v3023_v29 = vadd.f32 %v3022_v57, %v2989_v59 }
 0x4f6   : > { %v3055_v55 = vadd.f32 %v3054_v11, %v3023_v29 }
 0x4f9   : > { %v2947_v23 = vpop.f32.mrf.mxu0  ;;  %v3122_v42 = vpop.f32.mrf.mxu1 }
 0x4fa   : > { %v2993_v25 = vadd.f32 %v2992_v26, %v2947_v23  ;;  %v3027_v17 = vpop.f32.mrf.mxu2 }
 0x4fb   : > { %v3060_v41 = vpop.f32.mrf.mxu3 }
 0x4fc   : > { %v3028_v22 = vadd.f32 %v3027_v17, %v2993_v25 }
 0x4fe   : > { %v3061_v34 = vadd.f32 %v3060_v41, %v3028_v22 }
 0x501   : > { %v3093_v31 = vpop.f32.mrf.mxu0  ;;  %v3126_v1 = vpop.f32.mrf.mxu1 }
 0x502   : > { %v3094_v39 = vadd.f32 %v3093_v31, %v3055_v55  ;;  %v3172_v8 = vpop.f32.mrf.mxu2 }
 0x503   : > { %v3221_v60 = vpop.f32.mrf.mxu3 }
 0x504   : > { %v3123_v2 = vadd.f32 %v3122_v42, %v3094_v39  ;;  %v3222_v40 = vadd.f32 %v3221_v60, %v3172_v8 }
 0x506   : > { %v3129_v58 = vadd.f32 %v3123_v2, %v2892_v12 }
 0x509   : > { %v3097_v10 = vpop.f32.mrf.mxu0  ;;  %v3287_v52 = vpop.f32.mrf.mxu1 }
 0x50a   : > { %v3098_v61 = vadd.f32 %v3097_v10, %v3061_v34  ;;  %v3180_v27 = vpop.f32.mrf.mxu2 }
 0x50b   : > { %v3225_v36 = vpop.f32.mrf.mxu3 }
 0x50c   : > { %v3127_v20 = vadd.f32 %v3126_v1, %v3098_v61  ;;  %v3226_v38 = vadd.f32 %v3225_v36, %v3180_v27 }
 0x50e   : > { %v3130_v30 = vadd.f32 %v3127_v20, %v2896_v18 }
 0x511   : > { %v3255_v53 = vpop.f32.mrf.mxu0  ;;  %v3293_v48 = vpop.f32.mrf.mxu1 }
 0x512   : > { %v3256_v0 = vadd.f32 %v3255_v53, %v3222_v40  ;;  %v3326_v32 = vpop.f32.mrf.mxu2 }
 0x513   : > { %v3355_v49 = vpop.f32.mrf.mxu3 }
 0x514   : > { %v3288_v7 = vadd.f32 %v3287_v52, %v3256_v0 }
 0x516   : > { %v3327_v5 = vadd.f32 %v3326_v32, %v3288_v7 }
 0x518   : > { %v3356_v54 = vadd.f32 %v3355_v49, %v3327_v5 }
 0x519   : > { %v3260_v62 = vpop.f32.mrf.mxu0  ;;  %v3453_v37 = vpop.f32.mrf.mxu1 }
 0x51a   : > { %v3362_v13 = vadd.f32 %v3356_v54, %v3129_v58  ;;  %v3261_v24 = vadd.f32 %v3260_v62, %v3226_v38  ;;  %v3330_v21 = vpop.f32.mrf.mxu2 }
 0x51b   : > { %v3359_v45 = vpop.f32.mrf.mxu3 }
 0x51c   : > { %v3294_v6 = vadd.f32 %v3293_v48, %v3261_v24 }
 0x51e   : > { %v3331_v14 = vadd.f32 %v3330_v21, %v3294_v6 }
 0x520   : > { %v3360_v9 = vadd.f32 %v3359_v45, %v3331_v14 }
 0x521   : > { %v3404_v19 = vpop.f32.mrf.mxu0  ;;  %v3457_v56 = vpop.f32.mrf.mxu1 }
 0x522   : > { %v6887_v46 = vadd.f32 %v3360_v9, %v3130_v30  ;;  %v3487_v63 = vpop.f32.mrf.mxu2  ;;  %v3454_v23 = vadd.f32 %v3453_v37, %v3404_v19 }
 0x523   : > { %v3519_v47 = vpop.f32.mrf.mxu3 }
 0x524   : > { %v3488_v41 = vadd.f32 %v3487_v63, %v3454_v23 }
 0x526   : > { %v3520_v1 = vadd.f32 %v3519_v47, %v3488_v41 }
 0x529   : > { %v3412_v50 = vpop.f32.mrf.mxu0  ;;  %v3587_v16 = vpop.f32.mrf.mxu1 }
 0x52a   : > { %v3492_v4 = vpop.f32.mrf.mxu2  ;;  %v3458_v34 = vadd.f32 %v3457_v56, %v3412_v50 }
 0x52b   : > { %v3525_v12 = vpop.f32.mrf.mxu3 }
 0x52c   : > { %v3493_v10 = vadd.f32 %v3492_v4, %v3458_v34 }
 0x52e   : > { %v3526_v38 = vadd.f32 %v3525_v12, %v3493_v10 }
 0x531   : > { %v3558_v44 = vpop.f32.mrf.mxu0  ;;  %v3591_v35 = vpop.f32.mrf.mxu1 }
 0x532   : > { %v3637_v15 = vpop.f32.mrf.mxu2  ;;  %v3559_v40 = vadd.f32 %v3558_v44, %v3520_v1 }
 0x533   : > { %v3686_v43 = vpop.f32.mrf.mxu3 }
 0x534   : > { %v3687_v25 = vadd.f32 %v3686_v43, %v3637_v15  ;;  %v3588_v20 = vadd.f32 %v3587_v16, %v3559_v40  ;;  %v384_v43 = vld [vmem:[%s6967_s6 + $0x10] sm:$0xff] }
 0x536   : > { %v3594_v5 = vadd.f32 %v3588_v20, %v3362_v13 }
 0x539   : > { %v3562_v33 = vpop.f32.mrf.mxu0  ;;  %v3752_v28 = vpop.f32.mrf.mxu1 }
 0x53a   : > { %v3645_v51 = vpop.f32.mrf.mxu2  ;;  %v3563_v7 = vadd.f32 %v3562_v33, %v3526_v38  ;;  %v4121_v33 = vand.u32 4294901760, %v384_v43 }
 0x53b   : > { %v3690_v18 = vpop.f32.mrf.mxu3 }
 0x53c   : > { %v3691_v58 = vadd.f32 %v3690_v18, %v3645_v51  ;;  %v3592_v6 = vadd.f32 %v3591_v35, %v3563_v7  ;;  %v382_v35 = vld [vmem:[%s6967_s6] sm:$0xff]  ;;  %4122 = vmatpush.msra.mxu2 %v4121_v33  ;;  %4223 = vmatpush.msrb.mxu1 %v4121_v33 }
 0x53e   : > { %v3595_v50 = vadd.f32 %v3592_v6, %v6887_v46  ;;  %v4157_v46 = vsub.f32 %v384_v43, %v4121_v33 }
 0x540   : > { %4193 = vmatpush.msrb.mxu0 %v4157_v46 }
 0x541   : > { %v3720_v3 = vpop.f32.mrf.mxu0  ;;  %v3758_v26 = vpop.f32.mrf.mxu1 }
 0x542   : > { %v3791_v59 = vpop.f32.mrf.mxu2  ;;  %v3721_v22 = vadd.f32 %v3720_v3, %v3687_v25 }
 0x543   : > { %v3820_v57 = vpop.f32.mrf.mxu3 }
 0x544   : > { %v3753_v39 = vadd.f32 %v3752_v28, %v3721_v22  ;;  %v4123_v28 = vand.u32 4294901760, %v382_v35  ;;  %v383_v22 = vld [vmem:[%s6967_s6 + $0x8] sm:$0xff] }
 0x546   : > { %v3792_v52 = vadd.f32 %v3791_v59, %v3753_v39  ;;  %v4163_v18 = vsub.f32 %v382_v35, %v4123_v28  ;;  %4124 = vmatpush.msra.mxu2 %v4123_v28  ;;  %4225 = vmatpush.msrb.mxu1 %v4123_v28 }
 0x548   : > { %v3821_v30 = vadd.f32 %v3820_v57, %v3792_v52  ;;  %v4158_v57 = vand.u32 4294901760, %v4157_v46  ;;  %4196 = vmatpush.msrb.mxu0 %v4163_v18 }
 0x549   : > { %v3725_v11 = vpop.f32.mrf.mxu0  ;;  %v3919_v29 = vpop.f32.mrf.mxu1 }
 0x54a   : > { %v3795_v55 = vpop.f32.mrf.mxu2  ;;  %v3726_v61 = vadd.f32 %v3725_v11, %v3691_v58  ;;  %v3827_v37 = vadd.f32 %v3821_v30, %v3594_v5  ;;  %v4164_v11 = vand.u32 4294901760, %v4163_v18  ;;  %4256 = vmatpush.msrb.mxu2 %v4158_v57 }
 0x54b   : > { %v3824_v17 = vpop.f32.mrf.mxu3 }
 0x54c   : > { %v3759_v53 = vadd.f32 %v3758_v26, %v3726_v61  ;;  %v4165_v23 = vsub.f32 %v4163_v18, %v4164_v11  ;;  %4260 = vmatpush.msrb.mxu2 %v4164_v11 }
 0x54e   : > { %v3796_v24 = vadd.f32 %v3795_v55, %v3759_v53  ;;  %v4159_v55 = vsub.f32 %v4157_v46, %v4158_v57 }
 0x550   : > { %v3825_v19 = vadd.f32 %v3824_v17, %v3796_v24  ;;  %v4160_v25 = vand.u32 4294901760, %v4159_v55  ;;  %v4166_v17 = vand.u32 4294901760, %v4165_v23 }
 0x551   : > { %v3870_v42 = vpop.f32.mrf.mxu0  ;;  %v3923_v31 = vpop.f32.mrf.mxu1 }
 0x552   : > { %v3920_v8 = vadd.f32 %v3919_v29, %v3870_v42  ;;  %v3953_v60 = vpop.f32.mrf.mxu2  ;;  %v3828_v44 = vadd.f32 %v3825_v19, %v3595_v50  ;;  %v385_v29 = vld [vmem:[%s6967_s6 + $0x18] sm:$0xff]  ;;  %4161 = vmatpush.msra.mxu3 %v4160_v25 }
 0x553   : > { %v3985_v36 = vpop.f32.mrf.mxu3  ;;  %v6899_v42 = vand.u32 4294901760, %v385_v29 }
 0x554   : > { %v3954_v27 = vadd.f32 %v3953_v60, %v3920_v8  ;;  %4167 = vmatpush.msra.mxu3 %v4166_v17 }
 0x555   : > { %4312 = vmatpush.msra.mxu0 %v6899_v42  ;;  %v6903_v41 = vsub.f32 %v385_v29, %v6899_v42 }
 0x556   : > { %v3986_v48 = vadd.f32 %v3985_v36, %v3954_v27  ;;  %4285 = vmatpush.msrb.mxu3 %v4121_v33 }
 0x557   : > { %v4348_v1 = vand.u32 4294901760, %v6903_v41 }
 0x558   : > { %4287 = vmatpush.msrb.mxu3 %v4123_v28 }
 0x559   : > { %v3878_v2 = vpop.f32.mrf.mxu0  ;;  %v4053_v32 = vpop.f32.mrf.mxu1 }
 0x55a   : > { %v3924_v0 = vadd.f32 %v3923_v31, %v3878_v2  ;;  %v3958_v62 = vpop.f32.mrf.mxu2  ;;  %v4313_v31 = vand.u32 4294901760, %v383_v22  ;;  %v4349_v2 = vsub.f32 %v6903_v41, %v4348_v1 }
 0x55b   : > { %v3991_v9 = vpop.f32.mrf.mxu3 }
 0x55c   : > { %v3959_v21 = vadd.f32 %v3958_v62, %v3924_v0  ;;  %4314 = vmatpush.msra.mxu0 %v4313_v31  ;;  %v4353_v40 = vsub.f32 %v383_v22, %v4313_v31  ;;  %v4350_v10 = vand.u32 4294901760, %v4349_v2 }
 0x55e   : > { %v3992_v56 = vadd.f32 %v3991_v9, %v3959_v21  ;;  %v4354_v52 = vand.u32 4294901760, %v4353_v40  ;;  %4351 = vmatpush.msra.mxu1 %v4350_v10 }
 0x560   : > { %v4355_v20 = vsub.f32 %v4353_v40, %v4354_v52 }
 0x561   : > { %v4024_v49 = vpop.f32.mrf.mxu0  ;;  %v4057_v12 = vpop.f32.mrf.mxu1 }
 0x562   : > { %v4025_v54 = vadd.f32 %v4024_v49, %v3986_v48  ;;  %v4356_v30 = vand.u32 4294901760, %v4355_v20 }
 0x564   : > { %v4054_v45 = vadd.f32 %v4053_v32, %v4025_v54  ;;  %4357 = vmatpush.msra.mxu1 %v4356_v30 }
 0x566   : > { %v4060_v14 = vadd.f32 %v4054_v45, %v3827_v37 }
 0x568   : > { %v4062_v63 = vsub.f32 0.0, %v4060_v14 }
 0x569   : > { %v4028_v47 = vpop.f32.mrf.mxu0 }
 0x56a   : > { %v4064_v16 = vmul.f32 1.442695, %v4062_v63  ;;  %v4029_v4 = vadd.f32 %v4028_v47, %v3992_v56 }
 0x56c   : > { %4680 = vpow2.f32 %v4064_v16  ;;  %v4058_v13 = vadd.f32 %v4057_v12, %v4029_v4 }
 0x56e   : > { %v4061_v15 = vadd.f32 %v4058_v13, %v3828_v44 }
 0x570   : > { %v4063_v51 = vsub.f32 0.0, %v4061_v15 }
 0x572   : > { %v4681_v3 = vpop.eup %4680  ;;  %v4066_v26 = vmul.f32 1.442695, %v4063_v51 }
 0x573   : > { %v4068_v59 = vadd.f32 1.0, %v4681_v3 }
 0x574   : > { %4682 = vpow2.f32 %v4066_v26 }
 0x575   : > { %4684 = vrcp.f32 %v4068_v59  ;;  %v4081_v61 = vand.u32 2147483648, %v4068_v59  ;;  %v4079_v36 = vand.u32 2147483647, %v4068_v59  ;;  %vm4075_vm1 = vweird.f32 %v4068_v59 }
 0x577   : > { %v4082_v48 = vor.u32 1.1754944e-38, %v4081_v61  ;;  %vm4080_vm4 = vcmp.eq.f32.partialorder %v4079_v36, 8.507059e+37 }
 0x57a   : > { %v4683_v34 = vpop.eup %4682 }
 0x57b   : > { %v4685_v39 = vpop.eup %4684  ;;  %v4069_v8 = vadd.f32 1.0, %v4683_v34 }
 0x57c   : > { %v4071_v60 = vmul.f32 %v4685_v39, %v4068_v59  ;;  %vm4076_vm15 = vweird.f32 %v4685_v39 }
 0x57d   : > { %4686 = vrcp.f32 %v4069_v8  ;;  %vm4077_vm2 = vmor %vm4075_vm1, %vm4076_vm15  ;;  %v4096_v54 = vand.u32 2147483648, %v4069_v8  ;;  %v4094_v24 = vand.u32 2147483647, %v4069_v8  ;;  %vm4090_vm6 = vweird.f32 %v4069_v8 }
 0x57e   : > { %v4072_v58 = vsub.f32 1.0, %v4071_v60 }
 0x57f   : > { %v4097_v6 = vor.u32 1.1754944e-38, %v4096_v54  ;;  %vm4095_vm8 = vcmp.eq.f32.partialorder %v4094_v24, 8.507059e+37  ;;  %v387_v24 = vld [vmem:[%s6968_s7 + $0x8] sm:$0xff] }
 0x580   : > { %v4073_v27 = vmul.f32 %v4685_v39, %v4072_v58  ;;  %v388_v58 = vld [vmem:[%s6968_s7 + $0x10] sm:$0xff] }
 0x582   : > { %v4074_v38 = vadd.f32 %v4685_v39, %v4073_v27 }
 0x583   : > { %v4687_v53 = vpop.eup %4686 }
 0x584   : > { %v4078_v0 = vsel %vm4077_vm2, %v4685_v39, %v4074_v38  ;;  %v4086_v32 = vmul.f32 %v4687_v53, %v4069_v8  ;;  %vm4091_vm5 = vweird.f32 %v4687_v53 }
 0x585   : > { %v4083_v49 = vsel %vm4080_vm4, %v4082_v48, %v4078_v0  ;;  %vm4092_vm7 = vmor %vm4090_vm6, %vm4091_vm5 }
 0x586   : > { %v4102_v7 = vsel %vm4100_vm3, %v4083_v49, 0  ;;  %v4087_v5 = vsub.f32 1.0, %v4086_v32 }
 0x587   : > { %v4125_v62 = vand.u32 4294901760, %v4102_v7 }
 0x588   : > { %v4088_v37 = vmul.f32 %v4687_v53, %v4087_v5 }
 0x589   : > { %4169 = vmatmul.f32.vlgmr.msra.gmra.mxu3 %v4125_v62  ;;  %v4126_v21 = vsub.f32 %v4102_v7, %v4125_v62 }
 0x58a   : > { %v4089_v45 = vadd.f32 %v4687_v53, %v4088_v37  ;;  %4413 = vmatpush.msra.mxu3 %v6899_v42 }
 0x58b   : > { %4199 = vmatmul.f32.vlgmr.msrb.gmra.mxu0 %v4126_v21  ;;  %v4127_v14 = vand.u32 4294901760, %v4126_v21 }
 0x58c   : > { %v4093_v9 = vsel %vm4092_vm7, %v4687_v53, %v4089_v45  ;;  %4415 = vmatpush.msra.mxu3 %v4313_v31  ;;  %4446 = vmatpush.msrb.mxu0 %v4348_v1 }
 0x58d   : > { %v4098_v19 = vsel %vm4095_vm8, %v4097_v6, %v4093_v9  ;;  %4229 = vmatmul.f32.vlgmr.msrb.gmra.mxu1 %v4127_v14  ;;  %v4128_v56 = vsub.f32 %v4126_v21, %v4127_v14 }
 0x58e   : > { %v4105_v63 = vsel %vm4100_vm3, %v4098_v19, 0  ;;  %4450 = vmatpush.msrb.mxu0 %v4354_v52  ;;  %4475 = vmatpush.msrb.mxu1 %v6899_v42  ;;  %v386_v52 = vld [vmem:[%s6968_s7] sm:$0xff] }
 0x58f   : > { %v4129_v47 = vand.u32 4294901760, %v4128_v56  ;;  %v4133_v50 = vand.u32 4294901760, %v4105_v63 }
 0x590   : > { %4477 = vmatpush.msrb.mxu1 %v4313_v31 }
 0x591   : > { %4130 = vmatmul.f32.vlgmr.msra.gmra.mxu2 %v4129_v47  ;;  %4173 = vmatmul.f32.gmra.mxu3 %v4133_v50  ;;  %v4134_v16 = vsub.f32 %v4105_v63, %v4133_v50 }
 0x592   : > { %4383 = vmatpush.msra.mxu2 %v6903_v41 }
 0x593   : > { %4204 = vmatmul.f32.gmra.mxu0 %v4134_v16  ;;  %v4135_v4 = vand.u32 4294901760, %v4134_v16 }
 0x594   : > { %4386 = vmatpush.msra.mxu2 %v4353_v40 }
 0x595   : > { %4235 = vmatmul.f32.gmra.mxu1 %v4135_v4  ;;  %v4136_v12 = vsub.f32 %v4134_v16, %v4135_v4 }
 0x597   : > { %v4137_v44 = vand.u32 4294901760, %v4136_v12 }
 0x599   : > { %4138 = vmatmul.f32.gmra.mxu2 %v4137_v44  ;;  %4289 = vmatmul.f32.vlgmr.msrb.gmra.mxu3 %v4125_v62 }
 0x59b   : > { %4320 = vmatmul.f32.vlgmr.msra.gmra.mxu0 %v4129_v47 }
 0x59d   : > { %4359 = vmatmul.f32.vlgmr.msra.gmra.mxu1 %v4125_v62 }
 0x5a1   : > { %4262 = vmatmul.f32.vlgmr.msrb.gmra.mxu2 %v4125_v62  ;;  %4293 = vmatmul.f32.gmra.mxu3 %v4133_v50 }
 0x5a3   : > { %4328 = vmatmul.f32.gmra.mxu0 %v4137_v44 }
 0x5a5   : > { %4363 = vmatmul.f32.gmra.mxu1 %v4133_v50 }
 0x5a9   : > { %4266 = vmatmul.f32.gmra.mxu2 %v4133_v50  ;;  %4419 = vmatmul.f32.vlgmr.msra.gmra.mxu3 %v4127_v14 }
 0x5ab   : > { %4452 = vmatmul.f32.vlgmr.msrb.gmra.mxu0 %v4125_v62 }
 0x5ad   : > { %4479 = vmatmul.f32.vlgmr.msrb.gmra.mxu1 %v4125_v62 }
 0x5b1   : > { %4389 = vmatmul.f32.vlgmr.msra.gmra.mxu2 %v4126_v21  ;;  %4425 = vmatmul.f32.gmra.mxu3 %v4135_v4  ;;  %v389_v21 = vld [vmem:[%s6968_s7 + $0x18] sm:$0xff] }
 0x5b3   : > { %4456 = vmatmul.f32.gmra.mxu0 %v4133_v50 }
 0x5b5   : > { %4483 = vmatmul.f32.gmra.mxu1 %v4133_v50 }
 0x5b9   : > { %4394 = vmatmul.f32.gmra.mxu2 %v4134_v16 }
 0x608   : > { %v4200_v15 = vpop.f32.mrf.mxu0 }
 0x60a   : > { %v4230_v43 = vpop.f32.mrf.mxu1 }
 0x60c   : > { %v4170_v13 = vpop.f32.mrf.mxu3 }
 0x610   : > { %v4205_v28 = vpop.f32.mrf.mxu0 }
 0x612   : > { %v4236_v51 = vpop.f32.mrf.mxu1 }
 0x614   : > { %v4131_v35 = vpop.f32.mrf.mxu2  ;;  %v4174_v33 = vpop.f32.mrf.mxu3 }
 0x615   : > { %v4171_v11 = vadd.f32 %v4170_v13, %v4131_v35 }
 0x617   : > { %v4201_v25 = vadd.f32 %v4200_v15, %v4171_v11 }
 0x618   : > { %v4321_v3 = vpop.f32.mrf.mxu0 }
 0x619   : > { %v4231_v22 = vadd.f32 %v4230_v43, %v4201_v25 }
 0x61a   : > { %v4360_v26 = vpop.f32.mrf.mxu1 }
 0x61b   : > { %v4361_v31 = vadd.f32 %v4360_v26, %v4321_v3 }
 0x61c   : > { %v4139_v46 = vpop.f32.mrf.mxu2  ;;  %v4290_v18 = vpop.f32.mrf.mxu3 }
 0x61d   : > { %v4175_v57 = vadd.f32 %v4174_v33, %v4139_v46  ;;  %v7054_v33 = vld [vmem:[#allocation5_spill] sm:$0xff] }
 0x61f   : > { %v4206_v55 = vadd.f32 %v4205_v28, %v4175_v57 }
 0x620   : > { %v4329_v23 = vpop.f32.mrf.mxu0 }
 0x621   : > { %v4237_v41 = vadd.f32 %v4236_v51, %v4206_v55 }
 0x622   : > { %v4364_v17 = vpop.f32.mrf.mxu1 }
 0x623   : > { %v4365_v20 = vadd.f32 %v4364_v17, %v4329_v23 }
 0x624   : > { %v4263_v59 = vpop.f32.mrf.mxu2  ;;  %v4294_v29 = vpop.f32.mrf.mxu3 }
 0x625   : > { %v4264_v1 = vadd.f32 %v4263_v59, %v4231_v22 }
 0x627   : > { %v4291_v10 = vadd.f32 %v4290_v18, %v4264_v1 }
 0x628   : > { %v4453_v40 = vpop.f32.mrf.mxu0 }
 0x629   : > { %v4487_v38 = vmul.f32 %v4291_v10, %v386_v52 }
 0x62a   : > { %v4480_v61 = vpop.f32.mrf.mxu1 }
 0x62c   : > { %v4267_v42 = vpop.f32.mrf.mxu2  ;;  %v4420_v39 = vpop.f32.mrf.mxu3 }
 0x62d   : > { %v4268_v34 = vadd.f32 %v4267_v42, %v4237_v41 }
 0x62f   : > { %v4295_v60 = vadd.f32 %v4294_v29, %v4268_v34 }
 0x630   : > { %v4457_v7 = vpop.f32.mrf.mxu0 }
 0x631   : > { %v4489_v27 = vmul.f32 %v4295_v60, %v388_v58 }
 0x632   : > { %v4484_v37 = vpop.f32.mrf.mxu1 }
 0x633   : > { %v4491_v53 = vadd.f32 %v4489_v27, %v4487_v38 }
 0x634   : > { %v4390_v8 = vpop.f32.mrf.mxu2  ;;  %v4426_v32 = vpop.f32.mrf.mxu3 }
 0x635   : > { %v4391_v2 = vadd.f32 %v4390_v8, %v4361_v31  ;;  %v4492_v5 = vrot.slane %v4491_v53, 4 }
 0x637   : > { %v4421_v36 = vadd.f32 %v4420_v39, %v4391_v2  ;;  %v4493_v6 = vadd.f32 %v4492_v5, %v4491_v53 }
 0x639   : > { %v4454_v48 = vadd.f32 %v4453_v40, %v4421_v36  ;;  %v4494_v56 = vrot.slane %v4493_v6, 2 }
 0x63b   : > { %v4481_v54 = vadd.f32 %v4480_v61, %v4454_v48  ;;  %v4495_v50 = vadd.f32 %v4494_v56, %v4493_v6 }
 0x63c   : > { %v4395_v30 = vpop.f32.mrf.mxu2 }
 0x63d   : > { %v4396_v0 = vadd.f32 %v4395_v30, %v4365_v20  ;;  %v4488_v14 = vmul.f32 %v4481_v54, %v387_v24  ;;  %v4496_v12 = vrot.slane %v4495_v50, 1 }
 0x63f   : > { %v4427_v49 = vadd.f32 %v4426_v32, %v4396_v0  ;;  %v4497_v15 = vadd.f32 %v4496_v12, %v4495_v50 }
 0x641   : > { %v4458_v62 = vadd.f32 %v4457_v7, %v4427_v49 }
 0x643   : > { %v4485_v45 = vadd.f32 %v4484_v37, %v4458_v62 }
 0x645   : > { %v4490_v9 = vmul.f32 %v4485_v45, %v389_v21 }
 0x647   : > { %v4498_v19 = vadd.f32 %v4490_v9, %v4488_v14 }
 0x649   : > { %v4499_v63 = vrot.slane %v4498_v19, 4 }
 0x64b   : > { %v4500_v47 = vadd.f32 %v4499_v63, %v4498_v19 }
 0x64d   : > { %v4501_v16 = vrot.slane %v4500_v47, 2 }
 0x64f   : > { %v4502_v4 = vadd.f32 %v4501_v16, %v4500_v47 }
 0x651   : > { %v4503_v44 = vrot.slane %v4502_v4, 1 }
 0x653   : > { %v4504_v13 = vadd.f32 %v4503_v44, %v4502_v4 }
 0x655   : > { %v4507_v43 = vrot.slane %v4504_v13, 4 }
 0x657   : > { %v4508_v35 = vsel %vm397_vm0, %v4497_v15, %v4507_v43 }
 0x658   : > { %v4510_v28 = vmul.f32 %v4508_v35, %v7054_v33 }
 0x65a   : > { %4511 = vst [vmem:[%s298_s23] sm:$0xff] %v4510_v28 }
 0x65b   : > { %4715 = shalt.err (!%p4712_p3)
}
 0x65c   : > { %4626 = dma.vmem_to_hbm [thread:$0]  (%p4840_p5), %s4527_s24, 128, %s4529_s25, %s4513_s9  }
 0x65d PF: > { %p4632_p4 = scmp.ge.s32.totalorder %s4750_s30, 2  ;;  %s4540_s17 = sand.u32 1, %s4738_s27  }
 0x65e   : > { %s4541_s21 = scalar_lea.sflag [#allocation3], %s4540_s17 }
 0x65f   : > { %p4629_p7 = pnand %p4632_p4, %p4844_p6 }
 0x661   : > { %p4630_p8 = pneg %p4629_p7 }
 0x663   : > { %4733 = dma.done.wait (%p4630_p8), %s4541_s21, 128  }
 0x664   : > { %4735 = vsyncadd (%p4630_p8), %s4541_s21, 4294967168  ;;  %p18_p9 = scmp.ge.s32.totalorder %s4827_s11, 4   ;;  %s7055_s27 = smov %s4742_s28 }
 0x665   : > { %s7056_s28 = smov %s4746_s29  ;;  %s7057_s29 = smov %s4838_s14 }
 0x666   : > { %s7058_s30 = smov %s4827_s11  ;;  %20 = sbr.rel (!%p18_p9) target bundleno = 3 (0x3), region = 93 }
 0x66b   :  { %4547 = vsyncpa [#allocation3], 1 }
 0x66c   :  { %4549 = vsyncpa [#allocation3 + $0x1], 1 }

</bundles_post_ra>
